<compile_context>
chip_gen: v7x
topology: tpu7x:2x2x1
jax: 0.10.0
libtpu: 0.0.40
codegen_flags: <defaults>
</compile_context>

<pallas_src>
import numpy as np

import jax
import jax.numpy as jnp
from jax.experimental import pallas as pl
from jax.experimental.pallas import tpu as pltpu

_EPS = 1e-5


# ----------------------------------------------------------------------------------
# Pallas kernel: the whole ResNet6 forward for one batch element per grid step.
# ----------------------------------------------------------------------------------
def _resnet6_kernel(x_ref,
                    s1_ref, g1_ref, b1_ref,
                    sa1_ref, ga1_ref, ba1_ref, gs1_ref, bs1_ref, sb1_ref, gb1_ref, bb1_ref,
                    sa2_ref, ga2_ref, ba2_ref, gs2_ref, bs2_ref, sb2_ref, gb2_ref, bb2_ref,
                    pool_ref, khead_ref, bhead_ref,
                    o_ref):
    def dot(a, b):
        return jnp.dot(a, b, preferred_element_type=jnp.float32)

    x = x_ref[0]                                            # (32, 32*3) slab

    # conv1 (5x5, stride 1, no pad, bias) + bn1 + relu   -> (28, 28*6)
    acc = dot(dot(s1_ref[0], x), g1_ref[0])
    for di in range(1, 5):
        acc = acc + dot(dot(s1_ref[di], x), g1_ref[di])
    y = jnp.maximum(acc + b1_ref[...], 0.0)

    def basic_block(a, sa, ga, ba, gs, bs, sb, gb, bb):
        # conv1: 3x3 stride 2 pad 1 (+bn+relu); shortcut: fused 1x1 stride 2 (+bn);
        # conv2: 3x3 stride 1 pad 1 (+bn); residual add; relu.
        r = [dot(sa[di], a) for di in range(3)]             # strided row gathers
        a1 = dot(r[0], ga[0]) + dot(r[1], ga[1]) + dot(r[2], ga[2])
        y1 = jnp.maximum(a1 + ba[...], 0.0)
        sc = dot(r[1], gs[...]) + bs[...]                   # r[1] == rows 2*oh (shortcut)
        a2 = (dot(dot(sb[0], y1), gb[0]) +
              dot(dot(sb[1], y1), gb[1]) +
              dot(dot(sb[2], y1), gb[2]))
        return jnp.maximum(a2 + bb[...] + sc, 0.0)

    y = basic_block(y, sa1_ref, ga1_ref, ba1_ref, gs1_ref, bs1_ref,
                    sb1_ref, gb1_ref, bb1_ref)              # (14, 14*16)
    y = basic_block(y, sa2_ref, ga2_ref, ba2_ref, gs2_ref, bs2_ref,
                    sb2_ref, gb2_ref, bb2_ref)              # (7, 7*32)

    # avg_pool2d(4) (top-left 4x4 of the 7x7 map) + linear, folded into 2 matmuls.
    logits = dot(dot(pool_ref[...], y), khead_ref[...]) + bhead_ref[...]   # (1, ncls)
    o_ref[0] = logits


# ----------------------------------------------------------------------------------
# Host-side (numpy) parameter preprocessing — done once, outside the jitted forward.
# ----------------------------------------------------------------------------------
def _fold_bn(gamma, beta, mean, var, conv_bias=None):
    scale = gamma / np.sqrt(var + _EPS)
    bias = np.zeros_like(gamma) if conv_bias is None else conv_bias
    shift = (bias - mean) * scale + beta
    return scale.astype(np.float32), shift.astype(np.float32)


def _sel_rows(h_out, h_in, kh, stride, pad):
    """S[di] (h_out, h_in): S[di][oh, stride*oh + di - pad] = 1 (zero row = H zero-pad)."""
    s = np.zeros((kh, h_out, h_in), np.float32)
    for di in range(kh):
        for oh in range(h_out):
            h = stride * oh + di - pad
            if 0 <= h < h_in:
                s[di, oh, h] = 1.0
    return s


def _conv_cols(w, scale, w_out, w_in, stride, pad):
    """G[di] (w_in*Cin, w_out*Cout): G[di][wi*Cin+c, ow*Cout+o] = w[o,c,di,dj]*scale[o],
    wi = stride*ow + dj - pad (out-of-range taps dropped == W zero-pad)."""
    o_, c_, kh, kw = w.shape
    ws = np.asarray(w, np.float32) * np.asarray(scale, np.float32)[:, None, None, None]
    g = np.zeros((kh, w_in * c_, w_out * o_), np.float32)
    for di in range(kh):
        for dj in range(kw):
            for ow in range(w_out):
                wi = stride * ow + dj - pad
                if 0 <= wi < w_in:
                    g[di, wi * c_:(wi + 1) * c_, ow * o_:(ow + 1) * o_] += ws[:, :, di, dj].T
    return g


def _tile_shift(shift, w_out):
    return np.tile(np.asarray(shift, np.float32), w_out)[None, :]   # (1, w_out*C)


def prepare_operands(params):
    """Build all kernel operands (S / G / tiled-shift / head matrices) from the
    PyTorch-layout parameters.  Hoisted out of the per-forward path."""
    p = jax.tree_util.tree_map(lambda a: np.asarray(a, np.float32), params)
    ops = []

    # conv1: 5x5, stride 1, no pad, 3->6 ch, 32->28 spatial (+ bn1, conv bias folded)
    sc, sh = _fold_bn(**p['bn1'], conv_bias=p['conv1_b'])
    ops += [_sel_rows(28, 32, 5, 1, 0),
            _conv_cols(p['conv1_w'], sc, 28, 32, 1, 0),
            _tile_shift(sh, 28)]

    def block_ops(bp, h_in, h_out):
        c1s, c1h = _fold_bn(**bp['bn1'])
        c2s, c2h = _fold_bn(**bp['bn2'])
        scs, sch = _fold_bn(**bp['bns'])
        return [
            _sel_rows(h_out, h_in, 3, 2, 1),                  # conv1 rows (stride 2, pad 1)
            _conv_cols(bp['w1'], c1s, h_out, h_in, 2, 1),
            _tile_shift(c1h, h_out),
            _conv_cols(bp['ws'], scs, h_out, h_in, 2, 0)[0],  # 1x1 stride-2 shortcut
            _tile_shift(sch, h_out),
            _sel_rows(h_out, h_out, 3, 1, 1),                 # conv2 rows (stride 1, pad 1)
            _conv_cols(bp['w2'], c2s, h_out, h_out, 1, 1),
            _tile_shift(c2h, h_out),
        ]

    ops += block_ops(p['l1'], 28, 14)                         # 6 -> 16, 28x28 -> 14x14
    ops += block_ops(p['l2'], 14, 7)                          # 16 -> 32, 14x14 -> 7x7

    # Head: avg_pool2d(4) keeps only the top-left 4x4 of the 7x7 map (PyTorch floor),
    # folded with 1/16 and the Linear layer into (1,7) and (7*32, ncls) matrices.
    ncls, c_out = p['lin_w'].shape
    pool_rows = np.zeros((1, 7), np.float32)
    pool_rows[0, :4] = 1.0
    khead = np.zeros((7 * c_out, ncls), np.float32)
    for w in range(4):
        khead[w * c_out:(w + 1) * c_out, :] = p['lin_w'].T / 16.0
    ops += [pool_rows, khead, p['lin_b'][None, :].astype(np.float32)]

    return tuple(jnp.asarray(a) for a in ops)


# ----------------------------------------------------------------------------------
# Forward wrapper: one pallas_call for the whole network.
# ----------------------------------------------------------------------------------
def resnet6_forward(x_nchw, operands):
    n = x_nchw.shape[0]
    ncls = operands[-1].shape[1]

    # NCHW -> per-element (H, W*C) slabs (channel fastest along lanes).
    x = jnp.transpose(x_nchw.astype(jnp.float32), (0, 2, 3, 1)).reshape(n, 32, 32 * 3)

    def whole_spec(a):
        nd = a.ndim
        return pl.BlockSpec(a.shape, lambda i: (0,) * nd)     # resident, not re-fetched

    in_specs = [pl.BlockSpec((1, 32, 96), lambda i: (i, 0, 0))]
    in_specs += [whole_spec(a) for a in operands]

    out = pl.pallas_call(
        _resnet6_kernel,
        grid=(n,),
        out_shape=jax.ShapeDtypeStruct((n, 1, ncls), jnp.float32),
        in_specs=in_specs,
        out_specs=pl.BlockSpec((1, 1, ncls), lambda i: (i, 0, 0)),
        compiler_params=pltpu.CompilerParams(
            dimension_semantics=("parallel",),
            vmem_limit_bytes=32 * 1024 * 1024,
        ),
    )(x, *operands)
    return out.reshape(n, ncls)


# ----------------------------------------------------------------------------------
# Plain-JAX reference (inference-mode BN), used only for a self-check.
# ----------------------------------------------------------------------------------
def _reference_forward(x_nchw, p):
    def conv(x, w, stride, pad, bias=None):
        y = jax.lax.conv_general_dilated(
            x, w, window_strides=(stride, stride),
            padding=[(pad, pad), (pad, pad)],
            dimension_numbers=("NCHW", "OIHW", "NCHW"),
            precision=jax.lax.Precision.HIGHEST)
        if bias is not None:
            y = y + bias[None, :, None, None]
        return y

    def bn(x, b):
        scale = b['gamma'] / jnp.sqrt(b['var'] + _EPS)
        return (x - b['mean'][None, :, None, None]) * scale[None, :, None, None] \
            + b['beta'][None, :, None, None]

    def block(x, bp, stride):
        h = jax.nn.relu(bn(conv(x, bp['w1'], stride, 1), bp['bn1']))
        h = bn(conv(h, bp['w2'], 1, 1), bp['bn2'])
        s = bn(conv(x, bp['ws'], stride, 0), bp['bns'])
        return jax.nn.relu(h + s)

    y = jax.nn.relu(bn(conv(x_nchw.astype(jnp.float32), p['conv1_w'], 1, 0,
                            p['conv1_b']), p['bn1']))
    y = block(y, p['l1'], 2)
    y = block(y, p['l2'], 2)
    pooled = jnp.mean(y[:, :, :4, :4], axis=(2, 3))           # F.avg_pool2d(., 4) on 7x7
    return pooled @ p['lin_w'].T + p['lin_b']


# ----------------------------------------------------------------------------------
# Deterministic parameter init (PyTorch layouts).
# ----------------------------------------------------------------------------------
def init_params(key, num_classes=10):
    keys = iter(jax.random.split(key, 64))

    def nrm(shape, s=0.1):
        return s * jax.random.normal(next(keys), shape, jnp.float32)

    def bn(c):
        return dict(gamma=1.0 + nrm((c,)), beta=nrm((c,)), mean=nrm((c,)),
                    var=0.5 + jax.random.uniform(next(keys), (c,), jnp.float32))

    def block(cin, cout):
        return dict(w1=nrm((cout, cin, 3, 3)), bn1=bn(cout),
                    w2=nrm((cout, cout, 3, 3)), bn2=bn(cout),
                    ws=nrm((cout, cin, 1, 1)), bns=bn(cout))

    p = {}
    p['conv1_w'] = nrm((6, 3, 5, 5))
    p['conv1_b'] = nrm((6,))
    p['bn1'] = bn(6)
    p['l1'] = block(6, 16)
    p['l2'] = block(16, 32)
    p['lin_w'] = nrm((num_classes, 32))
    p['lin_b'] = nrm((num_classes,))
    return p


if __name__ == "__main__":
    key = jax.random.PRNGKey(0)
    k_x, k_p = jax.random.split(key)
    x = jax.random.normal(k_x, (2, 3, 32, 32), jnp.float32)   # NCHW, like the PyTorch module
    params = init_params(k_p, num_classes=10)

    operands = prepare_operands(params)                       # hoisted param prep (host, once)

    fwd = jax.jit(resnet6_forward)
    out = jax.block_until_ready(fwd(x, operands))
    assert out.shape == (2, 10) and out.dtype == jnp.float32

    ref = jax.block_until_ready(_reference_forward(x, params))
    np.testing.assert_allclose(np.asarray(out), np.asarray(ref), rtol=5e-2, atol=5e-2)

    print("KERNEL_OK")
</pallas_src>

<mosaic_0001>
module attributes {stable_mosaic.version = 11 : i64} {
  func.func @_resnet6_kernel(%arg0: i32, %arg1: memref<1x32x96xf32, #tpu.memory_space<vmem>>, %arg2: memref<5x28x32xf32, #tpu.memory_space<vmem>>, %arg3: memref<5x96x168xf32, #tpu.memory_space<vmem>>, %arg4: memref<1x168xf32, #tpu.memory_space<vmem>>, %arg5: memref<3x14x28xf32, #tpu.memory_space<vmem>>, %arg6: memref<3x168x224xf32, #tpu.memory_space<vmem>>, %arg7: memref<1x224xf32, #tpu.memory_space<vmem>>, %arg8: memref<168x224xf32, #tpu.memory_space<vmem>>, %arg9: memref<1x224xf32, #tpu.memory_space<vmem>>, %arg10: memref<3x14x14xf32, #tpu.memory_space<vmem>>, %arg11: memref<3x224x224xf32, #tpu.memory_space<vmem>>, %arg12: memref<1x224xf32, #tpu.memory_space<vmem>>, %arg13: memref<3x7x14xf32, #tpu.memory_space<vmem>>, %arg14: memref<3x224x224xf32, #tpu.memory_space<vmem>>, %arg15: memref<1x224xf32, #tpu.memory_space<vmem>>, %arg16: memref<224x224xf32, #tpu.memory_space<vmem>>, %arg17: memref<1x224xf32, #tpu.memory_space<vmem>>, %arg18: memref<3x7x7xf32, #tpu.memory_space<vmem>>, %arg19: memref<3x224x224xf32, #tpu.memory_space<vmem>>, %arg20: memref<1x224xf32, #tpu.memory_space<vmem>>, %arg21: memref<1x7xf32, #tpu.memory_space<vmem>>, %arg22: memref<224x10xf32, #tpu.memory_space<vmem>>, %arg23: memref<1x10xf32, #tpu.memory_space<vmem>>, %arg24: memref<1x1x10xf32, #tpu.memory_space<vmem>>) attributes {dimension_semantics = [#tpu.dimension_semantics<parallel>], iteration_bounds = array<i64: 2>, scalar_prefetch = 0 : i64, scratch_operands = 0 : i64, tpu.core_type = #tpu.core_type<tc>, window_params = [{transform_indices = @transform_0, window_bounds = array<i64: 1, 32, 96>}, {pipeline_mode = #tpu.pipeline_mode<synchronous>, transform_indices = @transform_1, window_bounds = array<i64: 5, 28, 32>}, {pipeline_mode = #tpu.pipeline_mode<synchronous>, transform_indices = @transform_2, window_bounds = array<i64: 5, 96, 168>}, {pipeline_mode = #tpu.pipeline_mode<synchronous>, transform_indices = @transform_3, window_bounds = array<i64: 1, 168>}, {pipeline_mode = #tpu.pipeline_mode<synchronous>, transform_indices = @transform_4, window_bounds = array<i64: 3, 14, 28>}, {pipeline_mode = #tpu.pipeline_mode<synchronous>, transform_indices = @transform_5, window_bounds = array<i64: 3, 168, 224>}, {pipeline_mode = #tpu.pipeline_mode<synchronous>, transform_indices = @transform_6, window_bounds = array<i64: 1, 224>}, {pipeline_mode = #tpu.pipeline_mode<synchronous>, transform_indices = @transform_7, window_bounds = array<i64: 168, 224>}, {pipeline_mode = #tpu.pipeline_mode<synchronous>, transform_indices = @transform_8, window_bounds = array<i64: 1, 224>}, {pipeline_mode = #tpu.pipeline_mode<synchronous>, transform_indices = @transform_9, window_bounds = array<i64: 3, 14, 14>}, {pipeline_mode = #tpu.pipeline_mode<synchronous>, transform_indices = @transform_10, window_bounds = array<i64: 3, 224, 224>}, {pipeline_mode = #tpu.pipeline_mode<synchronous>, transform_indices = @transform_11, window_bounds = array<i64: 1, 224>}, {pipeline_mode = #tpu.pipeline_mode<synchronous>, transform_indices = @transform_12, window_bounds = array<i64: 3, 7, 14>}, {pipeline_mode = #tpu.pipeline_mode<synchronous>, transform_indices = @transform_13, window_bounds = array<i64: 3, 224, 224>}, {pipeline_mode = #tpu.pipeline_mode<synchronous>, transform_indices = @transform_14, window_bounds = array<i64: 1, 224>}, {pipeline_mode = #tpu.pipeline_mode<synchronous>, transform_indices = @transform_15, window_bounds = array<i64: 224, 224>}, {pipeline_mode = #tpu.pipeline_mode<synchronous>, transform_indices = @transform_16, window_bounds = array<i64: 1, 224>}, {pipeline_mode = #tpu.pipeline_mode<synchronous>, transform_indices = @transform_17, window_bounds = array<i64: 3, 7, 7>}, {pipeline_mode = #tpu.pipeline_mode<synchronous>, transform_indices = @transform_18, window_bounds = array<i64: 3, 224, 224>}, {pipeline_mode = #tpu.pipeline_mode<synchronous>, transform_indices = @transform_19, window_bounds = array<i64: 1, 224>}, {pipeline_mode = #tpu.pipeline_mode<synchronous>, transform_indices = @transform_20, window_bounds = array<i64: 1, 7>}, {pipeline_mode = #tpu.pipeline_mode<synchronous>, transform_indices = @transform_21, window_bounds = array<i64: 224, 10>}, {pipeline_mode = #tpu.pipeline_mode<synchronous>, transform_indices = @transform_22, window_bounds = array<i64: 1, 10>}, {transform_indices = @transform_23, window_bounds = array<i64: 1, 1, 10>}]} {
    %c0 = arith.constant 0 : index
    %c0_0 = arith.constant 0 : index
    %c0_1 = arith.constant 0 : index
    %0 = vector.load %arg1[%c0, %c0_0, %c0_1] : memref<1x32x96xf32, #tpu.memory_space<vmem>>, vector<1x32x96xf32>
    %1 = vector.shape_cast %0 : vector<1x32x96xf32> to vector<32x96xf32>
    %c0_2 = arith.constant 0 : index
    %c0_3 = arith.constant 0 : index
    %c0_4 = arith.constant 0 : index
    %2 = vector.load %arg2[%c0_2, %c0_3, %c0_4] : memref<5x28x32xf32, #tpu.memory_space<vmem>>, vector<1x28x32xf32>
    %3 = vector.shape_cast %2 : vector<1x28x32xf32> to vector<28x32xf32>
    %cst = arith.constant dense<0.000000e+00> : vector<28x96xf32>
    %4 = tpu.matmul %3, %1, %cst {dimension_numbers = #tpu.dot_dimension_numbers<[1], [0], [0], [1], [0, 0, 1, 1], [], []>} : vector<28x32xf32>, vector<32x96xf32>, vector<28x96xf32> -> vector<28x96xf32>
    %c0_5 = arith.constant 0 : index
    %c0_6 = arith.constant 0 : index
    %c0_7 = arith.constant 0 : index
    %5 = vector.load %arg3[%c0_5, %c0_6, %c0_7] : memref<5x96x168xf32, #tpu.memory_space<vmem>>, vector<1x96x168xf32>
    %6 = vector.shape_cast %5 : vector<1x96x168xf32> to vector<96x168xf32>
    %cst_8 = arith.constant dense<0.000000e+00> : vector<28x168xf32>
    %7 = tpu.matmul %4, %6, %cst_8 {dimension_numbers = #tpu.dot_dimension_numbers<[1], [0], [0], [1], [0, 0, 1, 1], [], []>} : vector<28x96xf32>, vector<96x168xf32>, vector<28x168xf32> -> vector<28x168xf32>
    %c1 = arith.constant 1 : index
    %c0_9 = arith.constant 0 : index
    %c0_10 = arith.constant 0 : index
    %8 = vector.load %arg2[%c1, %c0_9, %c0_10] : memref<5x28x32xf32, #tpu.memory_space<vmem>>, vector<1x28x32xf32>
    %9 = vector.shape_cast %8 : vector<1x28x32xf32> to vector<28x32xf32>
    %cst_11 = arith.constant dense<0.000000e+00> : vector<28x96xf32>
    %10 = tpu.matmul %9, %1, %cst_11 {dimension_numbers = #tpu.dot_dimension_numbers<[1], [0], [0], [1], [0, 0, 1, 1], [], []>} : vector<28x32xf32>, vector<32x96xf32>, vector<28x96xf32> -> vector<28x96xf32>
    %c1_12 = arith.constant 1 : index
    %c0_13 = arith.constant 0 : index
    %c0_14 = arith.constant 0 : index
    %11 = vector.load %arg3[%c1_12, %c0_13, %c0_14] : memref<5x96x168xf32, #tpu.memory_space<vmem>>, vector<1x96x168xf32>
    %12 = vector.shape_cast %11 : vector<1x96x168xf32> to vector<96x168xf32>
    %cst_15 = arith.constant dense<0.000000e+00> : vector<28x168xf32>
    %13 = tpu.matmul %10, %12, %cst_15 {dimension_numbers = #tpu.dot_dimension_numbers<[1], [0], [0], [1], [0, 0, 1, 1], [], []>} : vector<28x96xf32>, vector<96x168xf32>, vector<28x168xf32> -> vector<28x168xf32>
    %14 = arith.addf %7, %13 : vector<28x168xf32>
    %c2 = arith.constant 2 : index
    %c0_16 = arith.constant 0 : index
    %c0_17 = arith.constant 0 : index
    %15 = vector.load %arg2[%c2, %c0_16, %c0_17] : memref<5x28x32xf32, #tpu.memory_space<vmem>>, vector<1x28x32xf32>
    %16 = vector.shape_cast %15 : vector<1x28x32xf32> to vector<28x32xf32>
    %cst_18 = arith.constant dense<0.000000e+00> : vector<28x96xf32>
    %17 = tpu.matmul %16, %1, %cst_18 {dimension_numbers = #tpu.dot_dimension_numbers<[1], [0], [0], [1], [0, 0, 1, 1], [], []>} : vector<28x32xf32>, vector<32x96xf32>, vector<28x96xf32> -> vector<28x96xf32>
    %c2_19 = arith.constant 2 : index
    %c0_20 = arith.constant 0 : index
    %c0_21 = arith.constant 0 : index
    %18 = vector.load %arg3[%c2_19, %c0_20, %c0_21] : memref<5x96x168xf32, #tpu.memory_space<vmem>>, vector<1x96x168xf32>
    %19 = vector.shape_cast %18 : vector<1x96x168xf32> to vector<96x168xf32>
    %cst_22 = arith.constant dense<0.000000e+00> : vector<28x168xf32>
    %20 = tpu.matmul %17, %19, %cst_22 {dimension_numbers = #tpu.dot_dimension_numbers<[1], [0], [0], [1], [0, 0, 1, 1], [], []>} : vector<28x96xf32>, vector<96x168xf32>, vector<28x168xf32> -> vector<28x168xf32>
    %21 = arith.addf %14, %20 : vector<28x168xf32>
    %c3 = arith.constant 3 : index
    %c0_23 = arith.constant 0 : index
    %c0_24 = arith.constant 0 : index
    %22 = vector.load %arg2[%c3, %c0_23, %c0_24] : memref<5x28x32xf32, #tpu.memory_space<vmem>>, vector<1x28x32xf32>
    %23 = vector.shape_cast %22 : vector<1x28x32xf32> to vector<28x32xf32>
    %cst_25 = arith.constant dense<0.000000e+00> : vector<28x96xf32>
    %24 = tpu.matmul %23, %1, %cst_25 {dimension_numbers = #tpu.dot_dimension_numbers<[1], [0], [0], [1], [0, 0, 1, 1], [], []>} : vector<28x32xf32>, vector<32x96xf32>, vector<28x96xf32> -> vector<28x96xf32>
    %c3_26 = arith.constant 3 : index
    %c0_27 = arith.constant 0 : index
    %c0_28 = arith.constant 0 : index
    %25 = vector.load %arg3[%c3_26, %c0_27, %c0_28] : memref<5x96x168xf32, #tpu.memory_space<vmem>>, vector<1x96x168xf32>
    %26 = vector.shape_cast %25 : vector<1x96x168xf32> to vector<96x168xf32>
    %cst_29 = arith.constant dense<0.000000e+00> : vector<28x168xf32>
    %27 = tpu.matmul %24, %26, %cst_29 {dimension_numbers = #tpu.dot_dimension_numbers<[1], [0], [0], [1], [0, 0, 1, 1], [], []>} : vector<28x96xf32>, vector<96x168xf32>, vector<28x168xf32> -> vector<28x168xf32>
    %28 = arith.addf %21, %27 : vector<28x168xf32>
    %c4 = arith.constant 4 : index
    %c0_30 = arith.constant 0 : index
    %c0_31 = arith.constant 0 : index
    %29 = vector.load %arg2[%c4, %c0_30, %c0_31] : memref<5x28x32xf32, #tpu.memory_space<vmem>>, vector<1x28x32xf32>
    %30 = vector.shape_cast %29 : vector<1x28x32xf32> to vector<28x32xf32>
    %cst_32 = arith.constant dense<0.000000e+00> : vector<28x96xf32>
    %31 = tpu.matmul %30, %1, %cst_32 {dimension_numbers = #tpu.dot_dimension_numbers<[1], [0], [0], [1], [0, 0, 1, 1], [], []>} : vector<28x32xf32>, vector<32x96xf32>, vector<28x96xf32> -> vector<28x96xf32>
    %c4_33 = arith.constant 4 : index
    %c0_34 = arith.constant 0 : index
    %c0_35 = arith.constant 0 : index
    %32 = vector.load %arg3[%c4_33, %c0_34, %c0_35] : memref<5x96x168xf32, #tpu.memory_space<vmem>>, vector<1x96x168xf32>
    %33 = vector.shape_cast %32 : vector<1x96x168xf32> to vector<96x168xf32>
    %cst_36 = arith.constant dense<0.000000e+00> : vector<28x168xf32>
    %34 = tpu.matmul %31, %33, %cst_36 {dimension_numbers = #tpu.dot_dimension_numbers<[1], [0], [0], [1], [0, 0, 1, 1], [], []>} : vector<28x96xf32>, vector<96x168xf32>, vector<28x168xf32> -> vector<28x168xf32>
    %35 = arith.addf %28, %34 : vector<28x168xf32>
    %c0_37 = arith.constant 0 : index
    %c0_38 = arith.constant 0 : index
    %36 = vector.load %arg4[%c0_37, %c0_38] : memref<1x168xf32, #tpu.memory_space<vmem>>, vector<1x168xf32>
    %37 = vector.broadcast %36 : vector<1x168xf32> to vector<28x168xf32>
    %38 = arith.addf %35, %37 : vector<28x168xf32>
    %cst_39 = arith.constant 0.000000e+00 : f32
    %39 = vector.broadcast %cst_39 : f32 to vector<28x168xf32>
    %40 = arith.maximumf %38, %39 : vector<28x168xf32>
    %c0_40 = arith.constant 0 : index
    %c0_41 = arith.constant 0 : index
    %c0_42 = arith.constant 0 : index
    %41 = vector.load %arg5[%c0_40, %c0_41, %c0_42] : memref<3x14x28xf32, #tpu.memory_space<vmem>>, vector<1x14x28xf32>
    %42 = vector.shape_cast %41 : vector<1x14x28xf32> to vector<14x28xf32>
    %cst_43 = arith.constant dense<0.000000e+00> : vector<14x168xf32>
    %43 = tpu.matmul %42, %40, %cst_43 {dimension_numbers = #tpu.dot_dimension_numbers<[1], [0], [0], [1], [0, 0, 1, 1], [], []>} : vector<14x28xf32>, vector<28x168xf32>, vector<14x168xf32> -> vector<14x168xf32>
    %c1_44 = arith.constant 1 : index
    %c0_45 = arith.constant 0 : index
    %c0_46 = arith.constant 0 : index
    %44 = vector.load %arg5[%c1_44, %c0_45, %c0_46] : memref<3x14x28xf32, #tpu.memory_space<vmem>>, vector<1x14x28xf32>
    %45 = vector.shape_cast %44 : vector<1x14x28xf32> to vector<14x28xf32>
    %cst_47 = arith.constant dense<0.000000e+00> : vector<14x168xf32>
    %46 = tpu.matmul %45, %40, %cst_47 {dimension_numbers = #tpu.dot_dimension_numbers<[1], [0], [0], [1], [0, 0, 1, 1], [], []>} : vector<14x28xf32>, vector<28x168xf32>, vector<14x168xf32> -> vector<14x168xf32>
    %c2_48 = arith.constant 2 : index
    %c0_49 = arith.constant 0 : index
    %c0_50 = arith.constant 0 : index
    %47 = vector.load %arg5[%c2_48, %c0_49, %c0_50] : memref<3x14x28xf32, #tpu.memory_space<vmem>>, vector<1x14x28xf32>
    %48 = vector.shape_cast %47 : vector<1x14x28xf32> to vector<14x28xf32>
    %cst_51 = arith.constant dense<0.000000e+00> : vector<14x168xf32>
    %49 = tpu.matmul %48, %40, %cst_51 {dimension_numbers = #tpu.dot_dimension_numbers<[1], [0], [0], [1], [0, 0, 1, 1], [], []>} : vector<14x28xf32>, vector<28x168xf32>, vector<14x168xf32> -> vector<14x168xf32>
    %c0_52 = arith.constant 0 : index
    %c0_53 = arith.constant 0 : index
    %c0_54 = arith.constant 0 : index
    %50 = vector.load %arg6[%c0_52, %c0_53, %c0_54] : memref<3x168x224xf32, #tpu.memory_space<vmem>>, vector<1x168x224xf32>
    %51 = vector.shape_cast %50 : vector<1x168x224xf32> to vector<168x224xf32>
    %cst_55 = arith.constant dense<0.000000e+00> : vector<14x224xf32>
    %52 = tpu.matmul %43, %51, %cst_55 {dimension_numbers = #tpu.dot_dimension_numbers<[1], [0], [0], [1], [0, 0, 1, 1], [], []>} : vector<14x168xf32>, vector<168x224xf32>, vector<14x224xf32> -> vector<14x224xf32>
    %c1_56 = arith.constant 1 : index
    %c0_57 = arith.constant 0 : index
    %c0_58 = arith.constant 0 : index
    %53 = vector.load %arg6[%c1_56, %c0_57, %c0_58] : memref<3x168x224xf32, #tpu.memory_space<vmem>>, vector<1x168x224xf32>
    %54 = vector.shape_cast %53 : vector<1x168x224xf32> to vector<168x224xf32>
    %cst_59 = arith.constant dense<0.000000e+00> : vector<14x224xf32>
    %55 = tpu.matmul %46, %54, %cst_59 {dimension_numbers = #tpu.dot_dimension_numbers<[1], [0], [0], [1], [0, 0, 1, 1], [], []>} : vector<14x168xf32>, vector<168x224xf32>, vector<14x224xf32> -> vector<14x224xf32>
    %56 = arith.addf %52, %55 : vector<14x224xf32>
    %c2_60 = arith.constant 2 : index
    %c0_61 = arith.constant 0 : index
    %c0_62 = arith.constant 0 : index
    %57 = vector.load %arg6[%c2_60, %c0_61, %c0_62] : memref<3x168x224xf32, #tpu.memory_space<vmem>>, vector<1x168x224xf32>
    %58 = vector.shape_cast %57 : vector<1x168x224xf32> to vector<168x224xf32>
    %cst_63 = arith.constant dense<0.000000e+00> : vector<14x224xf32>
    %59 = tpu.matmul %49, %58, %cst_63 {dimension_numbers = #tpu.dot_dimension_numbers<[1], [0], [0], [1], [0, 0, 1, 1], [], []>} : vector<14x168xf32>, vector<168x224xf32>, vector<14x224xf32> -> vector<14x224xf32>
    %60 = arith.addf %56, %59 : vector<14x224xf32>
    %c0_64 = arith.constant 0 : index
    %c0_65 = arith.constant 0 : index
    %61 = vector.load %arg7[%c0_64, %c0_65] : memref<1x224xf32, #tpu.memory_space<vmem>>, vector<1x224xf32>
    %62 = vector.broadcast %61 : vector<1x224xf32> to vector<14x224xf32>
    %63 = arith.addf %60, %62 : vector<14x224xf32>
    %cst_66 = arith.constant 0.000000e+00 : f32
    %64 = vector.broadcast %cst_66 : f32 to vector<14x224xf32>
    %65 = arith.maximumf %63, %64 : vector<14x224xf32>
    %c0_67 = arith.constant 0 : index
    %c0_68 = arith.constant 0 : index
    %66 = vector.load %arg8[%c0_67, %c0_68] : memref<168x224xf32, #tpu.memory_space<vmem>>, vector<168x224xf32>
    %cst_69 = arith.constant dense<0.000000e+00> : vector<14x224xf32>
    %67 = tpu.matmul %46, %66, %cst_69 {dimension_numbers = #tpu.dot_dimension_numbers<[1], [0], [0], [1], [0, 0, 1, 1], [], []>} : vector<14x168xf32>, vector<168x224xf32>, vector<14x224xf32> -> vector<14x224xf32>
    %c0_70 = arith.constant 0 : index
    %c0_71 = arith.constant 0 : index
    %68 = vector.load %arg9[%c0_70, %c0_71] : memref<1x224xf32, #tpu.memory_space<vmem>>, vector<1x224xf32>
    %69 = vector.broadcast %68 : vector<1x224xf32> to vector<14x224xf32>
    %70 = arith.addf %67, %69 : vector<14x224xf32>
    %c0_72 = arith.constant 0 : index
    %c0_73 = arith.constant 0 : index
    %c0_74 = arith.constant 0 : index
    %71 = vector.load %arg10[%c0_72, %c0_73, %c0_74] : memref<3x14x14xf32, #tpu.memory_space<vmem>>, vector<1x14x14xf32>
    %72 = vector.shape_cast %71 : vector<1x14x14xf32> to vector<14x14xf32>
    %cst_75 = arith.constant dense<0.000000e+00> : vector<14x224xf32>
    %73 = tpu.matmul %72, %65, %cst_75 {dimension_numbers = #tpu.dot_dimension_numbers<[1], [0], [0], [1], [0, 0, 1, 1], [], []>} : vector<14x14xf32>, vector<14x224xf32>, vector<14x224xf32> -> vector<14x224xf32>
    %c0_76 = arith.constant 0 : index
    %c0_77 = arith.constant 0 : index
    %c0_78 = arith.constant 0 : index
    %74 = vector.load %arg11[%c0_76, %c0_77, %c0_78] : memref<3x224x224xf32, #tpu.memory_space<vmem>>, vector<1x224x224xf32>
    %75 = vector.shape_cast %74 : vector<1x224x224xf32> to vector<224x224xf32>
    %cst_79 = arith.constant dense<0.000000e+00> : vector<14x224xf32>
    %76 = tpu.matmul %73, %75, %cst_79 {dimension_numbers = #tpu.dot_dimension_numbers<[1], [0], [0], [1], [0, 0, 1, 1], [], []>} : vector<14x224xf32>, vector<224x224xf32>, vector<14x224xf32> -> vector<14x224xf32>
    %c1_80 = arith.constant 1 : index
    %c0_81 = arith.constant 0 : index
    %c0_82 = arith.constant 0 : index
    %77 = vector.load %arg10[%c1_80, %c0_81, %c0_82] : memref<3x14x14xf32, #tpu.memory_space<vmem>>, vector<1x14x14xf32>
    %78 = vector.shape_cast %77 : vector<1x14x14xf32> to vector<14x14xf32>
    %cst_83 = arith.constant dense<0.000000e+00> : vector<14x224xf32>
    %79 = tpu.matmul %78, %65, %cst_83 {dimension_numbers = #tpu.dot_dimension_numbers<[1], [0], [0], [1], [0, 0, 1, 1], [], []>} : vector<14x14xf32>, vector<14x224xf32>, vector<14x224xf32> -> vector<14x224xf32>
    %c1_84 = arith.constant 1 : index
    %c0_85 = arith.constant 0 : index
    %c0_86 = arith.constant 0 : index
    %80 = vector.load %arg11[%c1_84, %c0_85, %c0_86] : memref<3x224x224xf32, #tpu.memory_space<vmem>>, vector<1x224x224xf32>
    %81 = vector.shape_cast %80 : vector<1x224x224xf32> to vector<224x224xf32>
    %cst_87 = arith.constant dense<0.000000e+00> : vector<14x224xf32>
    %82 = tpu.matmul %79, %81, %cst_87 {dimension_numbers = #tpu.dot_dimension_numbers<[1], [0], [0], [1], [0, 0, 1, 1], [], []>} : vector<14x224xf32>, vector<224x224xf32>, vector<14x224xf32> -> vector<14x224xf32>
    %83 = arith.addf %76, %82 : vector<14x224xf32>
    %c2_88 = arith.constant 2 : index
    %c0_89 = arith.constant 0 : index
    %c0_90 = arith.constant 0 : index
    %84 = vector.load %arg10[%c2_88, %c0_89, %c0_90] : memref<3x14x14xf32, #tpu.memory_space<vmem>>, vector<1x14x14xf32>
    %85 = vector.shape_cast %84 : vector<1x14x14xf32> to vector<14x14xf32>
    %cst_91 = arith.constant dense<0.000000e+00> : vector<14x224xf32>
    %86 = tpu.matmul %85, %65, %cst_91 {dimension_numbers = #tpu.dot_dimension_numbers<[1], [0], [0], [1], [0, 0, 1, 1], [], []>} : vector<14x14xf32>, vector<14x224xf32>, vector<14x224xf32> -> vector<14x224xf32>
    %c2_92 = arith.constant 2 : index
    %c0_93 = arith.constant 0 : index
    %c0_94 = arith.constant 0 : index
    %87 = vector.load %arg11[%c2_92, %c0_93, %c0_94] : memref<3x224x224xf32, #tpu.memory_space<vmem>>, vector<1x224x224xf32>
    %88 = vector.shape_cast %87 : vector<1x224x224xf32> to vector<224x224xf32>
    %cst_95 = arith.constant dense<0.000000e+00> : vector<14x224xf32>
    %89 = tpu.matmul %86, %88, %cst_95 {dimension_numbers = #tpu.dot_dimension_numbers<[1], [0], [0], [1], [0, 0, 1, 1], [], []>} : vector<14x224xf32>, vector<224x224xf32>, vector<14x224xf32> -> vector<14x224xf32>
    %90 = arith.addf %83, %89 : vector<14x224xf32>
    %c0_96 = arith.constant 0 : index
    %c0_97 = arith.constant 0 : index
    %91 = vector.load %arg12[%c0_96, %c0_97] : memref<1x224xf32, #tpu.memory_space<vmem>>, vector<1x224xf32>
    %92 = vector.broadcast %91 : vector<1x224xf32> to vector<14x224xf32>
    %93 = arith.addf %90, %92 : vector<14x224xf32>
    %94 = arith.addf %93, %70 : vector<14x224xf32>
    %cst_98 = arith.constant 0.000000e+00 : f32
    %95 = vector.broadcast %cst_98 : f32 to vector<14x224xf32>
    %96 = arith.maximumf %94, %95 : vector<14x224xf32>
    %c0_99 = arith.constant 0 : index
    %c0_100 = arith.constant 0 : index
    %c0_101 = arith.constant 0 : index
    %97 = vector.load %arg13[%c0_99, %c0_100, %c0_101] : memref<3x7x14xf32, #tpu.memory_space<vmem>>, vector<1x7x14xf32>
    %98 = vector.shape_cast %97 : vector<1x7x14xf32> to vector<7x14xf32>
    %cst_102 = arith.constant dense<0.000000e+00> : vector<7x224xf32>
    %99 = tpu.matmul %98, %96, %cst_102 {dimension_numbers = #tpu.dot_dimension_numbers<[1], [0], [0], [1], [0, 0, 1, 1], [], []>} : vector<7x14xf32>, vector<14x224xf32>, vector<7x224xf32> -> vector<7x224xf32>
    %c1_103 = arith.constant 1 : index
    %c0_104 = arith.constant 0 : index
    %c0_105 = arith.constant 0 : index
    %100 = vector.load %arg13[%c1_103, %c0_104, %c0_105] : memref<3x7x14xf32, #tpu.memory_space<vmem>>, vector<1x7x14xf32>
    %101 = vector.shape_cast %100 : vector<1x7x14xf32> to vector<7x14xf32>
    %cst_106 = arith.constant dense<0.000000e+00> : vector<7x224xf32>
    %102 = tpu.matmul %101, %96, %cst_106 {dimension_numbers = #tpu.dot_dimension_numbers<[1], [0], [0], [1], [0, 0, 1, 1], [], []>} : vector<7x14xf32>, vector<14x224xf32>, vector<7x224xf32> -> vector<7x224xf32>
    %c2_107 = arith.constant 2 : index
    %c0_108 = arith.constant 0 : index
    %c0_109 = arith.constant 0 : index
    %103 = vector.load %arg13[%c2_107, %c0_108, %c0_109] : memref<3x7x14xf32, #tpu.memory_space<vmem>>, vector<1x7x14xf32>
    %104 = vector.shape_cast %103 : vector<1x7x14xf32> to vector<7x14xf32>
    %cst_110 = arith.constant dense<0.000000e+00> : vector<7x224xf32>
    %105 = tpu.matmul %104, %96, %cst_110 {dimension_numbers = #tpu.dot_dimension_numbers<[1], [0], [0], [1], [0, 0, 1, 1], [], []>} : vector<7x14xf32>, vector<14x224xf32>, vector<7x224xf32> -> vector<7x224xf32>
    %c0_111 = arith.constant 0 : index
    %c0_112 = arith.constant 0 : index
    %c0_113 = arith.constant 0 : index
    %106 = vector.load %arg14[%c0_111, %c0_112, %c0_113] : memref<3x224x224xf32, #tpu.memory_space<vmem>>, vector<1x224x224xf32>
    %107 = vector.shape_cast %106 : vector<1x224x224xf32> to vector<224x224xf32>
    %cst_114 = arith.constant dense<0.000000e+00> : vector<7x224xf32>
    %108 = tpu.matmul %99, %107, %cst_114 {dimension_numbers = #tpu.dot_dimension_numbers<[1], [0], [0], [1], [0, 0, 1, 1], [], []>} : vector<7x224xf32>, vector<224x224xf32>, vector<7x224xf32> -> vector<7x224xf32>
    %c1_115 = arith.constant 1 : index
    %c0_116 = arith.constant 0 : index
    %c0_117 = arith.constant 0 : index
    %109 = vector.load %arg14[%c1_115, %c0_116, %c0_117] : memref<3x224x224xf32, #tpu.memory_space<vmem>>, vector<1x224x224xf32>
    %110 = vector.shape_cast %109 : vector<1x224x224xf32> to vector<224x224xf32>
    %cst_118 = arith.constant dense<0.000000e+00> : vector<7x224xf32>
    %111 = tpu.matmul %102, %110, %cst_118 {dimension_numbers = #tpu.dot_dimension_numbers<[1], [0], [0], [1], [0, 0, 1, 1], [], []>} : vector<7x224xf32>, vector<224x224xf32>, vector<7x224xf32> -> vector<7x224xf32>
    %112 = arith.addf %108, %111 : vector<7x224xf32>
    %c2_119 = arith.constant 2 : index
    %c0_120 = arith.constant 0 : index
    %c0_121 = arith.constant 0 : index
    %113 = vector.load %arg14[%c2_119, %c0_120, %c0_121] : memref<3x224x224xf32, #tpu.memory_space<vmem>>, vector<1x224x224xf32>
    %114 = vector.shape_cast %113 : vector<1x224x224xf32> to vector<224x224xf32>
    %cst_122 = arith.constant dense<0.000000e+00> : vector<7x224xf32>
    %115 = tpu.matmul %105, %114, %cst_122 {dimension_numbers = #tpu.dot_dimension_numbers<[1], [0], [0], [1], [0, 0, 1, 1], [], []>} : vector<7x224xf32>, vector<224x224xf32>, vector<7x224xf32> -> vector<7x224xf32>
    %116 = arith.addf %112, %115 : vector<7x224xf32>
    %c0_123 = arith.constant 0 : index
    %c0_124 = arith.constant 0 : index
    %117 = vector.load %arg15[%c0_123, %c0_124] : memref<1x224xf32, #tpu.memory_space<vmem>>, vector<1x224xf32>
    %118 = vector.broadcast %117 : vector<1x224xf32> to vector<7x224xf32>
    %119 = arith.addf %116, %118 : vector<7x224xf32>
    %cst_125 = arith.constant 0.000000e+00 : f32
    %120 = vector.broadcast %cst_125 : f32 to vector<7x224xf32>
    %121 = arith.maximumf %119, %120 : vector<7x224xf32>
    %c0_126 = arith.constant 0 : index
    %c0_127 = arith.constant 0 : index
    %122 = vector.load %arg16[%c0_126, %c0_127] : memref<224x224xf32, #tpu.memory_space<vmem>>, vector<224x224xf32>
    %cst_128 = arith.constant dense<0.000000e+00> : vector<7x224xf32>
    %123 = tpu.matmul %102, %122, %cst_128 {dimension_numbers = #tpu.dot_dimension_numbers<[1], [0], [0], [1], [0, 0, 1, 1], [], []>} : vector<7x224xf32>, vector<224x224xf32>, vector<7x224xf32> -> vector<7x224xf32>
    %c0_129 = arith.constant 0 : index
    %c0_130 = arith.constant 0 : index
    %124 = vector.load %arg17[%c0_129, %c0_130] : memref<1x224xf32, #tpu.memory_space<vmem>>, vector<1x224xf32>
    %125 = vector.broadcast %124 : vector<1x224xf32> to vector<7x224xf32>
    %126 = arith.addf %123, %125 : vector<7x224xf32>
    %c0_131 = arith.constant 0 : index
    %c0_132 = arith.constant 0 : index
    %c0_133 = arith.constant 0 : index
    %127 = vector.load %arg18[%c0_131, %c0_132, %c0_133] : memref<3x7x7xf32, #tpu.memory_space<vmem>>, vector<1x7x7xf32>
    %128 = vector.shape_cast %127 : vector<1x7x7xf32> to vector<7x7xf32>
    %cst_134 = arith.constant dense<0.000000e+00> : vector<7x224xf32>
    %129 = tpu.matmul %128, %121, %cst_134 {dimension_numbers = #tpu.dot_dimension_numbers<[1], [0], [0], [1], [0, 0, 1, 1], [], []>} : vector<7x7xf32>, vector<7x224xf32>, vector<7x224xf32> -> vector<7x224xf32>
    %c0_135 = arith.constant 0 : index
    %c0_136 = arith.constant 0 : index
    %c0_137 = arith.constant 0 : index
    %130 = vector.load %arg19[%c0_135, %c0_136, %c0_137] : memref<3x224x224xf32, #tpu.memory_space<vmem>>, vector<1x224x224xf32>
    %131 = vector.shape_cast %130 : vector<1x224x224xf32> to vector<224x224xf32>
    %cst_138 = arith.constant dense<0.000000e+00> : vector<7x224xf32>
    %132 = tpu.matmul %129, %131, %cst_138 {dimension_numbers = #tpu.dot_dimension_numbers<[1], [0], [0], [1], [0, 0, 1, 1], [], []>} : vector<7x224xf32>, vector<224x224xf32>, vector<7x224xf32> -> vector<7x224xf32>
    %c1_139 = arith.constant 1 : index
    %c0_140 = arith.constant 0 : index
    %c0_141 = arith.constant 0 : index
    %133 = vector.load %arg18[%c1_139, %c0_140, %c0_141] : memref<3x7x7xf32, #tpu.memory_space<vmem>>, vector<1x7x7xf32>
    %134 = vector.shape_cast %133 : vector<1x7x7xf32> to vector<7x7xf32>
    %cst_142 = arith.constant dense<0.000000e+00> : vector<7x224xf32>
    %135 = tpu.matmul %134, %121, %cst_142 {dimension_numbers = #tpu.dot_dimension_numbers<[1], [0], [0], [1], [0, 0, 1, 1], [], []>} : vector<7x7xf32>, vector<7x224xf32>, vector<7x224xf32> -> vector<7x224xf32>
    %c1_143 = arith.constant 1 : index
    %c0_144 = arith.constant 0 : index
    %c0_145 = arith.constant 0 : index
    %136 = vector.load %arg19[%c1_143, %c0_144, %c0_145] : memref<3x224x224xf32, #tpu.memory_space<vmem>>, vector<1x224x224xf32>
    %137 = vector.shape_cast %136 : vector<1x224x224xf32> to vector<224x224xf32>
    %cst_146 = arith.constant dense<0.000000e+00> : vector<7x224xf32>
    %138 = tpu.matmul %135, %137, %cst_146 {dimension_numbers = #tpu.dot_dimension_numbers<[1], [0], [0], [1], [0, 0, 1, 1], [], []>} : vector<7x224xf32>, vector<224x224xf32>, vector<7x224xf32> -> vector<7x224xf32>
    %139 = arith.addf %132, %138 : vector<7x224xf32>
    %c2_147 = arith.constant 2 : index
    %c0_148 = arith.constant 0 : index
    %c0_149 = arith.constant 0 : index
    %140 = vector.load %arg18[%c2_147, %c0_148, %c0_149] : memref<3x7x7xf32, #tpu.memory_space<vmem>>, vector<1x7x7xf32>
    %141 = vector.shape_cast %140 : vector<1x7x7xf32> to vector<7x7xf32>
    %cst_150 = arith.constant dense<0.000000e+00> : vector<7x224xf32>
    %142 = tpu.matmul %141, %121, %cst_150 {dimension_numbers = #tpu.dot_dimension_numbers<[1], [0], [0], [1], [0, 0, 1, 1], [], []>} : vector<7x7xf32>, vector<7x224xf32>, vector<7x224xf32> -> vector<7x224xf32>
    %c2_151 = arith.constant 2 : index
    %c0_152 = arith.constant 0 : index
    %c0_153 = arith.constant 0 : index
    %143 = vector.load %arg19[%c2_151, %c0_152, %c0_153] : memref<3x224x224xf32, #tpu.memory_space<vmem>>, vector<1x224x224xf32>
    %144 = vector.shape_cast %143 : vector<1x224x224xf32> to vector<224x224xf32>
    %cst_154 = arith.constant dense<0.000000e+00> : vector<7x224xf32>
    %145 = tpu.matmul %142, %144, %cst_154 {dimension_numbers = #tpu.dot_dimension_numbers<[1], [0], [0], [1], [0, 0, 1, 1], [], []>} : vector<7x224xf32>, vector<224x224xf32>, vector<7x224xf32> -> vector<7x224xf32>
    %146 = arith.addf %139, %145 : vector<7x224xf32>
    %c0_155 = arith.constant 0 : index
    %c0_156 = arith.constant 0 : index
    %147 = vector.load %arg20[%c0_155, %c0_156] : memref<1x224xf32, #tpu.memory_space<vmem>>, vector<1x224xf32>
    %148 = vector.broadcast %147 : vector<1x224xf32> to vector<7x224xf32>
    %149 = arith.addf %146, %148 : vector<7x224xf32>
    %150 = arith.addf %149, %126 : vector<7x224xf32>
    %cst_157 = arith.constant 0.000000e+00 : f32
    %151 = vector.broadcast %cst_157 : f32 to vector<7x224xf32>
    %152 = arith.maximumf %150, %151 : vector<7x224xf32>
    %c0_158 = arith.constant 0 : index
    %c0_159 = arith.constant 0 : index
    %153 = vector.load %arg21[%c0_158, %c0_159] : memref<1x7xf32, #tpu.memory_space<vmem>>, vector<1x7xf32>
    %cst_160 = arith.constant dense<0.000000e+00> : vector<1x224xf32>
    %154 = tpu.matmul %153, %152, %cst_160 {dimension_numbers = #tpu.dot_dimension_numbers<[1], [0], [0], [1], [0, 0, 1, 1], [], []>} : vector<1x7xf32>, vector<7x224xf32>, vector<1x224xf32> -> vector<1x224xf32>
    %c0_161 = arith.constant 0 : index
    %c0_162 = arith.constant 0 : index
    %155 = vector.load %arg22[%c0_161, %c0_162] : memref<224x10xf32, #tpu.memory_space<vmem>>, vector<224x10xf32>
    %cst_163 = arith.constant dense<0.000000e+00> : vector<1x10xf32>
    %156 = tpu.matmul %154, %155, %cst_163 {dimension_numbers = #tpu.dot_dimension_numbers<[1], [0], [0], [1], [0, 0, 1, 1], [], []>} : vector<1x224xf32>, vector<224x10xf32>, vector<1x10xf32> -> vector<1x10xf32>
    %c0_164 = arith.constant 0 : index
    %c0_165 = arith.constant 0 : index
    %157 = vector.load %arg23[%c0_164, %c0_165] : memref<1x10xf32, #tpu.memory_space<vmem>>, vector<1x10xf32>
    %158 = arith.addf %156, %157 : vector<1x10xf32>
    %c0_166 = arith.constant 0 : index
    %c0_167 = arith.constant 0 : index
    %c0_168 = arith.constant 0 : index
    %159 = vector.load %arg24[%c0_166, %c0_167, %c0_168] : memref<1x1x10xf32, #tpu.memory_space<vmem>>, vector<1x1x10xf32>
    %160 = vector.shape_cast %159 : vector<1x1x10xf32> to vector<1x10xf32>
    %161 = vector.shape_cast %158 : vector<1x10xf32> to vector<1x1x10xf32>
    tpu.vector_store %arg24[%c0_166, %c0_167, %c0_168], %161 {strides = array<i32>} : memref<1x1x10xf32, #tpu.memory_space<vmem>>, vector<1x1x10xf32>,
    return
  }
  func.func @transform_0(%arg0: i32) -> (i32, i32, i32) {
    %c0_i32 = arith.constant 0 : i32
    %c0_i32_0 = arith.constant 0 : i32
    %c0_i32_1 = arith.constant 0 : i32
    return %arg0, %c0_i32, %c0_i32_0 : i32, i32, i32
  }
  func.func @transform_1(%arg0: i32) -> (i32, i32, i32) {
    %c0_i32 = arith.constant 0 : i32
    %c0_i32_0 = arith.constant 0 : i32
    %c0_i32_1 = arith.constant 0 : i32
    %c0_i32_2 = arith.constant 0 : i32
    return %c0_i32, %c0_i32_0, %c0_i32_1 : i32, i32, i32
  }
  func.func @transform_2(%arg0: i32) -> (i32, i32, i32) {
    %c0_i32 = arith.constant 0 : i32
    %c0_i32_0 = arith.constant 0 : i32
    %c0_i32_1 = arith.constant 0 : i32
    %c0_i32_2 = arith.constant 0 : i32
    return %c0_i32, %c0_i32_0, %c0_i32_1 : i32, i32, i32
  }
  func.func @transform_3(%arg0: i32) -> (i32, i32) {
    %c0_i32 = arith.constant 0 : i32
    %c0_i32_0 = arith.constant 0 : i32
    %c0_i32_1 = arith.constant 0 : i32
    return %c0_i32, %c0_i32_0 : i32, i32
  }
  func.func @transform_4(%arg0: i32) -> (i32, i32, i32) {
    %c0_i32 = arith.constant 0 : i32
    %c0_i32_0 = arith.constant 0 : i32
    %c0_i32_1 = arith.constant 0 : i32
    %c0_i32_2 = arith.constant 0 : i32
    return %c0_i32, %c0_i32_0, %c0_i32_1 : i32, i32, i32
  }
  func.func @transform_5(%arg0: i32) -> (i32, i32, i32) {
    %c0_i32 = arith.constant 0 : i32
    %c0_i32_0 = arith.constant 0 : i32
    %c0_i32_1 = arith.constant 0 : i32
    %c0_i32_2 = arith.constant 0 : i32
    return %c0_i32, %c0_i32_0, %c0_i32_1 : i32, i32, i32
  }
  func.func @transform_6(%arg0: i32) -> (i32, i32) {
    %c0_i32 = arith.constant 0 : i32
    %c0_i32_0 = arith.constant 0 : i32
    %c0_i32_1 = arith.constant 0 : i32
    return %c0_i32, %c0_i32_0 : i32, i32
  }
  func.func @transform_7(%arg0: i32) -> (i32, i32) {
    %c0_i32 = arith.constant 0 : i32
    %c0_i32_0 = arith.constant 0 : i32
    %c0_i32_1 = arith.constant 0 : i32
    return %c0_i32, %c0_i32_0 : i32, i32
  }
  func.func @transform_8(%arg0: i32) -> (i32, i32) {
    %c0_i32 = arith.constant 0 : i32
    %c0_i32_0 = arith.constant 0 : i32
    %c0_i32_1 = arith.constant 0 : i32
    return %c0_i32, %c0_i32_0 : i32, i32
  }
  func.func @transform_9(%arg0: i32) -> (i32, i32, i32) {
    %c0_i32 = arith.constant 0 : i32
    %c0_i32_0 = arith.constant 0 : i32
    %c0_i32_1 = arith.constant 0 : i32
    %c0_i32_2 = arith.constant 0 : i32
    return %c0_i32, %c0_i32_0, %c0_i32_1 : i32, i32, i32
  }
  func.func @transform_10(%arg0: i32) -> (i32, i32, i32) {
    %c0_i32 = arith.constant 0 : i32
    %c0_i32_0 = arith.constant 0 : i32
    %c0_i32_1 = arith.constant 0 : i32
    %c0_i32_2 = arith.constant 0 : i32
    return %c0_i32, %c0_i32_0, %c0_i32_1 : i32, i32, i32
  }
  func.func @transform_11(%arg0: i32) -> (i32, i32) {
    %c0_i32 = arith.constant 0 : i32
    %c0_i32_0 = arith.constant 0 : i32
    %c0_i32_1 = arith.constant 0 : i32
    return %c0_i32, %c0_i32_0 : i32, i32
  }
  func.func @transform_12(%arg0: i32) -> (i32, i32, i32) {
    %c0_i32 = arith.constant 0 : i32
    %c0_i32_0 = arith.constant 0 : i32
    %c0_i32_1 = arith.constant 0 : i32
    %c0_i32_2 = arith.constant 0 : i32
    return %c0_i32, %c0_i32_0, %c0_i32_1 : i32, i32, i32
  }
  func.func @transform_13(%arg0: i32) -> (i32, i32, i32) {
    %c0_i32 = arith.constant 0 : i32
    %c0_i32_0 = arith.constant 0 : i32
    %c0_i32_1 = arith.constant 0 : i32
    %c0_i32_2 = arith.constant 0 : i32
    return %c0_i32, %c0_i32_0, %c0_i32_1 : i32, i32, i32
  }
  func.func @transform_14(%arg0: i32) -> (i32, i32) {
    %c0_i32 = arith.constant 0 : i32
    %c0_i32_0 = arith.constant 0 : i32
    %c0_i32_1 = arith.constant 0 : i32
    return %c0_i32, %c0_i32_0 : i32, i32
  }
  func.func @transform_15(%arg0: i32) -> (i32, i32) {
    %c0_i32 = arith.constant 0 : i32
    %c0_i32_0 = arith.constant 0 : i32
    %c0_i32_1 = arith.constant 0 : i32
    return %c0_i32, %c0_i32_0 : i32, i32
  }
  func.func @transform_16(%arg0: i32) -> (i32, i32) {
    %c0_i32 = arith.constant 0 : i32
    %c0_i32_0 = arith.constant 0 : i32
    %c0_i32_1 = arith.constant 0 : i32
    return %c0_i32, %c0_i32_0 : i32, i32
  }
  func.func @transform_17(%arg0: i32) -> (i32, i32, i32) {
    %c0_i32 = arith.constant 0 : i32
    %c0_i32_0 = arith.constant 0 : i32
    %c0_i32_1 = arith.constant 0 : i32
    %c0_i32_2 = arith.constant 0 : i32
    return %c0_i32, %c0_i32_0, %c0_i32_1 : i32, i32, i32
  }
  func.func @transform_18(%arg0: i32) -> (i32, i32, i32) {
    %c0_i32 = arith.constant 0 : i32
    %c0_i32_0 = arith.constant 0 : i32
    %c0_i32_1 = arith.constant 0 : i32
    %c0_i32_2 = arith.constant 0 : i32
    return %c0_i32, %c0_i32_0, %c0_i32_1 : i32, i32, i32
  }
  func.func @transform_19(%arg0: i32) -> (i32, i32) {
    %c0_i32 = arith.constant 0 : i32
    %c0_i32_0 = arith.constant 0 : i32
    %c0_i32_1 = arith.constant 0 : i32
    return %c0_i32, %c0_i32_0 : i32, i32
  }
  func.func @transform_20(%arg0: i32) -> (i32, i32) {
    %c0_i32 = arith.constant 0 : i32
    %c0_i32_0 = arith.constant 0 : i32
    %c0_i32_1 = arith.constant 0 : i32
    return %c0_i32, %c0_i32_0 : i32, i32
  }
  func.func @transform_21(%arg0: i32) -> (i32, i32) {
    %c0_i32 = arith.constant 0 : i32
    %c0_i32_0 = arith.constant 0 : i32
    %c0_i32_1 = arith.constant 0 : i32
    return %c0_i32, %c0_i32_0 : i32, i32
  }
  func.func @transform_22(%arg0: i32) -> (i32, i32) {
    %c0_i32 = arith.constant 0 : i32
    %c0_i32_0 = arith.constant 0 : i32
    %c0_i32_1 = arith.constant 0 : i32
    return %c0_i32, %c0_i32_0 : i32, i32
  }
  func.func @transform_23(%arg0: i32) -> (i32, i32, i32) {
    %c0_i32 = arith.constant 0 : i32
    %c0_i32_0 = arith.constant 0 : i32
    %c0_i32_1 = arith.constant 0 : i32
    return %arg0, %c0_i32, %c0_i32_0 : i32, i32, i32
  }
}

</mosaic_0001>

<bundles_post_ra>
// kernel: resnet6_forward.1
= control target key start
LH: loop header
LB: loop body
LE: loop exit
PB: predicated region body
PF: predicated region fallthrough
CT: control target
= control target key end

     0   :  { %s9713_s0 = inlined_call_operand.vmem [shape: f32[2,32,96], index: 0, kind: input, shape index: {}]   ;;  %s9714_s1 = inlined_call_operand.hbm [shape: f32[5,28,32], index: 1, kind: input, shape index: {}]   ;;  %s9715_s2 = inlined_call_operand.vmem [shape: f32[5,96,168], index: 2, kind: input, shape index: {}]   ;;  %s9716_s3 = inlined_call_operand.vmem [shape: f32[1,168], index: 3, kind: input, shape index: {}]   ;;  %s9717_s4 = inlined_call_operand.hbm [shape: f32[3,14,28], index: 4, kind: input, shape index: {}]   ;;  %s9718_s5 = inlined_call_operand.hbm [shape: f32[3,168,224], index: 5, kind: input, shape index: {}]   ;;  %s9719_s6 = inlined_call_operand.hbm [shape: f32[1,224], index: 6, kind: input, shape index: {}]   ;;  %s9720_s7 = inlined_call_operand.hbm [shape: f32[168,224], index: 7, kind: input, shape index: {}]   ;;  %s9721_s8 = inlined_call_operand.vmem [shape: f32[1,224], index: 8, kind: input, shape index: {}]   ;;  %s9722_s9 = inlined_call_operand.hbm [shape: f32[3,14,14], index: 9, kind: input, shape index: {}]   ;;  %s9723_s10 = inlined_call_operand.vmem [shape: f32[3,224,224], index: 10, kind: input, shape index: {}]   ;;  %s9724_s11 = inlined_call_operand.vmem [shape: f32[1,224], index: 11, kind: input, shape index: {}]   ;;  %s9725_s12 = inlined_call_operand.hbm [shape: f32[3,7,14], index: 12, kind: input, shape index: {}]   ;;  %s9726_s13 = inlined_call_operand.vmem [shape: f32[3,224,224], index: 13, kind: input, shape index: {}]   ;;  %s9727_s14 = inlined_call_operand.vmem [shape: f32[1,224], index: 14, kind: input, shape index: {}]   ;;  %s9728_s15 = inlined_call_operand.hbm [shape: f32[224,224], index: 15, kind: input, shape index: {}]   ;;  %s9729_s16 = inlined_call_operand.vmem [shape: f32[1,224], index: 16, kind: input, shape index: {}]   ;;  %s9730_s17 = inlined_call_operand.vmem [shape: f32[3,7,7], index: 17, kind: input, shape index: {}]   ;;  %s9731_s18 = inlined_call_operand.hbm [shape: f32[3,224,224], index: 18, kind: input, shape index: {}]   ;;  %s9732_s19 = inlined_call_operand.vmem [shape: f32[1,224], index: 19, kind: input, shape index: {}]   ;;  %s9733_s20 = inlined_call_operand.vmem [shape: f32[1,7], index: 20, kind: input, shape index: {}]   ;;  %s9734_s21 = inlined_call_operand.vmem [shape: f32[224,10], index: 21, kind: input, shape index: {}]   ;;  %s9735_s22 = inlined_call_operand.vmem [shape: f32[1,10], index: 22, kind: input, shape index: {}]   ;;  %s9736_s23 = inlined_call_operand.hbm [shape: f32[2,1,10], index: 23, kind: output, shape index: {}]  }
   0x1   :  { %9767 = sst [smem:[#allocation32_spill]] %s9713_s0 }
   0x2   :  { %9768 = sst [smem:[#allocation33_spill]] %s9714_s1 }
   0x3   :  { %9769 = sst [smem:[#allocation34_spill]] %s9715_s2 }
   0x4   :  { %9770 = sst [smem:[#allocation35_spill]] %s9716_s3 }
   0x5   :  { %9771 = sst [smem:[#allocation36_spill]] %s9717_s4 }
   0x6   :  { %9772 = sst [smem:[#allocation37_spill]] %s9718_s5 }
   0x7   :  { %9773 = sst [smem:[#allocation38_spill]] %s9719_s6 }
   0x8   :  { %9774 = sst [smem:[#allocation39_spill]] %s9720_s7 }
   0x9   :  { %9775 = sst [smem:[#allocation40_spill]] %s9722_s9 }
   0xa   :  { %9776 = sst [smem:[#allocation41_spill]] %s9728_s15 }
   0xb   :  { %9777 = sst [smem:[#allocation42_spill]] %s9732_s19 }
   0xc   :  { %9778 = sst [smem:[#allocation43_spill]] %s9733_s20 }
   0xd   :  { %9779 = sst [smem:[#allocation44_spill]] %s9734_s21 }
   0xe   :  { %9780 = sst [smem:[#allocation45_spill]] %s9735_s22 }
   0xf   :  { %9781 = sst [smem:[#allocation46_spill]] %s9736_s23 }
  0x10   :  { %28 = vsyncpa [#allocation3], 0 }
  0x11   :  { %29 = vsyncpa [#allocation6], 0 }
  0x12   :  { %30 = vsyncpa [#allocation9], 0 }
  0x13   :  { %31 = vsyncpa [#allocation12], 0 }
  0x14   :  { %32 = vsyncpa [#allocation15], 0 }
  0x15   :  { %33 = vsyncpa [#allocation4], 0 }
  0x16   :  { %35 = vsyncpa [#allocation4 + $0x1], 0  ;;  %s7552_s4 = smov 0   ;;  %s7554_s30 = smov 0  }
  0x17   :  { %s7556_s24 = smov 0   ;;  %s7558_s25 = smov 0  }
  0x18 LB: > { %9782 = sst [smem:[#allocation24_spill]] %s7401_s4  ;;  %s7573_s5 = sadd.s32 4294967295, %s7413_s25   ;;  %s7413_s25 = sphi %s7558_s25, %s9837_s25   ;;  %s7409_s24 = sphi %s7556_s24, %s9840_s24   ;;  %s7405_s30 = sphi %s7554_s30, %s9839_s30   ;;  %s7401_s4 = sphi %s7552_s4, %s9838_s4  }
  0x19   : > { %9783 = sst [smem:[#allocation25_spill]] %s7405_s30  ;;  %s5313_s1 = sadd.s32 4294967294, %s7413_s25  }
  0x1a   : > { %9784 = sst [smem:[#allocation26_spill]] %s7409_s24  ;;  %s7577_s26 = sadd.s32 1, %s7413_s25  }
  0x1b   : > { %9785 = sst [smem:[#allocation27_spill]] %s7413_s25  ;;  %s536_s2 = sadd.s32 1, %s7409_s24 }
  0x1c   : > { %9786 = sst [smem:[#allocation28_spill]] %s7577_s26  ;;  %s533_s6 = ssub.s32 %s7413_s25, %s7577_s26 }
  0x1d   : > { %p546_p0 = scmp.ne.s32.totalorder %s7409_s24, %s7405_s30  ;;  %p534_p1 = scmp.eq.s32.totalorder %s533_s6, 0 }
  0x1e   : > { %p547_p2 = scmp.eq.s32.totalorder %s7573_s5, 1  ;;  %p552_p3 = scmp.ne.s32.totalorder %s7405_s30, %s7401_s4 }
  0x1f   : > { %p553_p4 = scmp.eq.s32.totalorder %s5313_s1, 1  ;;  %p5314_p7 = scmp.ge.s32.totalorder %s7413_s25, 1 }
  0x20   : > { %s7588_s27 = scalar_select %p534_p1, %s7409_s24, %s536_s2  }
  0x21   : > { %p7590_p5 = por %p547_p2, %p546_p0  ;;  %p7594_p6 = por %p553_p4, %p552_p3 }
  0x22   : > { %9787 = sst [smem:[#allocation29_spill]] %s7588_s27  ;;  %p560_p8 = scmp.lt.s32.totalorder %s7413_s25, 3 }
  0x23   : > { %s9788_s7 = scalar_select %p7590_p5, 1, 0 }
  0x24   : > { %s9790_s28 = scalar_select %p7594_p6, 1, 0 }
  0x25   : > { %9789 = sst [smem:[#allocation30_spill]] %s9788_s7  ;;  %p9752_p9 = scmp.eq.s32.totalorder %s7573_s5, 0 }
  0x26   : > { %9791 = sst [smem:[#allocation31_spill]] %s9790_s28  ;;  %p7601_p10 = pnand %p5314_p7, %p560_p8 }
  0x27   : > { %s7415_s3 = smov [#allocation5]   ;;  %s7416_s2 = smov [#allocation8]  }
  0x28   : > { %s9792_s29 = scalar_select %p7601_p10, 1, 0 }
  0x29   : > { %p6980_p11 = pneg %p7601_p10  ;;  %s591_s0 = sshll.u32 %s7415_s3, 4  ;;  %s7607_s0 = int_to_ptr.vmem [resolvable:$true] %s591_s0 }
  0x2a   : > { %s618_s6 = sshll.u32 %s7416_s2, 4  ;;  %s7417_s27 = smov [#allocation11]   ;;  %s7615_s6 = int_to_ptr.vmem [resolvable:$true] %s618_s6 }
  0x2b   : > { %p7611_p12 = pnand %p9752_p9, %p6980_p11  ;;  %s7617_s24 = sshll.u32 %s7417_s27, 4  ;;  %s645_s24 = int_to_ptr.vmem [resolvable:$true] %s7617_s24 }
  0x2c   : > { %s9794_s4 = sld [smem:[#allocation36_spill]] }
  0x2d   : > { %p7627_p0 = pneg %p7611_p12 }
  0x32   : > { %s9795_s23 = smov %s9794_s4  ;;  %s7079_s25 = scalar_lea.hbm %s9794_s4, 768 }
  0x33   : > { %p7080_p13 = scmp.ne.s32.totalorder %s9795_s23, %s7079_s25  ;;  %p7086_p3 = scmp.lt.u32.totalorder %s7079_s25, %s9795_s23 }
  0x35   : > { %p7082_p1 = pnand %p7627_p0, %p7080_p13 }
  0x37   : > { %p7083_p2 = pneg %p7082_p1 }
  0x39   : > { %p7088_p4 = pnand %p7086_p3, %p7083_p2 }
  0x3b   : > { %7091 = shalt.err (!%p7088_p4)
}
  0x3c   : > { %s7092_s22 = scalar_lea.vmem %s7607_s0, 768  ;;  %p7100_p9 = scmp.lt.s32.totalorder %s7607_s0, %s7607_s0 }
  0x3d   : > { %p7093_p7 = scmp.ne.s32.totalorder %s7607_s0, %s7092_s22  ;;  %p7101_p6 = scmp.lt.s32.totalorder %s7092_s22, %s7092_s22 }
  0x3f   : > { %p7095_p8 = pnand %p7093_p7, %p7627_p0  ;;  %p7102_p13 = por %p7101_p6, %p7100_p9 }
  0x41   : > { %p7096_p11 = pneg %p7095_p8 }
  0x43   : > { %p7103_p1 = pnand %p7102_p13, %p7096_p11 }
  0x45   : > { %7106 = shalt.err (!%p7103_p1)
}
  0x46   : > { %s9758_s4 = smov 128   ;;  %s9764_s25 = smov 8  }
  0x47   : > { %6986 = dma.hbm_to_vmem [thread:$0]  (!%p7611_p12), %s9795_s23, 768, %s7607_s0, [#allocation6], %s9758_s4, %s9758_s4, %s9764_s25  }
  0x48   : > { %s9797_s27 = sld [smem:[#allocation38_spill]] }
  0x4e   : > { %s7107_s22 = scalar_lea.hbm %s9797_s27, 32 }
  0x4f   : > { %p7108_p6 = scmp.ne.s32.totalorder %s9797_s27, %s7107_s22  ;;  %p7114_p3 = scmp.lt.u32.totalorder %s7107_s22, %s9797_s27 }
  0x51   : > { %p7110_p9 = pnand %p7108_p6, %p7627_p0 }
  0x53   : > { %p7111_p2 = pneg %p7110_p9 }
  0x55   : > { %p7116_p4 = pnand %p7114_p3, %p7111_p2 }
  0x57   : > { %7119 = shalt.err (!%p7116_p4)
}
  0x58   : > { %s7120_s0 = scalar_lea.vmem %s7615_s6, 32  ;;  %p7128_p13 = scmp.lt.s32.totalorder %s7615_s6, %s7615_s6 }
  0x59   : > { %p7121_p7 = scmp.ne.s32.totalorder %s7615_s6, %s7120_s0  ;;  %p7129_p1 = scmp.lt.s32.totalorder %s7120_s0, %s7120_s0 }
  0x5b   : > { %p7123_p8 = pnand %p7121_p7, %p7627_p0  ;;  %p7130_p6 = por %p7129_p1, %p7128_p13 }
  0x5d   : > { %p7124_p11 = pneg %p7123_p8 }
  0x5f   : > { %p7131_p9 = pnand %p7130_p6, %p7124_p11 }
  0x61   : > { %7134 = shalt.err (!%p7131_p9)
}
  0x62   : > { %6992 = dma.hbm_to_vmem [thread:$0]  (!%p7611_p12), %s9797_s27, 32, %s7615_s6, [#allocation9]  }
  0x63   : > { %s9798_s9 = sld [smem:[#allocation40_spill]] }
  0x69   : > { %s7135_s26 = scalar_lea.hbm %s9798_s9, 768 }
  0x6a   : > { %p7136_p2 = scmp.ne.s32.totalorder %s9798_s9, %s7135_s26  ;;  %p7142_p7 = scmp.lt.u32.totalorder %s7135_s26, %s9798_s9 }
  0x6c   : > { %p7138_p3 = pnand %p7136_p2, %p7627_p0 }
  0x6e   : > { %p7139_p4 = pneg %p7138_p3 }
  0x70   : > { %p7144_p8 = pnand %p7142_p7, %p7139_p4 }
  0x72   : > { %7147 = shalt.err (!%p7144_p8)
}
  0x73   : > { %s7148_s0 = scalar_lea.vmem %s645_s24, 768  ;;  %p7156_p6 = scmp.lt.s32.totalorder %s645_s24, %s645_s24 }
  0x74   : > { %p7149_p11 = scmp.ne.s32.totalorder %s645_s24, %s7148_s0  ;;  %p7157_p9 = scmp.lt.s32.totalorder %s7148_s0, %s7148_s0 }
  0x76   : > { %p7151_p13 = pnand %p7149_p11, %p7627_p0  ;;  %p7158_p5 = por %p7157_p9, %p7156_p6 }
  0x78   : > { %p7152_p1 = pneg %p7151_p13 }
  0x7a   : > { %p7159_p10 = pnand %p7158_p5, %p7152_p1 }
  0x7c   : > { %7162 = shalt.err (!%p7159_p10)
}
  0x7d   : > { %6998 = dma.hbm_to_vmem [thread:$0]  (!%p7611_p12), %s9798_s9, 768, %s645_s24, [#allocation12], %s9758_s4, %s9758_s4, %s9764_s25  }
  0x7e   : > { %s7420_s20 = smov [#allocation14]   ;;  %s7421_s30 = smov [#allocation2]  }
  0x7f   : > { %s682_s21 = sshll.u32 %s7420_s20, 4  ;;  %s572_s26 = sshll.u32 %s7421_s30, 4  ;;  %s683_s21 = int_to_ptr.vmem [resolvable:$true] %s682_s21  ;;  %s573_s26 = int_to_ptr.vmem [resolvable:$true] %s572_s26 }
  0x80   : > { %s9799_s15 = sld [smem:[#allocation41_spill]] }
  0x86   : > { %s7163_s2 = scalar_lea.hbm %s9799_s15, 7168 }
  0x87   : > { %p7164_p5 = scmp.ne.s32.totalorder %s9799_s15, %s7163_s2  ;;  %p7170_p3 = scmp.lt.u32.totalorder %s7163_s2, %s9799_s15 }
  0x89   : > { %p7166_p10 = pnand %p7164_p5, %p7627_p0 }
  0x8b   : > { %p7167_p2 = pneg %p7166_p10 }
  0x8d   : > { %p7172_p4 = pnand %p7170_p3, %p7167_p2 }
  0x8f   : > { %7175 = shalt.err (!%p7172_p4)
}
  0x90   : > { %s7176_s24 = scalar_lea.vmem %s683_s21, 7168  ;;  %p7184_p13 = scmp.lt.s32.totalorder %s683_s21, %s683_s21 }
  0x91   : > { %p7177_p7 = scmp.ne.s32.totalorder %s683_s21, %s7176_s24  ;;  %p7185_p1 = scmp.lt.s32.totalorder %s7176_s24, %s7176_s24 }
  0x93   : > { %p7179_p8 = pnand %p7177_p7, %p7627_p0  ;;  %p7186_p6 = por %p7185_p1, %p7184_p13 }
  0x95   : > { %p7180_p11 = pneg %p7179_p8 }
  0x97   : > { %p7187_p9 = pnand %p7186_p6, %p7180_p11 }
  0x99   : > { %7190 = shalt.err (!%p7187_p9)
}
  0x9a   : > { %s9760_s19 = smov 256   ;;  %s9762_s20 = smov 16  }
  0x9b   : > { %7004 = dma.hbm_to_vmem [thread:$0]  (!%p7611_p12), %s9799_s15, 7168, %s683_s21, [#allocation15], %s9760_s19, %s9760_s19, %s9762_s20  }
  0x9c   : > { %s9800_s2 = sld [smem:[#allocation33_spill]] }
  0xa2   : > { %s7191_s22 = scalar_lea.hbm %s9800_s2, 2560 }
  0xa3   : > { %p7192_p5 = scmp.ne.s32.totalorder %s9800_s2, %s7191_s22  ;;  %p7198_p3 = scmp.lt.u32.totalorder %s7191_s22, %s9800_s2 }
  0xa5   : > { %p7194_p10 = pnand %p7192_p5, %p7627_p0 }
  0xa7   : > { %p7195_p2 = pneg %p7194_p10 }
  0xa9   : > { %p7200_p4 = pnand %p7198_p3, %p7195_p2 }
  0xab   : > { %7203 = shalt.err (!%p7200_p4)
}
  0xac   : > { %s7204_s23 = scalar_lea.vmem %s573_s26, 2560  ;;  %p7212_p13 = scmp.lt.s32.totalorder %s573_s26, %s573_s26 }
  0xad   : > { %p7205_p7 = scmp.ne.s32.totalorder %s573_s26, %s7204_s23  ;;  %p7213_p1 = scmp.lt.s32.totalorder %s7204_s23, %s7204_s23 }
  0xaf   : > { %p7207_p8 = pnand %p7205_p7, %p7627_p0  ;;  %p7214_p6 = por %p7213_p1, %p7212_p13 }
  0xb1   : > { %p7208_p11 = pneg %p7207_p8 }
  0xb3   : > { %p7215_p9 = pnand %p7214_p6, %p7208_p11 }
  0xb5   : > { %7218 = shalt.err (!%p7215_p9)
}
  0xb6   : > { %s9801_s21 = smov 128   ;;  %s7424_s28 = smov [#allocation7]  }
  0xb7   : > { %6983 = dma.hbm_to_vmem [thread:$0]  (!%p7611_p12), %s9800_s2, 2560, %s573_s26, [#allocation3], %s9801_s21, %s9801_s21, %s9764_s25  }
  0xb8   : > { %s604_s3 = sshll.u32 %s7424_s28, 4  ;;  %s7425_s22 = smov [#allocation10]   ;;  %s605_s3 = int_to_ptr.vmem [resolvable:$true] %s604_s3 }
  0xb9   : > { %s628_s0 = sshll.u32 %s7425_s22, 4  ;;  %s9802_s23 = sld [smem:[#allocation37_spill]]  ;;  %s629_s0 = int_to_ptr.vmem [resolvable:$true] %s628_s0 }
  0xbf   : > { %s7219_s19 = scalar_lea.hbm %s9802_s23, 16128 }
  0xc0   : > { %p7220_p5 = scmp.ne.s32.totalorder %s9802_s23, %s7219_s19  ;;  %p7226_p3 = scmp.lt.u32.totalorder %s7219_s19, %s9802_s23 }
  0xc2   : > { %p7222_p10 = pnand %p7220_p5, %p7627_p0 }
  0xc4   : > { %p7223_p2 = pneg %p7222_p10 }
  0xc6   : > { %p7228_p4 = pnand %p7226_p3, %p7223_p2 }
  0xc8   : > { %7231 = shalt.err (!%p7228_p4)
}
  0xc9   : > { %s7232_s26 = scalar_lea.vmem %s605_s3, 16128  ;;  %p7240_p13 = scmp.lt.s32.totalorder %s605_s3, %s605_s3 }
  0xca   : > { %p7233_p7 = scmp.ne.s32.totalorder %s605_s3, %s7232_s26  ;;  %p7241_p1 = scmp.lt.s32.totalorder %s7232_s26, %s7232_s26 }
  0xcc   : > { %p7235_p8 = pnand %p7233_p7, %p7627_p0  ;;  %p7242_p6 = por %p7241_p1, %p7240_p13 }
  0xce   : > { %p7236_p11 = pneg %p7235_p8 }
  0xd0   : > { %p7243_p9 = pnand %p7242_p6, %p7236_p11 }
  0xd2   : > { %7246 = shalt.err (!%p7243_p9)
}
  0xd3   : > { %s9803_s9 = smov 16   ;;  %s9804_s20 = smov 256  }
  0xd4   : > { %6989 = dma.hbm_to_vmem [thread:$0]  (!%p7611_p12), %s9802_s23, 16128, %s605_s3, [#allocation6], %s9804_s20, %s9804_s20, %s9803_s9  }
  0xd5   : > { %s9805_s22 = sld [smem:[#allocation39_spill]] }
  0xdb   : > { %s7247_s6 = scalar_lea.hbm %s9805_s22, 5376 }
  0xdc   : > { %p7248_p5 = scmp.ne.s32.totalorder %s9805_s22, %s7247_s6  ;;  %p7254_p3 = scmp.lt.u32.totalorder %s7247_s6, %s9805_s22 }
  0xde   : > { %p7250_p10 = pnand %p7248_p5, %p7627_p0 }
  0xe0   : > { %p7251_p2 = pneg %p7250_p10 }
  0xe2   : > { %p7256_p4 = pnand %p7254_p3, %p7251_p2 }
  0xe4   : > { %7259 = shalt.err (!%p7256_p4)
}
  0xe5   : > { %s7260_s15 = scalar_lea.vmem %s629_s0, 5376  ;;  %p7268_p13 = scmp.lt.s32.totalorder %s629_s0, %s629_s0 }
  0xe6   : > { %p7261_p7 = scmp.ne.s32.totalorder %s629_s0, %s7260_s15  ;;  %p7269_p1 = scmp.lt.s32.totalorder %s7260_s15, %s7260_s15 }
  0xe8   : > { %p7263_p8 = pnand %p7261_p7, %p7627_p0  ;;  %p7270_p6 = por %p7269_p1, %p7268_p13 }
  0xea   : > { %p7264_p11 = pneg %p7263_p8 }
  0xec   : > { %p7271_p9 = pnand %p7270_p6, %p7264_p11 }
  0xee   : > { %7274 = shalt.err (!%p7271_p9)
}
  0xef   : > { %6995 = dma.hbm_to_vmem [thread:$0]  (!%p7611_p12), %s9805_s22, 5376, %s629_s0, [#allocation9], %s9804_s20, %s9804_s20, %s9803_s9  }
  0xf0   : > { %s7426_s19 = smov [#allocation13]   ;;  %s7427_s28 = smov [#allocation16]  }
  0xf1   : > { %s663_s30 = sshll.u32 %s7426_s19, 4  ;;  %s701_s6 = sshll.u32 %s7427_s28, 4  ;;  %s664_s30 = int_to_ptr.vmem [resolvable:$true] %s663_s30  ;;  %s702_s6 = int_to_ptr.vmem [resolvable:$true] %s701_s6 }
  0xf2   : > { %s7275_s26 = scalar_lea.hbm %s9725_s12, 384 }
  0xf3   : > { %p7276_p5 = scmp.ne.s32.totalorder %s9725_s12, %s7275_s26  ;;  %p7282_p3 = scmp.lt.u32.totalorder %s7275_s26, %s9725_s12 }
  0xf5   : > { %p7278_p10 = pnand %p7276_p5, %p7627_p0 }
  0xf7   : > { %p7279_p2 = pneg %p7278_p10 }
  0xf9   : > { %p7284_p4 = pnand %p7282_p3, %p7279_p2 }
  0xfb   : > { %7287 = shalt.err (!%p7284_p4)
}
  0xfc   : > { %s7288_s0 = scalar_lea.vmem %s664_s30, 384  ;;  %p7296_p13 = scmp.lt.s32.totalorder %s664_s30, %s664_s30 }
  0xfd   : > { %p7289_p7 = scmp.ne.s32.totalorder %s664_s30, %s7288_s0  ;;  %p7297_p1 = scmp.lt.s32.totalorder %s7288_s0, %s7288_s0 }
  0xff   : > { %p7291_p8 = pnand %p7289_p7, %p7627_p0  ;;  %p7298_p6 = por %p7297_p1, %p7296_p13 }
 0x101   : > { %p7292_p11 = pneg %p7291_p8 }
 0x103   : > { %p7299_p9 = pnand %p7298_p6, %p7292_p11 }
 0x105   : > { %7302 = shalt.err (!%p7299_p9)
}
 0x106   : > { %s9806_s2 = smov 8   ;;  %s7303_s24 = scalar_lea.hbm %s9731_s18, 21504 }
 0x107   : > { %7001 = dma.hbm_to_vmem [thread:$0]  (!%p7611_p12), %s9725_s12, 384, %s664_s30, [#allocation12], %s9801_s21, %s9801_s21, %s9806_s2  }
 0x108   : > { %p7304_p5 = scmp.ne.s32.totalorder %s9731_s18, %s7303_s24  ;;  %p7310_p3 = scmp.lt.u32.totalorder %s7303_s24, %s9731_s18 }
 0x10a   : > { %p7306_p10 = pnand %p7304_p5, %p7627_p0 }
 0x10c   : > { %p7307_p2 = pneg %p7306_p10 }
 0x10e   : > { %p7312_p4 = pnand %p7310_p3, %p7307_p2 }
 0x110   : > { %7315 = shalt.err (!%p7312_p4)
}
 0x111   : > { %s7316_s0 = scalar_lea.vmem %s702_s6, 21504  ;;  %p7324_p13 = scmp.lt.s32.totalorder %s702_s6, %s702_s6 }
 0x112   : > { %p7317_p7 = scmp.ne.s32.totalorder %s702_s6, %s7316_s0  ;;  %p7325_p1 = scmp.lt.s32.totalorder %s7316_s0, %s7316_s0 }
 0x114   : > { %p7319_p8 = pnand %p7317_p7, %p7627_p0  ;;  %p7326_p6 = por %p7325_p1, %p7324_p13 }
 0x116   : > { %p7320_p11 = pneg %p7319_p8 }
 0x118   : > { %p7327_p9 = pnand %p7326_p6, %p7320_p11 }
 0x11a   : > { %7330 = shalt.err (!%p7327_p9)
}
 0x11b   : > { %7007 = dma.hbm_to_vmem [thread:$0]  (!%p7611_p12), %s9731_s18, 21504, %s702_s6, [#allocation15], %s9804_s20, %s9804_s20, %s9803_s9  }
 0x11c   : > { %p9807_p5 = scmp.ne.s32.totalorder %s9792_s29, 0 }
 0x11d   : > { %p9808_p0 = scmp.eq.s32.totalorder (!%p9807_p5), %s7573_s5, 0 }
 0x11e   : > { %737 = sbr.rel (%p9807_p5) target bundleno = 3624 (0xe28), region = 112 }
 0x125   : > { %7376 = dma.done.wait (%p9808_p0), [#allocation3], 2560   ;;  %p9809_p10 = pmov %p9808_p0 }
 0x126   : > { %p9810_p2 = pmov %p9808_p0 }
 0x127   : > { %7378 = vsyncadd (%p9809_p10), [#allocation3], 4294964736 }
 0x128   : > { %7380 = dma.done.wait (%p9810_p2), [#allocation6], 16896   ;;  %p9811_p3 = pmov %p9808_p0 }
 0x129   : > { %p9812_p4 = pmov %p9808_p0 }
 0x12a   : > { %7382 = vsyncadd (%p9811_p3), [#allocation6], 4294950400 }
 0x12b   : > { %7384 = dma.done.wait (%p9812_p4), [#allocation9], 5408   ;;  %p9813_p12 = pmov %p9808_p0 }
 0x12c   : > { %p9814_p7 = pmov %p9808_p0 }
 0x12d   : > { %7386 = vsyncadd (%p9813_p12), [#allocation9], 4294961888 }
 0x12e   : > { %7388 = dma.done.wait (%p9814_p7), [#allocation12], 1152   ;;  %p9815_p8 = pmov %p9808_p0 }
 0x12f   : > { %p9816_p11 = pmov %p9808_p0 }
 0x130   : > { %7390 = vsyncadd (%p9815_p8), [#allocation12], 4294966144 }
 0x131   : > { %7392 = dma.done.wait (%p9816_p11), [#allocation15], 28672   ;;  %p9817_p13 = pmov %p9808_p0 }
 0x132   : > { %p832_p1 = scmp.lt.s32.totalorder %s7573_s5, 1  ;;  %s9818_s20 = sld [smem:[#allocation32_spill]]  ;;  %vm845_vm0 = vcmask 261120   ;;  %v841_v5 = vld [vmem:[#allocation2] sm:$0xff]  ;;  %v842_v7 = vld [vmem:[#allocation2 + $0x8] sm:$0xff]  ;;  %v843_v8 = vld [vmem:[#allocation2 + $0x10] sm:$0xff] }
 0x133   : > { %7394 = vsyncadd (%p9817_p13), [#allocation15], 4294938624  ;;  %5818 = vmatprep.mubr.msk.f32.mxu1 %vm845_vm0, %v841_v5  ;;  %s9819_s3 = sld [smem:[#allocation34_spill]]  ;;  %v844_v22 = vld [vmem:[#allocation2 + $0x18] sm:$0xf]  ;;  %v968_v23 = vld [vmem:[#allocation2 + $0x20] sm:$0xff] }
 0x134   : > { %s833_s7 = scalar_select %p832_p1, %s7573_s5, 1  ;;  %v969_v30 = vld [vmem:[#allocation2 + $0x28] sm:$0xff]  ;;  %v970_v31 = vld [vmem:[#allocation2 + $0x30] sm:$0xff]  ;;  %v971_v36 = vld [vmem:[#allocation2 + $0x38] sm:$0xf]  ;;  %vm1094_vm1 = vcmask 785408  }
 0x135   : > { %v1298_v37 = vld [vmem:[#allocation2 + $0x40] sm:$0xff]  ;;  %v1299_v39 = vld [vmem:[#allocation2 + $0x48] sm:$0xff]  ;;  %v1300_v40 = vld [vmem:[#allocation2 + $0x50] sm:$0xff]  ;;  %s9820_s25 = sld [smem:[#allocation35_spill]]  ;;  %vm2042_vm2 = vcmask 1043456   ;;  %vm7429_vm3 = vmmov 1  }
 0x136   : > { %s5769_s29 = sshll.u32 %s833_s7, 5  ;;  %v1301_v41 = vld [vmem:[#allocation2 + $0x58] sm:$0xf]  ;;  %v1534_v42 = vld [vmem:[#allocation2 + $0x60] sm:$0xff]  ;;  %v1535_v43 = vld [vmem:[#allocation2 + $0x68] sm:$0xff]  ;;  %vm2035_vm5 = vcmask 228352  }
 0x137   : > { %v1536_v44 = vld [vmem:[#allocation2 + $0x70] sm:$0xff]  ;;  %v1537_v45 = vld [vmem:[#allocation2 + $0x78] sm:$0xf]  ;;  %v1770_v46 = vld [vmem:[#allocation2 + $0x80] sm:$0xff]  ;;  %vm2383_vm6 = vcmask 326656   ;;  %vm2840_vm7 = vcmask 1045504  }
 0x138   : > { %s836_s6 = scalar_lea.vmem %s9818_s20, %s5769_s29  ;;  %v1771_v47 = vld [vmem:[#allocation2 + $0x88] sm:$0xff]  ;;  %v1772_v48 = vld [vmem:[#allocation2 + $0x90] sm:$0xff]  ;;  %v1773_v49 = vld [vmem:[#allocation2 + $0x98] sm:$0xf]  ;;  %vm2833_vm9 = vcmask 113664   ;;  %vm4330_vm10 = vcmask 1046528  }
 0x139   : > { %v837_v0 = vld [vmem:[%s836_s6] sm:$0xff]  ;;  %v838_v1 = vld [vmem:[%s836_s6 + $0x8] sm:$0xff]  ;;  %v839_v2 = vld [vmem:[%s836_s6 + $0x10] sm:$0xff]  ;;  %vm4326_vm11 = vcmask 56320   ;;  %s9825_s29 = sld [smem:[#allocation42_spill]]  ;;  %s9826_s20 = sld [smem:[#allocation44_spill]] }
 0x13a   : > { %v7849_v3 = vpack.c.bf16 %v838_v1, %v837_v0  ;;  %v840_v4 = vld [vmem:[%s836_s6 + $0x18] sm:$0xff]  ;;  %v5346_v9 = vld [vmem:[%s9819_s3 + $0xc8] sm:$0xff]  ;;  %v5345_v11 = vld [vmem:[%s9819_s3 + $0xc0] sm:$0xff]  ;;  %v7428_v1 = vmov 0.0   ;;  %s9827_s28 = sld [smem:[#allocation43_spill]]  ;;  %s9828_s6 = sld [smem:[#allocation25_spill]] }
 0x13b   : > { %v7851_v6 = vpack.c.bf16 %v840_v4, %v839_v2  ;;  %v5348_v10 = vld [vmem:[%s9819_s3 + $0xd8] sm:$0xff]  ;;  %v5347_v13 = vld [vmem:[%s9819_s3 + $0xd0] sm:$0xff]  ;;  %v5350_v14 = vld [vmem:[%s9819_s3 + $0xe8] sm:$0xff]  ;;  %1171 = vmatprep.mubr.f32.mxu0 %v7428_v1  ;;  %s9829_s26 = sld [smem:[#allocation30_spill]]  ;;  %s5766_s30 = sshll.u32 %s7573_s5, 4  ;;  %vm5155_vm12 = vcmask 73728  }
 0x13c   : > { %5881 = vmatprep.subr.bf16.mxu1 %v7849_v3  ;;  %v5896_v12 = vpack.c.bf16 %v5348_v10, %v5346_v9  ;;  %v5352_v15 = vld [vmem:[%s9819_s3 + $0xf8] sm:$0xff]  ;;  %v5898_v16 = vpack.c.bf16 %v5347_v13, %v5345_v11  ;;  %v5349_v18 = vld [vmem:[%s9819_s3 + $0xe0] sm:$0xff]  ;;  %v5351_v19 = vld [vmem:[%s9819_s3 + $0xf0] sm:$0xff]  ;;  %s9830_s21 = sld [smem:[#allocation45_spill]]  ;;  %s9831_s2 = sld [smem:[#allocation46_spill]] }
 0x13d   : > { %5883 = vmatpush3.bf16.msra.mxu1 %v7849_v3  ;;  %v5900_v17 = vpack.c.bf16 %v5352_v15, %v5350_v14  ;;  %v5354_v20 = vld [vmem:[%s9819_s3 + $0x108] sm:$0xff]  ;;  %v5356_v21 = vld [vmem:[%s9819_s3 + $0x118] sm:$0xff]  ;;  %v5902_v24 = vpack.c.bf16 %v5351_v19, %v5349_v18  ;;  %v5353_v26 = vld [vmem:[%s9819_s3 + $0x100] sm:$0xff]  ;;  %s7431_s5 = smov [#allocation17]  }
 0x13e   : > { %5885 = vmatprep.subr.bf16.mxu1 %v7851_v6  ;;  %5897 = vmatprep.subr.bf16.mxu0 %v5896_v12  ;;  %v5904_v25 = vpack.c.bf16 %v5356_v21, %v5354_v20  ;;  %v5355_v27 = vld [vmem:[%s9819_s3 + $0x110] sm:$0xff]  ;;  %v5358_v28 = vld [vmem:[%s9819_s3 + $0x128] sm:$0xff]  ;;  %v5360_v29 = vld [vmem:[%s9819_s3 + $0x138] sm:$0xff] }
 0x13f   : > { %5899 = vmatpush1.bf16.msra.mxu0 %v5898_v16  ;;  %v5906_v32 = vpack.c.bf16 %v5355_v27, %v5353_v26  ;;  %v5908_v33 = vpack.c.bf16 %v5360_v29, %v5358_v28  ;;  %v5357_v34 = vld [vmem:[%s9819_s3 + $0x120] sm:$0xff]  ;;  %v5359_v35 = vld [vmem:[%s9819_s3 + $0x130] sm:$0xff]  ;;  %v5362_v50 = vld [vmem:[%s9819_s3 + $0x148] sm:$0xff] }
 0x140   : > { %5901 = vmatprep.subr.bf16.mxu0 %v5900_v17  ;;  %v5910_v38 = vpack.c.bf16 %v5359_v35, %v5357_v34  ;;  %v5364_v51 = vld [vmem:[%s9819_s3 + $0x158] sm:$0xff]  ;;  %v5361_v53 = vld [vmem:[%s9819_s3 + $0x140] sm:$0xff]  ;;  %v5363_v54 = vld [vmem:[%s9819_s3 + $0x150] sm:$0xff]  ;;  %s830_s15 = sand.u32 1, %s9828_s6  }
 0x141   : > { %5887 = vmatpush3.bf16.msra.mxu1 %v7851_v6  ;;  %v5912_v52 = vpack.c.bf16 %v5364_v51, %v5362_v50  ;;  %v5914_v55 = vpack.c.bf16 %v5363_v54, %v5361_v53  ;;  %v5366_v56 = vld [vmem:[%s9819_s3 + $0x168] sm:$0xff]  ;;  %v5368_v57 = vld [vmem:[%s9819_s3 + $0x178] sm:$0xff]  ;;  %v5365_v59 = vld [vmem:[%s9819_s3 + $0x160] sm:$0xff]  ;;  %s831_s7 = scalar_lea.vmem [#allocation17], %s830_s15  ;;  %s5158_s6 = scalar_lea.sflag [#allocation4], %s830_s15 }
 0x142   : > { %5889 = vmatprep.subr.bf16.mxu1 %v7849_v3  ;;  %v5916_v58 = vpack.c.bf16 %v5368_v57, %v5366_v56  ;;  %v5367_v60 = vld [vmem:[%s9819_s3 + $0x170] sm:$0xff]  ;;  %v944_v62 = vld [vmem:[%s9819_s3 + $0x8] sm:$0xff]  ;;  %v946_v63 = vld [vmem:[%s9819_s3 + $0x18] sm:$0xff]  ;;  %s9671_s23 = scalar_lea.hbm %s9831_s2, %s5766_s30  ;;  %p9832_p9 = scmp.ne.s32.totalorder %s9829_s26, 0 }
 0x143   : > { %5903 = vmatpush1.bf16.msra.mxu0 %v5902_v24  ;;  %v5918_v61 = vpack.c.bf16 %v5367_v60, %v5365_v59  ;;  %v5920_v0 = vpack.c.bf16 %v946_v63, %v944_v62  ;;  %v943_v5 = vld [vmem:[%s9819_s3] sm:$0xff]  ;;  %v950_v9 = vld [vmem:[%s9819_s3 + $0x38] sm:$0xff]  ;;  %v949_v14 = vld [vmem:[%s9819_s3 + $0x30] sm:$0xff] }
 0x144   : > { %5819 = vmatmul.mubr.msk.f32.vlgmr.msra.gmra.mrb[0].mxu1 %vm845_vm0, %v842_v7  ;;  %5905 = vmatprep.subr.bf16.mxu0 %v5904_v25  ;;  %v947_v13 = vld [vmem:[%s9819_s3 + $0x20] sm:$0xff]  ;;  %v952_v16 = vld [vmem:[%s9819_s3 + $0x48] sm:$0xff]  ;;  %v954_v17 = vld [vmem:[%s9819_s3 + $0x58] sm:$0xff] }
 0x145   : > { %5891 = vmatpush3.bf16.msra.mxu1 %v7849_v3  ;;  %5821 = vmatprep.mubr.msk.f32.mxu1 %vm845_vm0, %v843_v8  ;;  %v948_v8 = vld [vmem:[%s9819_s3 + $0x28] sm:$0xff]  ;;  %v5926_v18 = vpack.c.bf16 %v949_v14, %v947_v13  ;;  %v5928_v19 = vpack.c.bf16 %v954_v17, %v952_v16  ;;  %v951_v20 = vld [vmem:[%s9819_s3 + $0x40] sm:$0xff]  ;;  %v953_v21 = vld [vmem:[%s9819_s3 + $0x50] sm:$0xff] }
 0x146   : > { %5893 = vmatprep.subr.bf16.mxu1 %v7851_v6  ;;  %v5924_v12 = vpack.c.bf16 %v950_v9, %v948_v8  ;;  %v956_v24 = vld [vmem:[%s9819_s3 + $0x68] sm:$0xff]  ;;  %v958_v25 = vld [vmem:[%s9819_s3 + $0x78] sm:$0xff]  ;;  %v5930_v26 = vpack.c.bf16 %v953_v21, %v951_v20  ;;  %v955_v28 = vld [vmem:[%s9819_s3 + $0x60] sm:$0xff] }
 0x147   : > { %5907 = vmatpush1.bf16.msra.mxu0 %v5906_v32  ;;  %v5932_v27 = vpack.c.bf16 %v958_v25, %v956_v24  ;;  %v957_v29 = vld [vmem:[%s9819_s3 + $0x70] sm:$0xff]  ;;  %v962_v32 = vld [vmem:[%s9819_s3 + $0x98] sm:$0xff]  ;;  %v5385_v60 = vld [vmem:[%s9819_s3 + $0x1a0] sm:$0xff] }
 0x148   : > { %5822 = vmatmul.mubr.msk.f32.gmra.mrb[2].mxu1 %vm845_vm0, %v844_v22  ;;  %5909 = vmatprep.subr.bf16.mxu0 %v5908_v33  ;;  %v5934_v34 = vpack.c.bf16 %v957_v29, %v955_v28  ;;  %v5383_v53 = vld [vmem:[%s9819_s3 + $0x190] sm:$0xff]  ;;  %v5388_v56 = vld [vmem:[%s9819_s3 + $0x1b8] sm:$0xff]  ;;  %v5390_v63 = vld [vmem:[%s9819_s3 + $0x1c8] sm:$0xff] }
 0x149   : > { %5895 = vmatpush3.bf16.msra.mxu1 %v7851_v6  ;;  %5832 = vmatprep.mubr.msk.f32.mxu1 %vm845_vm0, %v968_v23  ;;  %v5389_v9 = vld [vmem:[%s9819_s3 + $0x1c0] sm:$0xff]  ;;  %v5395_v17 = vld [vmem:[%s9819_s3 + $0x1f0] sm:$0xff]  ;;  %v5414_v28 = vld [vmem:[%s9819_s3 + $0x248] sm:$0xff] }
 0x14a   : > { %5945 = vmatprep.subr.bf16.mxu1 %v7849_v3  ;;  %v5393_v16 = vld [vmem:[%s9819_s3 + $0x1e0] sm:$0xff]  ;;  %vm8352_vm4 = vmpackc.low %vm2042_vm2, %vm7429_vm3 }
 0x14b   : > { %5911 = vmatpush1.bf16.msra.mxu0 %v5910_v38  ;;  %v5397_v21 = vld [vmem:[%s9819_s3 + $0x200] sm:$0xff]  ;;  %vm8588_vm8 = vmpackc.low %vm2840_vm7, %vm7429_vm3 }
 0x14c   : > { %5833 = vmatmul.mubr.msk.f32.vlgmr.msra.gmra.mrb[4].mxu1 %vm845_vm0, %v969_v30  ;;  %5913 = vmatprep.subr.bf16.mxu0 %v5912_v52  ;;  %v5381_v52 = vld [vmem:[%s9819_s3 + $0x180] sm:$0xff] }
 0x14d   : > { %5835 = vmatprep.mubr.msk.f32.mxu1 %vm845_vm0, %v970_v31  ;;  %5947 = vmatpush3.bf16.msra.mxu1 %v7849_v3  ;;  %v960_v31 = vld [vmem:[%s9819_s3 + $0x88] sm:$0xff] }
 0x14e   : > { %5949 = vmatprep.subr.bf16.mxu1 %v7851_v6  ;;  %v5936_v35 = vpack.c.bf16 %v962_v32, %v960_v31  ;;  %v5413_v32 = vld [vmem:[%s9819_s3 + $0x240] sm:$0xff] }
 0x14f   : > { %5915 = vmatpush1.bf16.msra.mxu0 %v5914_v55  ;;  %v5386_v55 = vld [vmem:[%s9819_s3 + $0x1a8] sm:$0xff] }
 0x150   : > { %5836 = vmatmul.mubr.msk.f32.gmra.mrb[6].mxu1 %vm845_vm0, %v971_v36  ;;  %5917 = vmatprep.subr.bf16.mxu0 %v5916_v58  ;;  %v959_v36 = vld [vmem:[%s9819_s3 + $0x80] sm:$0xff]  ;;  %v5954_v58 = vpack.c.bf16 %v5383_v53, %v5381_v52  ;;  %v5956_v59 = vpack.c.bf16 %v5388_v56, %v5386_v55  ;;  %v5427_v56 = vld [vmem:[%s9819_s3 + $0x2b0] sm:$0xff] }
 0x151   : > { %5951 = vmatpush3.bf16.msra.mxu1 %v7851_v6  ;;  %5846 = vmatprep.mubr.msk.f32.mxu1 %vm845_vm0, %v1298_v37  ;;  %v961_v37 = vld [vmem:[%s9819_s3 + $0x90] sm:$0xff]  ;;  %v5425_v55 = vld [vmem:[%s9819_s3 + $0x2a0] sm:$0xff] }
 0x152   : > { %5977 = vmatprep.subr.bf16.mxu1 %v7849_v3 }
 0x153   : > { %5919 = vmatpush1.bf16.msra.mxu0 %v5918_v61  ;;  %v5387_v61 = vld [vmem:[%s9819_s3 + $0x1b0] sm:$0xff] }
 0x154   : > { %5847 = vmatmul.mubr.msk.f32.vlgmr.msra.gmra.mrb[8].mxu1 %vm845_vm0, %v1299_v39  ;;  %5921 = vmatprep.subr.bf16.mxu0 %v5920_v0  ;;  %v964_v39 = vld [vmem:[%s9819_s3 + $0xa8] sm:$0xff]  ;;  %v5392_v0 = vld [vmem:[%s9819_s3 + $0x1d8] sm:$0xff] }
 0x155   : > { %5849 = vmatprep.mubr.msk.f32.mxu1 %vm845_vm0, %v1300_v40  ;;  %5979 = vmatpush3.bf16.msra.mxu1 %v7849_v3  ;;  %v966_v40 = vld [vmem:[%s9819_s3 + $0xb8] sm:$0xff]  ;;  %v5960_v8 = vpack.c.bf16 %v5392_v0, %v5390_v63  ;;  %v5431_v63 = vld [vmem:[%s9819_s3 + $0x2d0] sm:$0xff]  ;;  %v5434_v0 = vld [vmem:[%s9819_s3 + $0x2e8] sm:$0xff] }
 0x156   : > { %5981 = vmatprep.subr.bf16.mxu1 %v7851_v6 }
 0x158   : > { %5850 = vmatmul.mubr.msk.f32.gmra.mrb[10].mxu1 %vm845_vm0, %v1301_v41 }
 0x159   : > { %5983 = vmatpush3.bf16.msra.mxu1 %v7851_v6  ;;  %5860 = vmatprep.mubr.msk.f32.mxu1 %vm845_vm0, %v1534_v42  ;;  %v5938_v42 = vpack.c.bf16 %v961_v37, %v959_v36  ;;  %v5420_v36 = vld [vmem:[%s9819_s3 + $0x278] sm:$0xff] }
 0x15a   : > { %6009 = vmatprep.subr.bf16.mxu1 %v7849_v3 }
 0x15c   : > { %5861 = vmatmul.mubr.msk.f32.vlgmr.msra.gmra.mrb[12].mxu1 %vm845_vm0, %v1535_v43  ;;  %v5940_v43 = vpack.c.bf16 %v966_v40, %v964_v39  ;;  %v5417_v40 = vld [vmem:[%s9819_s3 + $0x260] sm:$0xff] }
 0x15d   : > { %5863 = vmatprep.mubr.msk.f32.mxu1 %vm845_vm0, %v1536_v44  ;;  %6011 = vmatpush3.bf16.msra.mxu1 %v7849_v3  ;;  %v963_v44 = vld [vmem:[%s9819_s3 + $0xa0] sm:$0xff] }
 0x15e   : > { %6013 = vmatprep.subr.bf16.mxu1 %v7851_v6 }
 0x160   : > { %5864 = vmatmul.mubr.msk.f32.gmra.mrb[14].mxu1 %vm845_vm0, %v1537_v45  ;;  %v965_v45 = vld [vmem:[%s9819_s3 + $0xb0] sm:$0xff] }
 0x161   : > { %6015 = vmatpush3.bf16.msra.mxu1 %v7851_v6  ;;  %5874 = vmatprep.mubr.msk.f32.mxu1 %vm845_vm0, %v1770_v46  ;;  %v945_v6 = vld [vmem:[%s9819_s3 + $0x10] sm:$0xff]  ;;  %v5942_v50 = vpack.c.bf16 %v965_v45, %v963_v44  ;;  %v5424_v44 = vld [vmem:[%s9819_s3 + $0x298] sm:$0xff] }
 0x162   : > { %v5922_v10 = vpack.c.bf16 %v945_v6, %v943_v5  ;;  %v5958_v6 = vpack.c.bf16 %v5387_v61, %v5385_v60  ;;  %v5429_v61 = vld [vmem:[%s9819_s3 + $0x2c0] sm:$0xff] }
 0x164   : > { %5875 = vmatmul.mubr.msk.f32.vlgmr.msra.gmra.mrb[16].mxu1 %vm845_vm0, %v1771_v47  ;;  %v5382_v47 = vld [vmem:[%s9819_s3 + $0x188] sm:$0xff] }
 0x165   : > { %5877 = vmatprep.mubr.msk.f32.mxu1 %vm845_vm0, %v1772_v48  ;;  %v5384_v48 = vld [vmem:[%s9819_s3 + $0x198] sm:$0xff] }
 0x166   : > { %v5952_v51 = vpack.c.bf16 %v5384_v48, %v5382_v47  ;;  %v5421_v48 = vld [vmem:[%s9819_s3 + $0x280] sm:$0xff] }
 0x168   : > { %5878 = vmatmul.mubr.msk.f32.gmra.mrb[18].mxu1 %vm845_vm0, %v1773_v49 }
 0x169   : > { %2113 = vmatprep.mubr.f32.mxu1 %v7428_v1 }
 0x217   : > { %v7973_v2 = vpop.f32.mrb[0].mxu1 }
 0x218   : > { %v7975_v3 = vpop.f32.mrb[1].mxu1 }
 0x21b   : > { %v7977_v4 = vpop.f32.mrb[2].mxu1 }
 0x21c   : > { %v7985_v7 = vpop.f32.mrb[3].mxu1 }
 0x21f   : > { %v5834_v11 = vpop.f32.mrb[4].mxu1 }
 0x220   : > { %v1050_v15 = vpop.f32.mrb[5].mxu1 }
 0x221   : > { %5369 = vmatmul.mubr.msk.f32.vlgmr.msra.gmra.mrb[0].mxu0 %vm1094_vm1, %v1050_v15 }
 0x222   : > { %5923 = vmatpush1.bf16.msra.mxu0 %v5922_v10  ;;  %1177 = vmatprep.mubr.f32.mxu0 %v7428_v1  ;;  %v5391_v10 = vld [vmem:[%s9819_s3 + $0x1d0] sm:$0xff] }
 0x223   : > { %5925 = vmatprep.subr.bf16.mxu0 %v5924_v12  ;;  %v5837_v22 = vpop.f32.mrb[6].mxu1  ;;  %v5396_v12 = vld [vmem:[%s9819_s3 + $0x1f8] sm:$0xff]  ;;  %v5962_v14 = vpack.c.bf16 %v5391_v10, %v5389_v9  ;;  %v5433_v9 = vld [vmem:[%s9819_s3 + $0x2e0] sm:$0xff]  ;;  %v5435_v10 = vld [vmem:[%s9819_s3 + $0x2f0] sm:$0xff] }
 0x224   : > { %v1060_v23 = vpop.f32.mrb[7].mxu1 }
 0x225   : > { %5370 = vmatmul.mubr.msk.f32.gmra.mrb[2].mxu0 %vm1094_vm1, %v5834_v11 }
 0x226   : > { %5927 = vmatpush1.bf16.msra.mxu0 %v5926_v18  ;;  %1183 = vmatprep.mubr.f32.mxu0 %v7428_v1  ;;  %v5398_v18 = vld [vmem:[%s9819_s3 + $0x208] sm:$0xff] }
 0x227   : > { %5929 = vmatprep.subr.bf16.mxu0 %v5928_v19  ;;  %v8027_v30 = vpop.f32.mrb[8].mxu1  ;;  %v5966_v19 = vpack.c.bf16 %v5395_v17, %v5393_v16  ;;  %v5447_v16 = vld [vmem:[%s9819_s3 + $0x310] sm:$0xff]  ;;  %v5450_v17 = vld [vmem:[%s9819_s3 + $0x328] sm:$0xff] }
 0x228   : > { %v8035_v33 = vpop.f32.mrb[9].mxu1 }
 0x229   : > { %5371 = vmatmul.mubr.msk.f32.gmra.mrb[4].mxu0 %vm1094_vm1, %v1060_v23  ;;  %v5402_v23 = vld [vmem:[%s9819_s3 + $0x228] sm:$0xff] }
 0x22a   : > { %5931 = vmatpush1.bf16.msra.mxu0 %v5930_v26  ;;  %1189 = vmatprep.mubr.f32.mxu0 %v7428_v1  ;;  %v5401_v26 = vld [vmem:[%s9819_s3 + $0x220] sm:$0xff] }
 0x22b   : > { %5933 = vmatprep.subr.bf16.mxu0 %v5932_v27  ;;  %v8045_v38 = vpop.f32.mrb[10].mxu1  ;;  %v5403_v27 = vld [vmem:[%s9819_s3 + $0x230] sm:$0xff] }
 0x22c   : > { %v8053_v41 = vpop.f32.mrb[11].mxu1  ;;  %v5974_v29 = vpack.c.bf16 %v5403_v27, %v5401_v26  ;;  %v5455_v26 = vld [vmem:[%s9819_s3 + $0x350] sm:$0xff]  ;;  %v5458_v27 = vld [vmem:[%s9819_s3 + $0x368] sm:$0xff] }
 0x22d   : > { %5372 = vmatmul.mubr.msk.f32.gmra.mrb[6].mxu0 %vm1094_vm1, %v5837_v22  ;;  %v5399_v22 = vld [vmem:[%s9819_s3 + $0x210] sm:$0xff] }
 0x22e   : > { %5935 = vmatpush1.bf16.msra.mxu0 %v5934_v34  ;;  %1272 = vmatprep.mubr.f32.mxu0 %v7428_v1  ;;  %v5970_v24 = vpack.c.bf16 %v5399_v22, %v5397_v21  ;;  %v5415_v34 = vld [vmem:[%s9819_s3 + $0x250] sm:$0xff]  ;;  %v5454_v22 = vld [vmem:[%s9819_s3 + $0x348] sm:$0xff] }
 0x22f   : > { %5937 = vmatprep.subr.bf16.mxu0 %v5936_v35  ;;  %v8063_v46 = vpop.f32.mrb[12].mxu1  ;;  %v5418_v35 = vld [vmem:[%s9819_s3 + $0x268] sm:$0xff]  ;;  %v5986_v37 = vpack.c.bf16 %v5415_v34, %v5413_v32  ;;  %v5451_v21 = vld [vmem:[%s9819_s3 + $0x330] sm:$0xff] }
 0x230   : > { %v8071_v49 = vpop.f32.mrb[13].mxu1  ;;  %v5988_v39 = vpack.c.bf16 %v5420_v36, %v5418_v35  ;;  %v5462_v32 = vld [vmem:[%s9819_s3 + $0x388] sm:$0xff]  ;;  %v5461_v36 = vld [vmem:[%s9819_s3 + $0x380] sm:$0xff] }
 0x232   : > { %5939 = vmatpush1.bf16.msra.mxu0 %v5938_v42  ;;  %v5419_v42 = vld [vmem:[%s9819_s3 + $0x270] sm:$0xff] }
 0x233   : > { %5941 = vmatprep.subr.bf16.mxu0 %v5940_v43  ;;  %v8079_v54 = vpop.f32.mrb[14].mxu1  ;;  %v5422_v43 = vld [vmem:[%s9819_s3 + $0x288] sm:$0xff]  ;;  %v5990_v45 = vpack.c.bf16 %v5419_v42, %v5417_v40 }
 0x234   : > { %v8087_v57 = vpop.f32.mrb[15].mxu1  ;;  %v5992_v47 = vpack.c.bf16 %v5424_v44, %v5422_v43  ;;  %v5465_v43 = vld [vmem:[%s9819_s3 + $0x3a0] sm:$0xff]  ;;  %v5467_v44 = vld [vmem:[%s9819_s3 + $0x3b0] sm:$0xff] }
 0x236   : > { %5943 = vmatpush1.bf16.msra.mxu0 %v5942_v50  ;;  %v5423_v50 = vld [vmem:[%s9819_s3 + $0x290] sm:$0xff] }
 0x237   : > { %5953 = vmatprep.subr.bf16.mxu0 %v5952_v51  ;;  %v8095_v62 = vpop.f32.mrb[16].mxu1  ;;  %v5426_v51 = vld [vmem:[%s9819_s3 + $0x2a8] sm:$0xff]  ;;  %v5994_v52 = vpack.c.bf16 %v5423_v50, %v5421_v48 }
 0x238   : > { %v8103_v5 = vpop.f32.mrb[17].mxu1  ;;  %v2700_v50 = vld [vmem:[#allocation10] sm:$0xff] }
 0x239   : > { %5373 = vmatmul.mubr.msk.f32.vlgmr.msra.gmra.mrb[0].mxu0 %vm1094_vm1, %v7975_v3  ;;  %v5394_v3 = vld [vmem:[%s9819_s3 + $0x1e8] sm:$0xff] }
 0x23a   : > { %5955 = vmatpush1.bf16.msra.mxu0 %v5954_v58  ;;  %1278 = vmatprep.mubr.f32.mxu0 %v7428_v1  ;;  %v5964_v15 = vpack.c.bf16 %v5396_v12, %v5394_v3  ;;  %v5430_v58 = vld [vmem:[%s9819_s3 + $0x2c8] sm:$0xff]  ;;  %v6006_v12 = vpack.c.bf16 %v5435_v10, %v5433_v9  ;;  %v2719_v10 = vld [vmem:[#allocation10 + $0x98] sm:$0xff] }
 0x23b   : > { %5957 = vmatprep.subr.bf16.mxu0 %v5956_v59  ;;  %v8114_v11 = vpop.f32.mrb[18].mxu1  ;;  %v5998_v59 = vpack.c.bf16 %v5427_v56, %v5425_v55  ;;  %v5446_v3 = vld [vmem:[%s9819_s3 + $0x308] sm:$0xff]  ;;  %v2706_v55 = vld [vmem:[#allocation10 + $0x30] sm:$0xff] }
 0x23c   : > { %v8122_v13 = vpop.f32.mrb[19].mxu1  ;;  %v2717_v9 = vld [vmem:[#allocation10 + $0x88] sm:$0xff] }
 0x23d   : > { %5374 = vmatmul.mubr.msk.f32.gmra.mrb[2].mxu0 %vm1094_vm1, %v7973_v2  ;;  %v5400_v2 = vld [vmem:[%s9819_s3 + $0x218] sm:$0xff] }
 0x23e   : > { %5959 = vmatpush1.bf16.msra.mxu0 %v5958_v6  ;;  %1284 = vmatprep.mubr.f32.mxu0 %v7428_v1  ;;  %v5968_v20 = vpack.c.bf16 %v5400_v2, %v5398_v18  ;;  %v6002_v6 = vpack.c.bf16 %v5431_v63, %v5429_v61  ;;  %v5452_v18 = vld [vmem:[%s9819_s3 + $0x338] sm:$0xff]  ;;  %v2713_v61 = vld [vmem:[#allocation10 + $0x68] sm:$0xff] }
 0x23f   : > { %5961 = vmatprep.subr.bf16.mxu0 %v5960_v8  ;;  %v2715_v63 = vld [vmem:[#allocation10 + $0x78] sm:$0xff] }
 0x241   : > { %5375 = vmatmul.mubr.msk.f32.gmra.mrb[4].mxu0 %vm1094_vm1, %v7985_v7  ;;  %v5404_v7 = vld [vmem:[%s9819_s3 + $0x238] sm:$0xff] }
 0x242   : > { %5963 = vmatpush1.bf16.msra.mxu0 %v5962_v14  ;;  %1290 = vmatprep.mubr.f32.mxu0 %v7428_v1  ;;  %v5972_v25 = vpack.c.bf16 %v5404_v7, %v5402_v23  ;;  %v5456_v23 = vld [vmem:[%s9819_s3 + $0x358] sm:$0xff] }
 0x243   : > { %5965 = vmatprep.subr.bf16.mxu0 %v5964_v15  ;;  %v5445_v15 = vld [vmem:[%s9819_s3 + $0x300] sm:$0xff] }
 0x244   : > { %v6018_v2 = vpack.c.bf16 %v5447_v16, %v5445_v15  ;;  %v2721_v15 = vld [vmem:[#allocation10 + $0xa8] sm:$0xff]  ;;  %v2723_v16 = vld [vmem:[#allocation10 + $0xb8] sm:$0xff] }
 0x245   : > { %5376 = vmatmul.mubr.msk.f32.gmra.mrb[6].mxu0 %vm1094_vm1, %v7977_v4  ;;  %v5416_v4 = vld [vmem:[%s9819_s3 + $0x258] sm:$0xff] }
 0x246   : > { %5967 = vmatpush1.bf16.msra.mxu0 %v5966_v19  ;;  %1500 = vmatprep.mubr.f32.mxu0 %v7428_v1  ;;  %v5984_v31 = vpack.c.bf16 %v5416_v4, %v5414_v28  ;;  %v6020_v19 = vpack.c.bf16 %v5452_v18, %v5450_v17  ;;  %v6210_v17 = vpack.c.bf16 %v2723_v16, %v2721_v15  ;;  %v2720_v18 = vld [vmem:[#allocation10 + $0xa0] sm:$0xff]  ;;  %v2348_v16 = vld [vmem:[#allocation7 + $0x188] sm:$0xff] }
 0x247   : > { %5969 = vmatprep.subr.bf16.mxu0 %v5968_v20  ;;  %v5449_v20 = vld [vmem:[%s9819_s3 + $0x320] sm:$0xff]  ;;  %v2346_v15 = vld [vmem:[#allocation7 + $0x178] sm:$0xff] }
 0x248   : > { %v6022_v7 = vpack.c.bf16 %v5451_v21, %v5449_v20  ;;  %v2725_v20 = vld [vmem:[#allocation10 + $0xc8] sm:$0xff]  ;;  %v2727_v21 = vld [vmem:[#allocation10 + $0xd8] sm:$0xff] }
 0x24a   : > { %5971 = vmatpush1.bf16.msra.mxu0 %v5970_v24  ;;  %v6024_v24 = vpack.c.bf16 %v5456_v23, %v5454_v22  ;;  %v6214_v22 = vpack.c.bf16 %v2727_v21, %v2725_v20  ;;  %v2724_v23 = vld [vmem:[#allocation10 + $0xc0] sm:$0xff]  ;;  %v2347_v20 = vld [vmem:[#allocation7 + $0x180] sm:$0xff] }
 0x24b   : > { %5973 = vmatprep.subr.bf16.mxu0 %v5972_v25  ;;  %v5453_v25 = vld [vmem:[%s9819_s3 + $0x340] sm:$0xff]  ;;  %v2350_v21 = vld [vmem:[#allocation7 + $0x198] sm:$0xff] }
 0x24c   : > { %v6026_v28 = vpack.c.bf16 %v5455_v26, %v5453_v25  ;;  %v2729_v25 = vld [vmem:[#allocation10 + $0xe8] sm:$0xff]  ;;  %v2731_v26 = vld [vmem:[#allocation10 + $0xf8] sm:$0xff] }
 0x24e   : > { %5975 = vmatpush1.bf16.msra.mxu0 %v5974_v29  ;;  %v5457_v29 = vld [vmem:[%s9819_s3 + $0x360] sm:$0xff] }
 0x24f   : > { %5985 = vmatprep.subr.bf16.mxu0 %v5984_v31  ;;  %v5459_v31 = vld [vmem:[%s9819_s3 + $0x370] sm:$0xff] }
 0x250   : > { %v6030_v34 = vpack.c.bf16 %v5459_v31, %v5457_v29  ;;  %v2007_v29 = vlaneseq }
 0x251   : > { %5405 = vmatmul.mubr.msk.f32.vlgmr.msra.gmra.mrb[0].mxu0 %vm1094_vm1, %v8035_v33  ;;  %v5428_v33 = vld [vmem:[%s9819_s3 + $0x2b8] sm:$0xff] }
 0x252   : > { %5987 = vmatpush1.bf16.msra.mxu0 %v5986_v37  ;;  %1506 = vmatprep.mubr.f32.mxu0 %v7428_v1  ;;  %v5996_v53 = vpack.c.bf16 %v5428_v33, %v5426_v51  ;;  %v5463_v37 = vld [vmem:[%s9819_s3 + $0x390] sm:$0xff]  ;;  %v2008_v31 = vshrl.u32 %v2007_v29, 7  ;;  %v2353_v29 = vld [vmem:[#allocation7 + $0x1b0] sm:$0xff] }
 0x253   : > { %5989 = vmatprep.subr.bf16.mxu0 %v5988_v39  ;;  %v5466_v39 = vld [vmem:[%s9819_s3 + $0x3a8] sm:$0xff]  ;;  %v6034_v40 = vpack.c.bf16 %v5463_v37, %v5461_v36 }
 0x254   : > { %v2705_v33 = vld [vmem:[#allocation10 + $0x28] sm:$0xff] }
 0x255   : > { %5406 = vmatmul.mubr.msk.f32.gmra.mrb[2].mxu0 %vm1094_vm1, %v8027_v30  ;;  %v5432_v30 = vld [vmem:[%s9819_s3 + $0x2d8] sm:$0xff] }
 0x256   : > { %5991 = vmatpush1.bf16.msra.mxu0 %v5990_v45  ;;  %1512 = vmatprep.mubr.f32.mxu0 %v7428_v1  ;;  %v6000_v60 = vpack.c.bf16 %v5432_v30, %v5430_v58  ;;  %v6038_v45 = vpack.c.bf16 %v5467_v44, %v5465_v43  ;;  %v2711_v58 = vld [vmem:[#allocation10 + $0x58] sm:$0xff]  ;;  %v2708_v30 = vld [vmem:[#allocation10 + $0x40] sm:$0xff] }
 0x257   : > { %5993 = vmatprep.subr.bf16.mxu0 %v5992_v47  ;;  %v2703_v47 = vld [vmem:[#allocation10 + $0x18] sm:$0xff] }
 0x259   : > { %5407 = vmatmul.mubr.msk.f32.gmra.mrb[4].mxu0 %vm1094_vm1, %v8053_v41  ;;  %v5436_v41 = vld [vmem:[%s9819_s3 + $0x2f8] sm:$0xff] }
 0x25a   : > { %5995 = vmatpush1.bf16.msra.mxu0 %v5994_v52  ;;  %1518 = vmatprep.mubr.f32.mxu0 %v7428_v1  ;;  %v6004_v8 = vpack.c.bf16 %v5436_v41, %v5434_v0  ;;  %v2707_v52 = vld [vmem:[#allocation10 + $0x38] sm:$0xff]  ;;  %v6202_v0 = vpack.c.bf16 %v2715_v63, %v2713_v61  ;;  %v2712_v41 = vld [vmem:[#allocation10 + $0x60] sm:$0xff]  ;;  %v2733_v63 = vld [vmem:[#allocation10 + $0x108] sm:$0xff] }
 0x25b   : > { %5997 = vmatprep.subr.bf16.mxu0 %v5996_v53  ;;  %v6194_v53 = vpack.c.bf16 %v2707_v52, %v2705_v33 }
 0x25d   : > { %5408 = vmatmul.mubr.msk.f32.gmra.mrb[6].mxu0 %vm1094_vm1, %v8045_v38  ;;  %v5448_v38 = vld [vmem:[%s9819_s3 + $0x318] sm:$0xff] }
 0x25e   : > { %5999 = vmatpush1.bf16.msra.mxu0 %v5998_v59  ;;  %1736 = vmatprep.mubr.f32.mxu0 %v7428_v1  ;;  %v6016_v14 = vpack.c.bf16 %v5448_v38, %v5446_v3  ;;  %v2710_v59 = vld [vmem:[#allocation10 + $0x50] sm:$0xff]  ;;  %v6206_v3 = vpack.c.bf16 %v2719_v10, %v2717_v9  ;;  %v2716_v38 = vld [vmem:[#allocation10 + $0x80] sm:$0xff] }
 0x25f   : > { %6001 = vmatprep.subr.bf16.mxu0 %v6000_v60  ;;  %v6200_v60 = vpack.c.bf16 %v2710_v59, %v2708_v30  ;;  %v2342_v9 = vld [vmem:[#allocation7 + $0x158] sm:$0xff]  ;;  %v2344_v10 = vld [vmem:[#allocation7 + $0x168] sm:$0xff] }
 0x262   : > { %6003 = vmatpush1.bf16.msra.mxu0 %v6002_v6  ;;  %v2714_v6 = vld [vmem:[#allocation10 + $0x70] sm:$0xff] }
 0x263   : > { %6005 = vmatprep.subr.bf16.mxu0 %v6004_v8  ;;  %v6204_v8 = vpack.c.bf16 %v2714_v6, %v2712_v41  ;;  %v2033_v41 = vld [vmem:[#allocation5] sm:$0xff]  ;;  %v2034_v6 = vld [vmem:[#allocation5 + $0x8] sm:$0x3f] }
 0x266   : > { %6007 = vmatpush1.bf16.msra.mxu0 %v6006_v12  ;;  %v2718_v12 = vld [vmem:[#allocation10 + $0x90] sm:$0xff] }
 0x267   : > { %6017 = vmatprep.subr.bf16.mxu0 %v6016_v14  ;;  %v6208_v14 = vpack.c.bf16 %v2718_v12, %v2716_v38  ;;  %v6070_v38 = vpack.c.bf16 %v2344_v10, %v2342_v9  ;;  %v2341_v12 = vld [vmem:[#allocation7 + $0x150] sm:$0xff] }
 0x269   : > { %5437 = vmatmul.mubr.msk.f32.vlgmr.msra.gmra.mrb[0].mxu0 %vm1094_vm1, %v8071_v49  ;;  %v5460_v49 = vld [vmem:[%s9819_s3 + $0x378] sm:$0xff] }
 0x26a   : > { %6019 = vmatpush1.bf16.msra.mxu0 %v6018_v2  ;;  %1742 = vmatprep.mubr.f32.mxu0 %v7428_v1  ;;  %v6028_v4 = vpack.c.bf16 %v5460_v49, %v5458_v27  ;;  %v2722_v2 = vld [vmem:[#allocation10 + $0xb0] sm:$0xff]  ;;  %v6218_v27 = vpack.c.bf16 %v2731_v26, %v2729_v25  ;;  %v2728_v49 = vld [vmem:[#allocation10 + $0xe0] sm:$0xff] }
 0x26b   : > { %6021 = vmatprep.subr.bf16.mxu0 %v6020_v19  ;;  %v6212_v19 = vpack.c.bf16 %v2722_v2, %v2720_v18  ;;  %v6074_v2 = vpack.c.bf16 %v2348_v16, %v2346_v15  ;;  %v2349_v25 = vld [vmem:[#allocation7 + $0x190] sm:$0xff]  ;;  %v2351_v26 = vld [vmem:[#allocation7 + $0x1a0] sm:$0xff] }
 0x26c   : > { %v2379_v15 = vld [vmem:[#allocation7 + $0x280] sm:$0xff] }
 0x26d   : > { %5438 = vmatmul.mubr.msk.f32.gmra.mrb[2].mxu0 %vm1094_vm1, %v8063_v46  ;;  %v5464_v46 = vld [vmem:[%s9819_s3 + $0x398] sm:$0xff]  ;;  %v2737_v16 = vld [vmem:[#allocation10 + $0x128] sm:$0xff] }
 0x26e   : > { %6023 = vmatpush1.bf16.msra.mxu0 %v6022_v7  ;;  %1748 = vmatprep.mubr.f32.mxu0 %v7428_v1  ;;  %v6032_v35 = vpack.c.bf16 %v5464_v46, %v5462_v32  ;;  %v2726_v7 = vld [vmem:[#allocation10 + $0xd0] sm:$0xff]  ;;  %v8342_v32 = vsub.s32 0, %v2008_v31  ;;  %v2005_v46 = vld [vmem:[%s9820_s25] sm:$0x3] }
 0x26f   : > { %6025 = vmatprep.subr.bf16.mxu0 %v6024_v24  ;;  %v6216_v24 = vpack.c.bf16 %v2726_v7, %v2724_v23  ;;  %v2214_v23 = vld [vmem:[#allocation5 + $0x28] sm:$0x3f] }
 0x271   : > { %5439 = vmatmul.mubr.msk.f32.gmra.mrb[4].mxu0 %vm1094_vm1, %v8087_v57  ;;  %v5468_v57 = vld [vmem:[%s9819_s3 + $0x3b8] sm:$0xff] }
 0x272   : > { %6027 = vmatpush1.bf16.msra.mxu0 %v6026_v28  ;;  %1754 = vmatprep.mubr.f32.mxu0 %v7428_v1  ;;  %v6036_v42 = vpack.c.bf16 %v5468_v57, %v5466_v39  ;;  %v2730_v28 = vld [vmem:[#allocation10 + $0xf0] sm:$0xff] }
 0x273   : > { %6029 = vmatprep.subr.bf16.mxu0 %v6028_v4  ;;  %v6220_v4 = vpack.c.bf16 %v2730_v28, %v2728_v49  ;;  %v2356_v49 = vld [vmem:[#allocation7 + $0x1c8] sm:$0xff]  ;;  %v6080_v28 = vpack.c.bf16 %v2351_v26, %v2349_v25  ;;  %v2741_v25 = vld [vmem:[#allocation10 + $0x148] sm:$0xff] }
 0x275   : > { %5440 = vmatmul.mubr.msk.f32.gmra.mrb[6].mxu0 %vm1094_vm1, %v8079_v54  ;;  %v2701_v54 = vld [vmem:[#allocation10 + $0x8] sm:$0xff] }
 0x276   : > { %6031 = vmatpush1.bf16.msra.mxu0 %v6030_v34  ;;  %1972 = vmatprep.mubr.f32.mxu0 %v7428_v1  ;;  %v6190_v48 = vpack.c.bf16 %v2703_v47, %v2701_v54  ;;  %v8347_v34 = vsub.s32 1, %v2008_v31  ;;  %v2355_v31 = vld [vmem:[#allocation7 + $0x1c0] sm:$0xff] }
 0x277   : > { %6033 = vmatprep.subr.bf16.mxu0 %v6032_v35  ;;  %v2010_v35 = vrot.slane %v2005_v46, %v8342_v32 }
 0x278   : > { %v2014_v37 = vrot.slane %v2005_v46, %v8347_v34  ;;  %v2358_v46 = vld [vmem:[#allocation7 + $0x1d8] sm:$0xff] }
 0x27a   : > { %6035 = vmatpush1.bf16.msra.mxu0 %v6034_v40 }
 0x27b   : > { %6037 = vmatprep.subr.bf16.mxu0 %v6036_v42 }
 0x27e   : > { %6039 = vmatpush1.bf16.msra.mxu0 %v6038_v45 }
 0x27f   : > { %6191 = vmatprep.subr.bf16.mxu0 %v6190_v48 }
 0x281   : > { %5469 = vmatmul.mubr.msk.f32.vlgmr.msra.gmra.mrb[0].mxu0 %vm1094_vm1, %v8103_v5  ;;  %v2702_v5 = vld [vmem:[#allocation10 + $0x10] sm:$0xff] }
 0x282   : > { %1978 = vmatprep.mubr.f32.mxu0 %v7428_v1  ;;  %v6192_v51 = vpack.c.bf16 %v2702_v5, %v2700_v50 }
 0x284   : > { %6193 = vmatpush1.bf16.msra.mxu0 %v6192_v51 }
 0x285   : > { %5470 = vmatmul.mubr.msk.f32.gmra.mrb[2].mxu0 %vm1094_vm1, %v8095_v62  ;;  %v2704_v62 = vld [vmem:[#allocation10 + $0x20] sm:$0xff]  ;;  %6195 = vmatprep.subr.bf16.mxu0 %v6194_v53 }
 0x286   : > { %1984 = vmatprep.mubr.f32.mxu0 %v7428_v1  ;;  %v6196_v56 = vpack.c.bf16 %v2706_v55, %v2704_v62 }
 0x288   : > { %6197 = vmatpush1.bf16.msra.mxu0 %v6196_v56 }
 0x289   : > { %5471 = vmatmul.mubr.msk.f32.gmra.mrb[4].mxu0 %vm1094_vm1, %v8122_v13  ;;  %v2709_v13 = vld [vmem:[#allocation10 + $0x48] sm:$0xff] }
 0x28a   : > { %1990 = vmatprep.mubr.f32.mxu0 %v7428_v1 }
 0x28d   : > { %5472 = vmatmul.mubr.msk.f32.gmra.mrb[6].mxu0 %vm1094_vm1, %v8114_v11  ;;  %v6198_v11 = vpack.c.bf16 %v2711_v58, %v2709_v13 }
 0x28f   : > { %6199 = vmatprep.subr.bf16.mxu0 %v6198_v11 }
 0x290   : > { %6201 = vmatpush1.bf16.msra.mxu0 %v6200_v60 }
 0x291   : > { %6203 = vmatprep.subr.bf16.mxu0 %v6202_v0 }
 0x294   : > { %6205 = vmatpush1.bf16.msra.mxu0 %v6204_v8  ;;  %v2127_v8 = vld [vmem:[#allocation5 + $0x10] sm:$0xff] }
 0x295   : > { %6207 = vmatprep.subr.bf16.mxu0 %v6206_v3  ;;  %v2128_v3 = vld [vmem:[#allocation5 + $0x18] sm:$0x3f] }
 0x298   : > { %6209 = vmatpush1.bf16.msra.mxu0 %v6208_v14  ;;  %v2343_v14 = vld [vmem:[#allocation7 + $0x160] sm:$0xff] }
 0x299   : > { %6211 = vmatprep.subr.bf16.mxu0 %v6210_v17  ;;  %v2213_v17 = vld [vmem:[#allocation5 + $0x20] sm:$0xff]  ;;  %v6072_v18 = vpack.c.bf16 %v2343_v14, %v2341_v12 }
 0x29a   : > { %v2377_v14 = vld [vmem:[#allocation7 + $0x270] sm:$0xff] }
 0x29c   : > { %6213 = vmatpush1.bf16.msra.mxu0 %v6212_v19  ;;  %v2345_v19 = vld [vmem:[#allocation7 + $0x170] sm:$0xff] }
 0x29d   : > { %6215 = vmatprep.subr.bf16.mxu0 %v6214_v22  ;;  %v2352_v22 = vld [vmem:[#allocation7 + $0x1a8] sm:$0xff]  ;;  %v6076_v7 = vpack.c.bf16 %v2347_v20, %v2345_v19 }
 0x29e   : > { %v2738_v19 = vld [vmem:[#allocation10 + $0x130] sm:$0xff] }
 0x2a0   : > { %6217 = vmatpush1.bf16.msra.mxu0 %v6216_v24  ;;  %v6078_v24 = vpack.c.bf16 %v2352_v22, %v2350_v21  ;;  %v2382_v22 = vld [vmem:[#allocation7 + $0x298] sm:$0xff] }
 0x2a1   : > { %6219 = vmatprep.subr.bf16.mxu0 %v6218_v27  ;;  %v2354_v27 = vld [vmem:[#allocation7 + $0x1b8] sm:$0xff] }
 0x2a4   : > { %6221 = vmatpush1.bf16.msra.mxu0 %v6220_v4  ;;  %v6082_v4 = vpack.c.bf16 %v2356_v49, %v2354_v27  ;;  %v2740_v27 = vld [vmem:[#allocation10 + $0x140] sm:$0xff] }
 0x354   : > { %v1974_v36 = vpop.f32.mrb[0].mxu0 }
 0x355   : > { %v1976_v39 = vpop.f32.mrb[1].mxu0  ;;  %v2017_v57 = vadd.f32 %v2010_v35, %v1974_v36  ;;  %v6084_v36 = vpack.c.bf16 %v2355_v31, %v2353_v29  ;;  %v2298_v31 = vld [vmem:[#allocation7] sm:$0xff] }
 0x356   : > { %v2018_v40 = vadd.f32 %v2014_v37, %v1976_v39  ;;  %v2357_v39 = vld [vmem:[#allocation7 + $0x1d0] sm:$0xff] }
 0x357   : > { %v2025_v54 = vmax.f32 %v2017_v57, 0.0  ;;  %v2359_v57 = vld [vmem:[#allocation7 + $0x1e0] sm:$0xff] }
 0x358   : > { %v1980_v42 = vpop.f32.mrb[2].mxu0  ;;  %v2026_v48 = vmax.f32 %v2018_v40, 0.0  ;;  %v2362_v40 = vld [vmem:[#allocation7 + $0x1f8] sm:$0xff] }
 0x359   : > { %v2019_v43 = vadd.f32 %v2010_v35, %v1980_v42  ;;  %v1982_v44 = vpop.f32.mrb[3].mxu0  ;;  %v2364_v42 = vld [vmem:[#allocation7 + $0x208] sm:$0xff] }
 0x35a   : > { %v2020_v45 = vadd.f32 %v2014_v37, %v1982_v44  ;;  %v6090_v44 = vpack.c.bf16 %v2364_v42, %v2362_v40  ;;  %v2302_v42 = vld [vmem:[#allocation7 + $0x20] sm:$0xff] }
 0x35b   : > { %v2027_v47 = vmax.f32 %v2019_v43, 0.0  ;;  %v6088_v43 = vpack.c.bf16 %v2359_v57, %v2357_v39 }
 0x35c   : > { %v2028_v50 = vmax.f32 %v2020_v45, 0.0  ;;  %v1986_v5 = vpop.f32.mrb[4].mxu0  ;;  %v2361_v45 = vld [vmem:[#allocation7 + $0x1f0] sm:$0xff] }
 0x35d   : > { %v6042_v51 = vpack.c.bf16 %v2027_v47, %v2025_v54  ;;  %v1988_v33 = vpop.f32.mrb[5].mxu0  ;;  %v2021_v62 = vadd.f32 %v2010_v35, %v1986_v5  ;;  %v2363_v54 = vld [vmem:[#allocation7 + $0x200] sm:$0xff]  ;;  %v2366_v47 = vld [vmem:[#allocation7 + $0x218] sm:$0xff] }
 0x35e   : > { %v6040_v52 = vpack.c.bf16 %v2028_v50, %v2026_v48  ;;  %v2022_v53 = vadd.f32 %v2014_v37, %v1988_v33  ;;  %v2368_v48 = vld [vmem:[#allocation7 + $0x228] sm:$0xff]  ;;  %v6092_v50 = vpack.c.bf16 %v2363_v54, %v2361_v45  ;;  %v2367_v33 = vld [vmem:[#allocation7 + $0x220] sm:$0xff]  ;;  %v2309_v45 = vld [vmem:[#allocation7 + $0x58] sm:$0xff] }
 0x35f   : > { %v2029_v30 = vmax.f32 %v2021_v62, 0.0  ;;  %v6094_v5 = vpack.c.bf16 %v2368_v48, %v2366_v47  ;;  %v2372_v62 = vld [vmem:[#allocation7 + $0x248] sm:$0xff] }
 0x360   : > { %v1992_v55 = vpop.f32.mrb[6].mxu0  ;;  %6041 = vmatprep.subr.bf16.mxu1 %v6040_v52  ;;  %v2030_v11 = vmax.f32 %v2022_v53, 0.0 }
 0x361   : > { %v2023_v56 = vadd.f32 %v2010_v35, %v1992_v55  ;;  %v1994_v13 = vpop.f32.mrb[7].mxu0  ;;  %6043 = vmatpush1.bf16.msra.mxu1 %v6042_v51  ;;  %v2360_v35 = vld [vmem:[#allocation7 + $0x1e8] sm:$0xff] }
 0x362   : > { %v2024_v58 = vadd.f32 %v2014_v37, %v1994_v13  ;;  %v6086_v37 = vpack.c.bf16 %v2360_v35, %v2358_v46  ;;  %v2371_v13 = vld [vmem:[#allocation7 + $0x240] sm:$0xff]  ;;  %v2300_v46 = vld [vmem:[#allocation7 + $0x10] sm:$0xff]  ;;  %v2303_v35 = vld [vmem:[#allocation7 + $0x28] sm:$0xff] }
 0x363   : > { %v2031_v59 = vmax.f32 %v2023_v56, 0.0  ;;  %v2369_v56 = vld [vmem:[#allocation7 + $0x230] sm:$0xff]  ;;  %v6112_v39 = vpack.c.bf16 %v2300_v46, %v2298_v31  ;;  %v2335_v31 = vld [vmem:[#allocation7 + $0x128] sm:$0xff]  ;;  %v2337_v46 = vld [vmem:[#allocation7 + $0x138] sm:$0xff] }
 0x364   : > { %v2032_v60 = vmax.f32 %v2024_v58, 0.0  ;;  %v6100_v58 = vpack.c.bf16 %v2371_v13, %v2369_v56  ;;  %v2310_v56 = vld [vmem:[#allocation7 + $0x60] sm:$0xff]  ;;  %v2312_v13 = vld [vmem:[#allocation7 + $0x70] sm:$0xff] }
 0x365   : > { %v6047_v61 = vpack.c.bf16 %v2031_v59, %v2029_v30  ;;  %v2374_v30 = vld [vmem:[#allocation7 + $0x258] sm:$0xff]  ;;  %v2376_v59 = vld [vmem:[#allocation7 + $0x268] sm:$0xff] }
 0x366   : > { %v6044_v0 = vpack.c.bf16 %v2032_v60, %v2030_v11  ;;  %v6102_v11 = vpack.c.bf16 %v2376_v59, %v2374_v30  ;;  %v2373_v60 = vld [vmem:[#allocation7 + $0x250] sm:$0xff]  ;;  %v2315_v30 = vld [vmem:[#allocation7 + $0x88] sm:$0xff]  ;;  %v2317_v59 = vld [vmem:[#allocation7 + $0x98] sm:$0xff] }
 0x368   : > { %6046 = vmatprep.subr.msk.bf16.mxu1 %vm8352_vm4, %v6044_v0 }
 0x369   : > { %6049 = vmatpush1.bf16.msk.msra.mxu1 %vm8352_vm4, %v6047_v61 }
 0x36a   : > { %6051 = vmatprep.subr.bf16.mxu1 %v6040_v52 }
 0x36c   : > { %5475 = vmatmul.mubr.msk.f32.vlgmr.msra.gmra.mrb[20].mxu1 %vm2035_vm5, %v2033_v41  ;;  %v2735_v41 = vld [vmem:[#allocation10 + $0x118] sm:$0xff] }
 0x36d   : > { %6053 = vmatpush1.bf16.msra.mxu1 %v6042_v51  ;;  %2119 = vmatprep.mubr.f32.mxu1 %v7428_v1  ;;  %v6222_v9 = vpack.c.bf16 %v2735_v41, %v2733_v63  ;;  %v2314_v63 = vld [vmem:[#allocation7 + $0x80] sm:$0xff] }
 0x36e   : > { %6056 = vmatprep.subr.msk.bf16.mxu1 %vm8352_vm4, %v6044_v0 }
 0x36f   : > { %6223 = vmatprep.subr.bf16.mxu0 %v6222_v9 }
 0x370   : > { %5476 = vmatmul.mubr.msk.f32.gmra.mrb[22].mxu1 %vm2035_vm5, %v2034_v6  ;;  %v2732_v6 = vld [vmem:[#allocation10 + $0x100] sm:$0xff] }
 0x371   : > { %6059 = vmatpush1.bf16.msk.msra.mxu1 %vm8352_vm4, %v6047_v61  ;;  %2199 = vmatprep.mubr.f32.mxu1 %v7428_v1 }
 0x372   : > { %6061 = vmatprep.subr.bf16.mxu1 %v6040_v52  ;;  %v2370_v52 = vld [vmem:[#allocation7 + $0x238] sm:$0xff] }
 0x373   : > { %v6098_v55 = vpack.c.bf16 %v2372_v62, %v2370_v52  ;;  %v2313_v52 = vld [vmem:[#allocation7 + $0x78] sm:$0xff] }
 0x374   : > { %5479 = vmatmul.mubr.msk.f32.vlgmr.msra.gmra.mrb[24].mxu1 %vm2035_vm5, %v2127_v8  ;;  %v2734_v8 = vld [vmem:[#allocation10 + $0x110] sm:$0xff] }
 0x375   : > { %6063 = vmatpush1.bf16.msra.mxu1 %v6042_v51  ;;  %2205 = vmatprep.mubr.f32.mxu1 %v7428_v1  ;;  %v2365_v51 = vld [vmem:[#allocation7 + $0x210] sm:$0xff]  ;;  %v6224_v10 = vpack.c.bf16 %v2734_v8, %v2732_v6  ;;  %v2319_v6 = vld [vmem:[#allocation7 + $0xa8] sm:$0xff]  ;;  %v2321_v8 = vld [vmem:[#allocation7 + $0xb8] sm:$0xff] }
 0x376   : > { %6066 = vmatprep.subr.msk.bf16.mxu1 %vm8352_vm4, %v6044_v0  ;;  %v6096_v53 = vpack.c.bf16 %v2367_v33, %v2365_v51  ;;  %v2308_v51 = vld [vmem:[#allocation7 + $0x50] sm:$0xff]  ;;  %v2311_v33 = vld [vmem:[#allocation7 + $0x68] sm:$0xff] }
 0x377   : > { %6225 = vmatpush1.bf16.msra.mxu0 %v6224_v10  ;;  %v6130_v10 = vpack.c.bf16 %v2321_v8, %v2319_v6  ;;  %v2565_v6 = vld [vmem:[#allocation7 + $0x310] sm:$0xff]  ;;  %v2570_v8 = vld [vmem:[#allocation7 + $0x338] sm:$0xff] }
 0x378   : > { %5480 = vmatmul.mubr.msk.f32.gmra.mrb[26].mxu1 %vm2035_vm5, %v2128_v3  ;;  %v2378_v3 = vld [vmem:[#allocation7 + $0x278] sm:$0xff] }
 0x379   : > { %6069 = vmatpush1.bf16.msk.msra.mxu1 %vm8352_vm4, %v6047_v61  ;;  %2285 = vmatprep.mubr.f32.mxu1 %v7428_v1  ;;  %v2375_v61 = vld [vmem:[#allocation7 + $0x260] sm:$0xff] }
 0x37a   : > { %6071 = vmatprep.subr.bf16.mxu1 %v6070_v38  ;;  %v6104_v0 = vpack.c.bf16 %v2375_v61, %v2373_v60  ;;  %v2380_v38 = vld [vmem:[#allocation7 + $0x288] sm:$0xff]  ;;  %v6126_v61 = vpack.c.bf16 %v2317_v59, %v2315_v30  ;;  %v2559_v30 = vld [vmem:[#allocation7 + $0x2e0] sm:$0xff]  ;;  %v2561_v59 = vld [vmem:[#allocation7 + $0x2f0] sm:$0xff] }
 0x37b   : > { %v6106_v12 = vpack.c.bf16 %v2380_v38, %v2378_v3  ;;  %v2318_v3 = vld [vmem:[#allocation7 + $0xa0] sm:$0xff]  ;;  %v2320_v38 = vld [vmem:[#allocation7 + $0xb0] sm:$0xff] }
 0x37c   : > { %5483 = vmatmul.mubr.msk.f32.vlgmr.msra.gmra.mrb[28].mxu1 %vm2035_vm5, %v2213_v17  ;;  %v6108_v17 = vpack.c.bf16 %v2379_v15, %v2377_v14  ;;  %v2325_v14 = vld [vmem:[#allocation7 + $0xd8] sm:$0xff]  ;;  %v6132_v15 = vpack.c.bf16 %v2320_v38, %v2318_v3  ;;  %v2567_v3 = vld [vmem:[#allocation7 + $0x320] sm:$0xff]  ;;  %v2569_v38 = vld [vmem:[#allocation7 + $0x330] sm:$0xff] }
 0x37d   : > { %2291 = vmatprep.mubr.f32.mxu1 %v7428_v1  ;;  %6073 = vmatpush1.bf16.msra.mxu1 %v6072_v18  ;;  %v2739_v18 = vld [vmem:[#allocation10 + $0x138] sm:$0xff] }
 0x37e   : > { %6075 = vmatprep.subr.bf16.mxu1 %v6074_v2  ;;  %v2736_v2 = vld [vmem:[#allocation10 + $0x120] sm:$0xff]  ;;  %v6226_v20 = vpack.c.bf16 %v2739_v18, %v2737_v16 }
 0x37f   : > { %v6228_v21 = vpack.c.bf16 %v2738_v19, %v2736_v2  ;;  %v2324_v18 = vld [vmem:[#allocation7 + $0xd0] sm:$0xff]  ;;  %v2327_v2 = vld [vmem:[#allocation7 + $0xe8] sm:$0xff]  ;;  %v2329_v19 = vld [vmem:[#allocation7 + $0xf8] sm:$0xff] }
 0x380   : > { %5484 = vmatmul.mubr.msk.f32.gmra.mrb[30].mxu1 %vm2035_vm5, %v2214_v23  ;;  %6227 = vmatprep.subr.bf16.mxu0 %v6226_v20  ;;  %v2299_v23 = vld [vmem:[#allocation7 + $0x8] sm:$0xff] }
 0x381   : > { %6077 = vmatpush1.bf16.msra.mxu1 %v6076_v7  ;;  %6229 = vmatpush1.bf16.msra.mxu0 %v6228_v21  ;;  %v2301_v7 = vld [vmem:[#allocation7 + $0x18] sm:$0xff]  ;;  %v6138_v21 = vpack.c.bf16 %v2329_v19, %v2327_v2 }
 0x382   : > { %6079 = vmatprep.subr.bf16.mxu1 %v6078_v24  ;;  %v2381_v24 = vld [vmem:[#allocation7 + $0x290] sm:$0xff]  ;;  %v6110_v26 = vpack.c.bf16 %v2301_v7, %v2299_v23  ;;  %2794 = vmatprep.subr.mxu0 %v2741_v25  ;;  %v2331_v7 = vld [vmem:[#allocation7 + $0x108] sm:$0xff] }
 0x383   : > { %v2328_v23 = vld [vmem:[#allocation7 + $0xf0] sm:$0xff] }
 0x385   : > { %6081 = vmatpush1.bf16.msra.mxu1 %v6080_v28  ;;  %2795 = vmatpush1.msra.mxu0 %v2740_v27  ;;  %v2330_v27 = vld [vmem:[#allocation7 + $0x100] sm:$0xff] }
 0x386   : > { %6083 = vmatprep.subr.bf16.mxu1 %v6082_v4 }
 0x389   : > { %6085 = vmatpush1.bf16.msra.mxu1 %v6084_v36  ;;  %v2305_v36 = vld [vmem:[#allocation7 + $0x38] sm:$0xff] }
 0x38a   : > { %6087 = vmatprep.subr.bf16.mxu1 %v6086_v37  ;;  %v6114_v40 = vpack.c.bf16 %v2305_v36, %v2303_v35  ;;  %v6146_v36 = vpack.c.bf16 %v2337_v46, %v2335_v31 }
 0x38d   : > { %6089 = vmatpush1.bf16.msra.mxu1 %v6088_v43  ;;  %v2304_v43 = vld [vmem:[#allocation7 + $0x30] sm:$0xff] }
 0x38e   : > { %6091 = vmatprep.subr.bf16.mxu1 %v6090_v44  ;;  %v2307_v44 = vld [vmem:[#allocation7 + $0x48] sm:$0xff]  ;;  %v6116_v47 = vpack.c.bf16 %v2304_v43, %v2302_v42  ;;  %v2554_v43 = vld [vmem:[#allocation7 + $0x2b8] sm:$0xff] }
 0x38f   : > { %v2552_v42 = vld [vmem:[#allocation7 + $0x2a8] sm:$0xff] }
 0x391   : > { %6093 = vmatpush1.bf16.msra.mxu1 %v6092_v50  ;;  %v6118_v50 = vpack.c.bf16 %v2309_v45, %v2307_v44  ;;  %v2551_v44 = vld [vmem:[#allocation7 + $0x2a0] sm:$0xff]  ;;  %v2553_v45 = vld [vmem:[#allocation7 + $0x2b0] sm:$0xff] }
 0x392   : > { %6095 = vmatprep.subr.bf16.mxu1 %v6094_v5  ;;  %v2306_v5 = vld [vmem:[#allocation7 + $0x40] sm:$0xff] }
 0x393   : > { %v6120_v62 = vpack.c.bf16 %v2308_v51, %v2306_v5  ;;  %v6152_v5 = vpack.c.bf16 %v2553_v45, %v2551_v44  ;;  %v2592_v45 = vld [vmem:[#allocation7 + $0x3e8] sm:$0xff] }
 0x395   : > { %6097 = vmatpush1.bf16.msra.mxu1 %v6096_v53 }
 0x396   : > { %6099 = vmatprep.subr.bf16.mxu1 %v6098_v55  ;;  %v6122_v55 = vpack.c.bf16 %v2313_v52, %v2311_v33  ;;  %v2555_v33 = vld [vmem:[#allocation7 + $0x2c0] sm:$0xff]  ;;  %v2557_v52 = vld [vmem:[#allocation7 + $0x2d0] sm:$0xff] }
 0x399   : > { %6101 = vmatpush1.bf16.msra.mxu1 %v6100_v58 }
 0x39a   : > { %6103 = vmatprep.subr.bf16.mxu1 %v6102_v11  ;;  %v6124_v11 = vpack.c.bf16 %v2312_v13, %v2310_v56  ;;  %v6156_v56 = vpack.c.bf16 %v2557_v52, %v2555_v33  ;;  %v5505_v52 = vld [vmem:[%s9723_s10 + $0x1e0] sm:$0xff] }
 0x39d   : > { %6105 = vmatpush1.bf16.msra.mxu1 %v6104_v0  ;;  %v2316_v0 = vld [vmem:[#allocation7 + $0x90] sm:$0xff] }
 0x39e   : > { %6107 = vmatprep.subr.bf16.mxu1 %v6106_v12  ;;  %v6128_v9 = vpack.c.bf16 %v2316_v0, %v2314_v63  ;;  %v2323_v12 = vld [vmem:[#allocation7 + $0xc8] sm:$0xff]  ;;  %v6160_v63 = vpack.c.bf16 %v2561_v59, %v2559_v30  ;;  %v2563_v0 = vld [vmem:[#allocation7 + $0x300] sm:$0xff]  ;;  %v5509_v59 = vld [vmem:[%s9723_s10 + $0x200] sm:$0xff] }
 0x39f   : > { %v6134_v16 = vpack.c.bf16 %v2325_v14, %v2323_v12  ;;  %v2572_v12 = vld [vmem:[#allocation7 + $0x348] sm:$0xff]  ;;  %v2574_v14 = vld [vmem:[#allocation7 + $0x358] sm:$0xff] }
 0x3a1   : > { %6109 = vmatpush1.bf16.msra.mxu1 %v6108_v17  ;;  %v2322_v17 = vld [vmem:[#allocation7 + $0xc0] sm:$0xff] }
 0x3a2   : > { %2430 = vmatprep.subr.mxu1 %v2382_v22  ;;  %v6136_v20 = vpack.c.bf16 %v2324_v18, %v2322_v17  ;;  %v2326_v22 = vld [vmem:[#allocation7 + $0xe0] sm:$0xff]  ;;  %v2576_v17 = vld [vmem:[#allocation7 + $0x368] sm:$0xff]  ;;  %v2578_v18 = vld [vmem:[#allocation7 + $0x378] sm:$0xff] }
 0x3a3   : > { %v6140_v25 = vpack.c.bf16 %v2328_v23, %v2326_v22  ;;  %v6174_v19 = vpack.c.bf16 %v2578_v18, %v2576_v17  ;;  %v2580_v22 = vld [vmem:[#allocation7 + $0x388] sm:$0xff]  ;;  %v2582_v23 = vld [vmem:[#allocation7 + $0x398] sm:$0xff]  ;;  %v5523_v17 = vld [vmem:[%s9723_s10 + $0x270] sm:$0xff] }
 0x3a4   : > { %v5526_v18 = vld [vmem:[%s9723_s10 + $0x288] sm:$0xff] }
 0x3a5   : > { %2431 = vmatpush1.msra.mxu1 %v2381_v24  ;;  %v2333_v24 = vld [vmem:[#allocation7 + $0x118] sm:$0xff] }
 0x3a6   : > { %6111 = vmatprep.subr.bf16.mxu1 %v6110_v26  ;;  %v6142_v26 = vpack.c.bf16 %v2333_v24, %v2331_v7  ;;  %v6178_v24 = vpack.c.bf16 %v2582_v23, %v2580_v22  ;;  %v5527_v22 = vld [vmem:[%s9723_s10 + $0x290] sm:$0xff]  ;;  %v5530_v23 = vld [vmem:[%s9723_s10 + $0x2a8] sm:$0xff] }
 0x43f   : > { %v8379_v49 = vpop.f32.mrb[20].mxu1 }
 0x440   : > { %v2117_v28 = vpop.f32.mrb[21].mxu1 }
 0x443   : > { %v8381_v4 = vpop.f32.mrb[22].mxu1 }
 0x444   : > { %v8383_v29 = vpop.f32.mrb[23].mxu1 }
 0x447   : > { %v2201_v37 = vpop.f32.mrb[24].mxu1 }
 0x448   : > { %v2203_v57 = vpop.f32.mrb[25].mxu1 }
 0x449   : > { %5485 = vmatprep.mubr.msk.f32.mxu1 %vm2383_vm6, %v2203_v57  ;;  %5491 = vmatprep.mubr.msk.f32.mxu0 %vm2383_vm6, %v2203_v57 }
 0x44a   : > { %2455 = vmatmul.mubr.f32.vlgmr.msra.gmra.mrb[32].mxu1 %v2201_v37  ;;  %2819 = vmatmul.mubr.f32.vlgmr.msra.gmra.mrb[8].mxu0 %v2201_v37  ;;  %v2334_v37 = vld [vmem:[#allocation7 + $0x120] sm:$0xff] }
 0x44b   : > { %6113 = vmatpush1.bf16.msra.mxu1 %v6112_v39  ;;  %v2207_v54 = vpop.f32.mrb[26].mxu1  ;;  %v2336_v39 = vld [vmem:[#allocation7 + $0x130] sm:$0xff] }
 0x44c   : > { %v2209_v48 = vpop.f32.mrb[27].mxu1  ;;  %6115 = vmatprep.subr.bf16.mxu1 %v6114_v40  ;;  %v6148_v57 = vpack.c.bf16 %v2336_v39, %v2334_v37  ;;  %v2339_v40 = vld [vmem:[#allocation7 + $0x148] sm:$0xff]  ;;  %v2590_v39 = vld [vmem:[#allocation7 + $0x3d8] sm:$0xff] }
 0x44d   : > { %5486 = vmatprep.mubr.msk.f32.mxu1 %vm2383_vm6, %v2209_v48  ;;  %5492 = vmatprep.mubr.msk.f32.mxu0 %vm2383_vm6, %v2209_v48  ;;  %v2338_v48 = vld [vmem:[#allocation7 + $0x140] sm:$0xff]  ;;  %v2588_v37 = vld [vmem:[#allocation7 + $0x3c8] sm:$0xff] }
 0x44e   : > { %2461 = vmatmul.mubr.f32.gmra.mrb[34].mxu1 %v2207_v54  ;;  %2825 = vmatmul.mubr.f32.gmra.mrb[10].mxu0 %v2207_v54  ;;  %v2556_v54 = vld [vmem:[#allocation7 + $0x2c8] sm:$0xff] }
 0x44f   : > { %6117 = vmatpush1.bf16.msra.mxu1 %v6116_v47  ;;  %5487 = vmatprep.mubr.msk.f32.mxu1 %vm2383_vm6, %v2117_v28  ;;  %v8390_v53 = vpop.f32.mrb[28].mxu1  ;;  %v2332_v28 = vld [vmem:[#allocation7 + $0x110] sm:$0xff]  ;;  %v2558_v47 = vld [vmem:[#allocation7 + $0x2d8] sm:$0xff] }
 0x450   : > { %6119 = vmatprep.subr.bf16.mxu1 %v6118_v50  ;;  %v8392_v58 = vpop.f32.mrb[29].mxu1  ;;  %2911 = vmatprep.mubr.f32.mxu0 %v7428_v1  ;;  %v6144_v35 = vpack.c.bf16 %v2332_v28, %v2330_v27  ;;  %v6150_v50 = vpack.c.bf16 %v2554_v43, %v2552_v42  ;;  %v6154_v51 = vpack.c.bf16 %v2558_v47, %v2556_v54  ;;  %v2584_v27 = vld [vmem:[#allocation7 + $0x3a8] sm:$0xff]  ;;  %v2586_v28 = vld [vmem:[#allocation7 + $0x3b8] sm:$0xff]  ;;  %v2587_v42 = vld [vmem:[#allocation7 + $0x3c0] sm:$0xff] }
 0x451   : > { %v6182_v46 = vpack.c.bf16 %v2586_v28, %v2584_v27  ;;  %v2589_v43 = vld [vmem:[#allocation7 + $0x3d0] sm:$0xff]  ;;  %v2591_v54 = vld [vmem:[#allocation7 + $0x3e0] sm:$0xff]  ;;  %v5502_v47 = vld [vmem:[%s9723_s10 + $0x1c8] sm:$0xff] }
 0x452   : > { %v6188_v44 = vpack.c.bf16 %v2589_v43, %v2587_v42  ;;  %v5531_v27 = vld [vmem:[%s9723_s10 + $0x2b0] sm:$0xff]  ;;  %v5534_v28 = vld [vmem:[%s9723_s10 + $0x2c8] sm:$0xff]  ;;  %v5537_v43 = vld [vmem:[%s9723_s10 + $0x2e0] sm:$0xff] }
 0x453   : > { %6121 = vmatpush1.bf16.msra.mxu1 %v6120_v62  ;;  %v8395_v60 = vpop.f32.mrb[30].mxu1  ;;  %v2560_v62 = vld [vmem:[#allocation7 + $0x2e8] sm:$0xff] }
 0x454   : > { %6123 = vmatprep.subr.bf16.mxu1 %v6122_v55  ;;  %v8397_v41 = vpop.f32.mrb[31].mxu1  ;;  %v2562_v55 = vld [vmem:[#allocation7 + $0x2f8] sm:$0xff] }
 0x455   : > { %v6158_v13 = vpack.c.bf16 %v2562_v55, %v2560_v62  ;;  %v5507_v62 = vld [vmem:[%s9723_s10 + $0x1f0] sm:$0xff]  ;;  %v5510_v55 = vld [vmem:[%s9723_s10 + $0x208] sm:$0xff] }
 0x457   : > { %6125 = vmatpush1.bf16.msra.mxu1 %v6124_v11  ;;  %v2564_v11 = vld [vmem:[#allocation7 + $0x308] sm:$0xff] }
 0x458   : > { %6127 = vmatprep.subr.bf16.mxu1 %v6126_v61  ;;  %v2566_v61 = vld [vmem:[#allocation7 + $0x318] sm:$0xff] }
 0x45b   : > { %6129 = vmatpush1.bf16.msra.mxu1 %v6128_v9  ;;  %v6164_v9 = vpack.c.bf16 %v2565_v6, %v2563_v0  ;;  %v5513_v6 = vld [vmem:[%s9723_s10 + $0x220] sm:$0xff] }
 0x45c   : > { %6131 = vmatprep.subr.bf16.mxu1 %v6130_v10 }
 0x45f   : > { %6133 = vmatpush1.bf16.msra.mxu1 %v6132_v15  ;;  %v6170_v15 = vpack.c.bf16 %v2574_v14, %v2572_v12  ;;  %v5519_v12 = vld [vmem:[%s9723_s10 + $0x250] sm:$0xff]  ;;  %v5522_v14 = vld [vmem:[%s9723_s10 + $0x268] sm:$0xff] }
 0x460   : > { %6135 = vmatprep.subr.bf16.mxu1 %v6134_v16  ;;  %v2571_v16 = vld [vmem:[#allocation7 + $0x340] sm:$0xff] }
 0x463   : > { %6137 = vmatpush1.bf16.msra.mxu1 %v6136_v20  ;;  %v2575_v20 = vld [vmem:[#allocation7 + $0x360] sm:$0xff] }
 0x464   : > { %6139 = vmatprep.subr.bf16.mxu1 %v6138_v21  ;;  %v2577_v21 = vld [vmem:[#allocation7 + $0x370] sm:$0xff] }
 0x465   : > { %v6176_v7 = vpack.c.bf16 %v2577_v21, %v2575_v20  ;;  %v5525_v21 = vld [vmem:[%s9723_s10 + $0x280] sm:$0xff] }
 0x467   : > { %6141 = vmatpush1.bf16.msra.mxu1 %v6140_v25  ;;  %v2579_v25 = vld [vmem:[#allocation7 + $0x380] sm:$0xff] }
 0x468   : > { %6143 = vmatprep.subr.bf16.mxu1 %v6142_v26  ;;  %v2581_v26 = vld [vmem:[#allocation7 + $0x390] sm:$0xff] }
 0x469   : > { %v6180_v31 = vpack.c.bf16 %v2581_v26, %v2579_v25  ;;  %v5529_v26 = vld [vmem:[%s9723_s10 + $0x2a0] sm:$0xff] }
 0x46b   : > { %6145 = vmatpush1.bf16.msra.mxu1 %v6144_v35  ;;  %v2583_v35 = vld [vmem:[#allocation7 + $0x3a0] sm:$0xff] }
 0x46c   : > { %6147 = vmatprep.subr.bf16.mxu1 %v6146_v36  ;;  %v2585_v36 = vld [vmem:[#allocation7 + $0x3b0] sm:$0xff] }
 0x46f   : > { %6149 = vmatpush1.bf16.msra.mxu1 %v6148_v57  ;;  %v6184_v57 = vpack.c.bf16 %v2585_v36, %v2583_v35  ;;  %v5533_v36 = vld [vmem:[%s9723_s10 + $0x2c0] sm:$0xff] }
 0x470   : > { %2513 = vmatprep.subr.mxu1 %v2339_v40  ;;  %v6186_v40 = vpack.c.bf16 %v2590_v39, %v2588_v37  ;;  %v5535_v37 = vld [vmem:[%s9723_s10 + $0x2d0] sm:$0xff]  ;;  %v5538_v39 = vld [vmem:[%s9723_s10 + $0x2e8] sm:$0xff] }
 0x473   : > { %2514 = vmatpush1.msra.mxu1 %v2338_v48  ;;  %v5504_v48 = vld [vmem:[%s9723_s10 + $0x1d8] sm:$0xff] }
 0x474   : > { %2538 = vmatmul.mubr.f32.vlgmr.msra.gmra.mrb[32].mxu1 %v8379_v49  ;;  %6151 = vmatprep.subr.bf16.mxu1 %v6150_v50  ;;  %v6162_v49 = vpack.c.bf16 %v2566_v61, %v2564_v11  ;;  %v5501_v50 = vld [vmem:[%s9723_s10 + $0x1c0] sm:$0xff]  ;;  %v5511_v11 = vld [vmem:[%s9723_s10 + $0x210] sm:$0xff]  ;;  %v5514_v61 = vld [vmem:[%s9723_s10 + $0x228] sm:$0xff] }
 0x475   : > { %5488 = vmatprep.mubr.msk.f32.mxu1 %vm2383_vm6, %v8383_v29  ;;  %6153 = vmatpush1.bf16.msra.mxu1 %v6152_v5  ;;  %v2568_v29 = vld [vmem:[#allocation7 + $0x328] sm:$0xff]  ;;  %v6242_v5 = vpack.c.bf16 %v5504_v48, %v5502_v47 }
 0x476   : > { %6155 = vmatprep.subr.bf16.mxu1 %v6154_v51  ;;  %v6166_v10 = vpack.c.bf16 %v2570_v8, %v2568_v29  ;;  %v5515_v29 = vld [vmem:[%s9723_s10 + $0x230] sm:$0xff]  ;;  %v5518_v8 = vld [vmem:[%s9723_s10 + $0x248] sm:$0xff] }
 0x478   : > { %2544 = vmatmul.mubr.f32.gmra.mrb[34].mxu1 %v8381_v4  ;;  %v6168_v4 = vpack.c.bf16 %v2569_v38, %v2567_v3  ;;  %v5517_v38 = vld [vmem:[%s9723_s10 + $0x240] sm:$0xff] }
 0x479   : > { %6157 = vmatpush1.bf16.msra.mxu1 %v6156_v56  ;;  %5489 = vmatprep.mubr.msk.f32.mxu1 %vm2383_vm6, %v8392_v58  ;;  %v2573_v58 = vld [vmem:[#allocation7 + $0x350] sm:$0xff]  ;;  %v5512_v56 = vld [vmem:[%s9723_s10 + $0x218] sm:$0xff] }
 0x47a   : > { %6159 = vmatprep.subr.bf16.mxu1 %v6158_v13  ;;  %v6172_v2 = vpack.c.bf16 %v2573_v58, %v2571_v16  ;;  %v6248_v13 = vpack.c.bf16 %v5507_v62, %v5505_v52  ;;  %v6250_v30 = vpack.c.bf16 %v5512_v56, %v5510_v55  ;;  %v5521_v58 = vld [vmem:[%s9723_s10 + $0x260] sm:$0xff]  ;;  %v5547_v52 = vld [vmem:[%s9723_s10 + $0x330] sm:$0xff]  ;;  %v5550_v55 = vld [vmem:[%s9723_s10 + $0x348] sm:$0xff] }
 0x47b   : > { %v5552_v56 = vld [vmem:[%s9723_s10 + $0x358] sm:$0xff] }
 0x47d   : > { %6161 = vmatpush1.bf16.msra.mxu1 %v6160_v63  ;;  %v5516_v63 = vld [vmem:[%s9723_s10 + $0x238] sm:$0xff] }
 0x47e   : > { %6163 = vmatprep.subr.bf16.mxu1 %v6162_v49  ;;  %v6252_v49 = vpack.c.bf16 %v5511_v11, %v5509_v59  ;;  %v6254_v0 = vpack.c.bf16 %v5516_v63, %v5514_v61  ;;  %v5551_v59 = vld [vmem:[%s9723_s10 + $0x350] sm:$0xff]  ;;  %v5554_v61 = vld [vmem:[%s9723_s10 + $0x368] sm:$0xff]  ;;  %v5556_v63 = vld [vmem:[%s9723_s10 + $0x378] sm:$0xff] }
 0x481   : > { %6165 = vmatpush1.bf16.msra.mxu1 %v6164_v9  ;;  %v5520_v9 = vld [vmem:[%s9723_s10 + $0x258] sm:$0xff] }
 0x482   : > { %6167 = vmatprep.subr.bf16.mxu1 %v6166_v10  ;;  %v6256_v10 = vpack.c.bf16 %v5515_v29, %v5513_v6  ;;  %v6258_v3 = vpack.c.bf16 %v5520_v9, %v5518_v8  ;;  %v5555_v6 = vld [vmem:[%s9723_s10 + $0x370] sm:$0xff] }
 0x485   : > { %6169 = vmatpush1.bf16.msra.mxu1 %v6168_v4  ;;  %v5524_v4 = vld [vmem:[%s9723_s10 + $0x278] sm:$0xff] }
 0x486   : > { %6171 = vmatprep.subr.bf16.mxu1 %v6170_v15  ;;  %v6260_v15 = vpack.c.bf16 %v5519_v12, %v5517_v38  ;;  %v6262_v16 = vpack.c.bf16 %v5524_v4, %v5522_v14  ;;  %v2680_v38 = vld [vmem:[#allocation8] sm:$0x3] }
 0x487   : > { %v2685_v12 = vrot.slane %v2680_v38, %v8342_v32  ;;  %v2689_v4 = vrot.slane %v2680_v38, %v8347_v34  ;;  %v2949_v38 = vld [vmem:[%s9723_s10 + $0xc8] sm:$0xff] }
 0x489   : > { %6173 = vmatpush1.bf16.msra.mxu1 %v6172_v2  ;;  %v5528_v2 = vld [vmem:[%s9723_s10 + $0x298] sm:$0xff] }
 0x48a   : > { %6175 = vmatprep.subr.bf16.mxu1 %v6174_v19  ;;  %v6264_v19 = vpack.c.bf16 %v5523_v17, %v5521_v58  ;;  %v6266_v20 = vpack.c.bf16 %v5528_v2, %v5526_v18 }
 0x48d   : > { %6177 = vmatpush1.bf16.msra.mxu1 %v6176_v7  ;;  %v5532_v7 = vld [vmem:[%s9723_s10 + $0x2b8] sm:$0xff] }
 0x48e   : > { %6179 = vmatprep.subr.bf16.mxu1 %v6178_v24  ;;  %v6268_v24 = vpack.c.bf16 %v5527_v22, %v5525_v21  ;;  %v6270_v25 = vpack.c.bf16 %v5532_v7, %v5530_v23  ;;  %v5643_v7 = vld [vmem:[%s9726_s13 + $0x218] sm:$0xff] }
 0x491   : > { %6181 = vmatpush1.bf16.msra.mxu1 %v6180_v31  ;;  %v5536_v31 = vld [vmem:[%s9723_s10 + $0x2d8] sm:$0xff] }
 0x492   : > { %6183 = vmatprep.subr.bf16.mxu1 %v6182_v46  ;;  %v6272_v46 = vpack.c.bf16 %v5531_v27, %v5529_v26  ;;  %v6274_v35 = vpack.c.bf16 %v5536_v31, %v5534_v28  ;;  %v2925_v26 = vld [vmem:[%s9723_s10 + $0x8] sm:$0xff]  ;;  %v2927_v27 = vld [vmem:[%s9723_s10 + $0x18] sm:$0xff] }
 0x493   : > { %v2831_v28 = vld [vmem:[#allocation11] sm:$0xff]  ;;  %v6298_v31 = vpack.c.bf16 %v2927_v27, %v2925_v26  ;;  %v2956_v26 = vld [vmem:[%s9723_s10 + $0x100] sm:$0xff] }
 0x494   : > { %v2958_v27 = vld [vmem:[%s9723_s10 + $0x110] sm:$0xff] }
 0x495   : > { %6185 = vmatpush1.bf16.msra.mxu1 %v6184_v57  ;;  %v5540_v57 = vld [vmem:[%s9723_s10 + $0x2f8] sm:$0xff] }
 0x496   : > { %6187 = vmatprep.subr.bf16.mxu1 %v6186_v40  ;;  %v6276_v40 = vpack.c.bf16 %v5535_v37, %v5533_v36  ;;  %v6278_v42 = vpack.c.bf16 %v5540_v57, %v5538_v39  ;;  %v2926_v36 = vld [vmem:[%s9723_s10 + $0x10] sm:$0xff]  ;;  %v2929_v37 = vld [vmem:[%s9723_s10 + $0x28] sm:$0xff]  ;;  %v2931_v39 = vld [vmem:[%s9723_s10 + $0x38] sm:$0xff] }
 0x497   : > { %v2981_v57 = vld [vmem:[#allocation11 + $0x10] sm:$0xff] }
 0x499   : > { %6189 = vmatpush1.bf16.msra.mxu1 %v6188_v44  ;;  %v5539_v44 = vld [vmem:[%s9723_s10 + $0x2f0] sm:$0xff] }
 0x49a   : > { %2639 = vmatprep.subr.mxu1 %v2592_v45  ;;  %v5542_v45 = vld [vmem:[%s9723_s10 + $0x308] sm:$0xff]  ;;  %v6280_v47 = vpack.c.bf16 %v5539_v44, %v5537_v43  ;;  %v2928_v43 = vld [vmem:[%s9723_s10 + $0x20] sm:$0xff]  ;;  %v2930_v44 = vld [vmem:[%s9723_s10 + $0x30] sm:$0xff] }
 0x49d   : > { %2640 = vmatpush1.msra.mxu1 %v2591_v54  ;;  %v5544_v54 = vld [vmem:[%s9723_s10 + $0x318] sm:$0xff] }
 0x49e   : > { %2664 = vmatmul.mubr.f32.vlgmr.msra.gmra.mrb[32].mxu1 %v8390_v53  ;;  %v5503_v53 = vld [vmem:[%s9723_s10 + $0x1d0] sm:$0xff]  ;;  %6243 = vmatprep.subr.bf16.mxu1 %v6242_v5  ;;  %v6282_v48 = vpack.c.bf16 %v5544_v54, %v5542_v45  ;;  %v2933_v45 = vld [vmem:[%s9723_s10 + $0x48] sm:$0xff]  ;;  %v2935_v54 = vld [vmem:[%s9723_s10 + $0x58] sm:$0xff] }
 0x49f   : > { %5490 = vmatprep.mubr.msk.f32.mxu1 %vm2383_vm6, %v8397_v41  ;;  %v5508_v41 = vld [vmem:[%s9723_s10 + $0x1f8] sm:$0xff]  ;;  %v6244_v51 = vpack.c.bf16 %v5503_v53, %v5501_v50  ;;  %v5541_v50 = vld [vmem:[%s9723_s10 + $0x300] sm:$0xff]  ;;  %v5543_v5 = vld [vmem:[%s9723_s10 + $0x310] sm:$0xff] }
 0x4a0   : > { %v6284_v53 = vpack.c.bf16 %v5543_v5, %v5541_v50  ;;  %v6306_v50 = vpack.c.bf16 %v2935_v54, %v2933_v45  ;;  %v2932_v5 = vld [vmem:[%s9723_s10 + $0x40] sm:$0xff]  ;;  %v2969_v45 = vld [vmem:[%s9723_s10 + $0x168] sm:$0xff]  ;;  %v2971_v54 = vld [vmem:[%s9723_s10 + $0x178] sm:$0xff] }
 0x4a1   : > { %6245 = vmatpush1.bf16.msra.mxu1 %v6244_v51 }
 0x4a2   : > { %2670 = vmatmul.mubr.f32.gmra.mrb[34].mxu1 %v8395_v60  ;;  %v5506_v60 = vld [vmem:[%s9723_s10 + $0x1e8] sm:$0xff] }
 0x4a3   : > { %v6246_v33 = vpack.c.bf16 %v5508_v41, %v5506_v60  ;;  %v5546_v60 = vld [vmem:[%s9723_s10 + $0x328] sm:$0xff]  ;;  %v5548_v41 = vld [vmem:[%s9723_s10 + $0x338] sm:$0xff] }
 0x4a4   : > { %v6286_v51 = vpack.c.bf16 %v5548_v41, %v5546_v60  ;;  %v2937_v60 = vld [vmem:[%s9723_s10 + $0x68] sm:$0xff]  ;;  %v2939_v41 = vld [vmem:[%s9723_s10 + $0x78] sm:$0xff] }
 0x4a5   : > { %6247 = vmatprep.subr.bf16.mxu1 %v6246_v33  ;;  %v5545_v33 = vld [vmem:[%s9723_s10 + $0x320] sm:$0xff] }
 0x4a6   : > { %6249 = vmatpush1.bf16.msra.mxu1 %v6248_v13  ;;  %v6288_v62 = vpack.c.bf16 %v5547_v52, %v5545_v33  ;;  %v6290_v13 = vpack.c.bf16 %v5552_v56, %v5550_v55  ;;  %v6310_v33 = vpack.c.bf16 %v2939_v41, %v2937_v60  ;;  %v2936_v52 = vld [vmem:[%s9723_s10 + $0x60] sm:$0xff]  ;;  %v2941_v55 = vld [vmem:[%s9723_s10 + $0x88] sm:$0xff]  ;;  %v2943_v56 = vld [vmem:[%s9723_s10 + $0x98] sm:$0xff] }
 0x4a7   : > { %6251 = vmatprep.subr.bf16.mxu1 %v6250_v30  ;;  %v5549_v30 = vld [vmem:[%s9723_s10 + $0x340] sm:$0xff]  ;;  %v2975_v60 = vld [vmem:[%s9723_s10 + $0x198] sm:$0xff] }
 0x4a8   : > { %v6292_v11 = vpack.c.bf16 %v5551_v59, %v5549_v30  ;;  %v6314_v30 = vpack.c.bf16 %v2943_v56, %v2941_v55  ;;  %v2940_v59 = vld [vmem:[%s9723_s10 + $0x80] sm:$0xff]  ;;  %v2979_v55 = vld [vmem:[%s9723_s10 + $0x1b8] sm:$0xff] }
 0x4aa   : > { %6253 = vmatpush1.bf16.msra.mxu1 %v6252_v49  ;;  %v6294_v49 = vpack.c.bf16 %v5556_v63, %v5554_v61  ;;  %v2945_v61 = vld [vmem:[%s9723_s10 + $0xa8] sm:$0xff]  ;;  %v2947_v63 = vld [vmem:[%s9723_s10 + $0xb8] sm:$0xff] }
 0x4ab   : > { %6255 = vmatprep.subr.bf16.mxu1 %v6254_v0  ;;  %v5553_v0 = vld [vmem:[%s9723_s10 + $0x360] sm:$0xff] }
 0x4ac   : > { %v6296_v29 = vpack.c.bf16 %v5555_v6, %v5553_v0  ;;  %v6318_v0 = vpack.c.bf16 %v2947_v63, %v2945_v61  ;;  %v2944_v6 = vld [vmem:[%s9723_s10 + $0xa0] sm:$0xff]  ;;  %v5566_v61 = vld [vmem:[%s9723_s10 + $0x388] sm:$0xff]  ;;  %v5568_v63 = vld [vmem:[%s9723_s10 + $0x398] sm:$0xff] }
 0x4ae   : > { %6257 = vmatpush1.bf16.msra.mxu1 %v6256_v10 }
 0x4af   : > { %6259 = vmatprep.subr.bf16.mxu1 %v6258_v3 }
 0x4b2   : > { %6261 = vmatpush1.bf16.msra.mxu1 %v6260_v15 }
 0x4b3   : > { %6263 = vmatprep.subr.bf16.mxu1 %v6262_v16 }
 0x4b6   : > { %6265 = vmatpush1.bf16.msra.mxu1 %v6264_v19 }
 0x4b7   : > { %6267 = vmatprep.subr.bf16.mxu1 %v6266_v20 }
 0x4ba   : > { %6269 = vmatpush1.bf16.msra.mxu1 %v6268_v24 }
 0x4bb   : > { %6271 = vmatprep.subr.bf16.mxu1 %v6270_v25 }
 0x4be   : > { %6273 = vmatpush1.bf16.msra.mxu1 %v6272_v46  ;;  %v2832_v46 = vld [vmem:[#allocation11 + $0x8] sm:$0x3f] }
 0x4bf   : > { %6275 = vmatprep.subr.bf16.mxu1 %v6274_v35  ;;  %v2924_v35 = vld [vmem:[%s9723_s10] sm:$0xff] }
 0x4c2   : > { %6277 = vmatpush1.bf16.msra.mxu1 %v6276_v40  ;;  %v6300_v40 = vpack.c.bf16 %v2926_v36, %v2924_v35  ;;  %v2960_v36 = vld [vmem:[%s9723_s10 + $0x120] sm:$0xff] }
 0x4c3   : > { %6279 = vmatprep.subr.bf16.mxu1 %v6278_v42  ;;  %v6302_v42 = vpack.c.bf16 %v2931_v39, %v2929_v37  ;;  %v2962_v37 = vld [vmem:[%s9723_s10 + $0x130] sm:$0xff]  ;;  %v2965_v39 = vld [vmem:[%s9723_s10 + $0x148] sm:$0xff] }
 0x4c6   : > { %6281 = vmatpush1.bf16.msra.mxu1 %v6280_v47  ;;  %v2982_v47 = vld [vmem:[#allocation11 + $0x18] sm:$0x3f] }
 0x4c7   : > { %6283 = vmatprep.subr.bf16.mxu1 %v6282_v48  ;;  %v6304_v48 = vpack.c.bf16 %v2930_v44, %v2928_v43  ;;  %v2964_v43 = vld [vmem:[%s9723_s10 + $0x140] sm:$0xff]  ;;  %v2966_v44 = vld [vmem:[%s9723_s10 + $0x150] sm:$0xff] }
 0x4ca   : > { %6285 = vmatpush1.bf16.msra.mxu1 %v6284_v53  ;;  %v2934_v53 = vld [vmem:[%s9723_s10 + $0x50] sm:$0xff] }
 0x4cb   : > { %6287 = vmatprep.subr.bf16.mxu1 %v6286_v51  ;;  %v6308_v51 = vpack.c.bf16 %v2934_v53, %v2932_v5  ;;  %v2970_v5 = vld [vmem:[%s9723_s10 + $0x170] sm:$0xff]  ;;  %v2973_v53 = vld [vmem:[%s9723_s10 + $0x188] sm:$0xff] }
 0x4ce   : > { %6289 = vmatpush1.bf16.msra.mxu1 %v6288_v62  ;;  %v2938_v62 = vld [vmem:[%s9723_s10 + $0x70] sm:$0xff] }
 0x4cf   : > { %6291 = vmatprep.subr.bf16.mxu1 %v6290_v13  ;;  %v6312_v13 = vpack.c.bf16 %v2938_v62, %v2936_v52  ;;  %v2974_v52 = vld [vmem:[%s9723_s10 + $0x190] sm:$0xff]  ;;  %v2977_v62 = vld [vmem:[%s9723_s10 + $0x1a8] sm:$0xff] }
 0x4d2   : > { %6293 = vmatpush1.bf16.msra.mxu1 %v6292_v11  ;;  %v2942_v11 = vld [vmem:[%s9723_s10 + $0x90] sm:$0xff] }
 0x4d3   : > { %6295 = vmatprep.subr.bf16.mxu1 %v6294_v49  ;;  %v6316_v49 = vpack.c.bf16 %v2942_v11, %v2940_v59  ;;  %v2978_v59 = vld [vmem:[%s9723_s10 + $0x1b0] sm:$0xff] }
 0x4d6   : > { %6297 = vmatpush1.bf16.msra.mxu1 %v6296_v29  ;;  %v2946_v29 = vld [vmem:[%s9723_s10 + $0xb0] sm:$0xff] }
 0x51d   : > { %v8577_v8 = vpop.f32.mrb[8].mxu0 }
 0x51e   : > { %v8579_v9 = vpop.f32.mrb[9].mxu0 }
 0x521   : > { %v8581_v10 = vpop.f32.mrb[10].mxu0 }
 0x522   : > { %v8583_v3 = vpop.f32.mrb[11].mxu0 }
 0x571   : > { %v2665_v14 = vpop.f32.mrb[32].mxu1 }
 0x572   : > { %v2667_v15 = vpop.f32.mrb[33].mxu1  ;;  %v2692_v16 = vadd.f32 %v2685_v12, %v2665_v14  ;;  %v6320_v14 = vpack.c.bf16 %v2946_v29, %v2944_v6  ;;  %v5567_v6 = vld [vmem:[%s9723_s10 + $0x390] sm:$0xff]  ;;  %v5570_v29 = vld [vmem:[%s9723_s10 + $0x3a8] sm:$0xff] }
 0x573   : > { %v2693_v58 = vadd.f32 %v2689_v4, %v2667_v15  ;;  %v2948_v15 = vld [vmem:[%s9723_s10 + $0xc0] sm:$0xff] }
 0x574   : > { %v2696_v20 = vmax.f32 %v2692_v16, 0.0  ;;  %v2950_v16 = vld [vmem:[%s9723_s10 + $0xd0] sm:$0xff] }
 0x575   : > { %v2671_v17 = vpop.f32.mrb[34].mxu1  ;;  %v2697_v22 = vmax.f32 %v2693_v58, 0.0  ;;  %v2953_v58 = vld [vmem:[%s9723_s10 + $0xe8] sm:$0xff] }
 0x576   : > { %v2694_v18 = vadd.f32 %v2685_v12, %v2671_v17  ;;  %v2673_v2 = vpop.f32.mrb[35].mxu1  ;;  %v2951_v12 = vld [vmem:[%s9723_s10 + $0xd8] sm:$0xff] }
 0x577   : > { %v2695_v19 = vadd.f32 %v2689_v4, %v2673_v2  ;;  %v6322_v4 = vpack.c.bf16 %v2951_v12, %v2949_v38  ;;  %v2955_v17 = vld [vmem:[%s9723_s10 + $0xf8] sm:$0xff] }
 0x578   : > { %v2698_v21 = vmax.f32 %v2694_v18, 0.0  ;;  %v6324_v18 = vpack.c.bf16 %v2950_v16, %v2948_v15  ;;  %v6326_v2 = vpack.c.bf16 %v2955_v17, %v2953_v58  ;;  %v5572_v38 = vld [vmem:[%s9723_s10 + $0x3b8] sm:$0xff]  ;;  %v5569_v16 = vld [vmem:[%s9723_s10 + $0x3a0] sm:$0xff]  ;;  %v5571_v58 = vld [vmem:[%s9723_s10 + $0x3b0] sm:$0xff] }
 0x579   : > { %v2699_v23 = vmax.f32 %v2695_v19, 0.0  ;;  %v2952_v19 = vld [vmem:[%s9723_s10 + $0xe0] sm:$0xff]  ;;  %v6364_v15 = vpack.c.bf16 %v5572_v38, %v5570_v29  ;;  %v5574_v17 = vld [vmem:[%s9723_s10 + $0x3c8] sm:$0xff]  ;;  %v5599_v38 = vld [vmem:[%s9723_s10 + $0x490] sm:$0xff] }
 0x57a   : > { %v8592_v24 = vpack.c.bf16 %v2698_v21, %v2696_v20  ;;  %v2954_v20 = vld [vmem:[%s9723_s10 + $0xf0] sm:$0xff]  ;;  %v2957_v21 = vld [vmem:[%s9723_s10 + $0x108] sm:$0xff]  ;;  %v5597_v29 = vld [vmem:[%s9723_s10 + $0x480] sm:$0xff] }
 0x57b   : > { %v6230_v25 = vpack.c.bf16 %v2699_v23, %v2697_v22  ;;  %v2959_v22 = vld [vmem:[%s9723_s10 + $0x118] sm:$0xff]  ;;  %v6328_v23 = vpack.c.bf16 %v2954_v20, %v2952_v19  ;;  %v6366_v19 = vpack.c.bf16 %v5571_v58, %v5569_v16  ;;  %v5601_v16 = vld [vmem:[%s9723_s10 + $0x4a0] sm:$0xff]  ;;  %v5603_v58 = vld [vmem:[%s9723_s10 + $0x4b0] sm:$0xff] }
 0x57d   : > { %6232 = vmatprep.subr.msk.bf16.mxu0 %vm8588_vm8, %v6230_v25  ;;  %6356 = vmatprep.subr.msk.bf16.mxu1 %vm8588_vm8, %v6230_v25 }
 0x57e   : > { %6235 = vmatpush1.bf16.msk.msra.mxu0 %vm8588_vm8, %v8592_v24 }
 0x57f   : > { %6238 = vmatprep.subr.msk.bf16.mxu0 %vm8588_vm8, %v6230_v25  ;;  %v6330_v25 = vpack.c.bf16 %v2959_v22, %v2957_v21  ;;  %v5573_v22 = vld [vmem:[%s9723_s10 + $0x3c0] sm:$0xff] }
 0x581   : > { %5495 = vmatmul.mubr.msk.f32.vlgmr.msra.gmra.mrb[12].mxu0 %vm2833_vm9, %v2831_v28  ;;  %v2961_v28 = vld [vmem:[%s9723_s10 + $0x128] sm:$0xff] }
 0x582   : > { %6241 = vmatpush1.bf16.msk.msra.mxu0 %vm8588_vm8, %v8592_v24  ;;  %2917 = vmatprep.mubr.f32.mxu0 %v7428_v1 }
 0x583   : > { %6299 = vmatprep.subr.bf16.mxu0 %v6298_v31  ;;  %v2963_v31 = vld [vmem:[%s9723_s10 + $0x138] sm:$0xff] }
 0x584   : > { %v6334_v35 = vpack.c.bf16 %v2963_v31, %v2961_v28 }
 0x585   : > { %5496 = vmatmul.mubr.msk.f32.gmra.mrb[14].mxu0 %vm2833_vm9, %v2832_v46  ;;  %v6332_v46 = vpack.c.bf16 %v2958_v27, %v2956_v26  ;;  %v5580_v26 = vld [vmem:[%s9723_s10 + $0x3f8] sm:$0xff] }
 0x586   : > { %3053 = vmatprep.mubr.f32.mxu0 %v7428_v1 }
 0x589   : > { %5499 = vmatmul.mubr.msk.f32.vlgmr.msra.gmra.mrb[16].mxu0 %vm2833_vm9, %v2981_v57  ;;  %v2967_v57 = vld [vmem:[%s9723_s10 + $0x158] sm:$0xff] }
 0x58a   : > { %3059 = vmatprep.mubr.f32.mxu0 %v7428_v1  ;;  %6301 = vmatpush1.bf16.msra.mxu0 %v6300_v40  ;;  %v6336_v40 = vpack.c.bf16 %v2962_v37, %v2960_v36  ;;  %v5579_v36 = vld [vmem:[%s9723_s10 + $0x3f0] sm:$0xff]  ;;  %v5582_v37 = vld [vmem:[%s9723_s10 + $0x408] sm:$0xff] }
 0x58b   : > { %6303 = vmatprep.subr.bf16.mxu0 %v6302_v42  ;;  %v6338_v42 = vpack.c.bf16 %v2967_v57, %v2965_v39  ;;  %v5584_v39 = vld [vmem:[%s9723_s10 + $0x418] sm:$0xff] }
 0x58d   : > { %5500 = vmatmul.mubr.msk.f32.gmra.mrb[18].mxu0 %vm2833_vm9, %v2982_v47  ;;  %v6340_v47 = vpack.c.bf16 %v2966_v44, %v2964_v43  ;;  %v6376_v43 = vpack.c.bf16 %v5584_v39, %v5582_v37  ;;  %v5581_v44 = vld [vmem:[%s9723_s10 + $0x400] sm:$0xff]  ;;  %v5615_v39 = vld [vmem:[%s9723_s10 + $0x510] sm:$0xff] }
 0x58e   : > { %6305 = vmatpush1.bf16.msra.mxu0 %v6304_v48  ;;  %v6342_v48 = vpack.c.bf16 %v2971_v54, %v2969_v45  ;;  %v5583_v45 = vld [vmem:[%s9723_s10 + $0x410] sm:$0xff]  ;;  %v5588_v54 = vld [vmem:[%s9723_s10 + $0x438] sm:$0xff]  ;;  %v5613_v37 = vld [vmem:[%s9723_s10 + $0x500] sm:$0xff] }
 0x58f   : > { %6307 = vmatprep.subr.bf16.mxu0 %v6306_v50  ;;  %v2968_v50 = vld [vmem:[%s9723_s10 + $0x160] sm:$0xff] }
 0x590   : > { %v6344_v41 = vpack.c.bf16 %v2970_v5, %v2968_v50  ;;  %v5585_v5 = vld [vmem:[%s9723_s10 + $0x420] sm:$0xff] }
 0x592   : > { %6309 = vmatpush1.bf16.msra.mxu0 %v6308_v51  ;;  %v6346_v51 = vpack.c.bf16 %v2975_v60, %v2973_v53  ;;  %v5587_v53 = vld [vmem:[%s9723_s10 + $0x430] sm:$0xff]  ;;  %v5590_v60 = vld [vmem:[%s9723_s10 + $0x448] sm:$0xff] }
 0x593   : > { %6311 = vmatprep.subr.bf16.mxu0 %v6310_v33  ;;  %v2972_v33 = vld [vmem:[%s9723_s10 + $0x180] sm:$0xff] }
 0x594   : > { %v6348_v56 = vpack.c.bf16 %v2974_v52, %v2972_v33  ;;  %v6382_v33 = vpack.c.bf16 %v5587_v53, %v5585_v5 }
 0x596   : > { %6313 = vmatpush1.bf16.msra.mxu0 %v6312_v13  ;;  %v6350_v13 = vpack.c.bf16 %v2979_v55, %v2977_v62  ;;  %v5589_v62 = vld [vmem:[%s9723_s10 + $0x440] sm:$0xff]  ;;  %v5591_v55 = vld [vmem:[%s9723_s10 + $0x450] sm:$0xff] }
 0x597   : > { %6315 = vmatprep.subr.bf16.mxu0 %v6314_v30  ;;  %v2976_v30 = vld [vmem:[%s9723_s10 + $0x1a0] sm:$0xff] }
 0x598   : > { %v6352_v11 = vpack.c.bf16 %v2978_v59, %v2976_v30  ;;  %v6386_v30 = vpack.c.bf16 %v5591_v55, %v5589_v62 }
 0x59a   : > { %6317 = vmatpush1.bf16.msra.mxu0 %v6316_v49  ;;  %v6360_v49 = vpack.c.bf16 %v5568_v63, %v5566_v61  ;;  %v5595_v61 = vld [vmem:[%s9723_s10 + $0x470] sm:$0xff]  ;;  %v5598_v63 = vld [vmem:[%s9723_s10 + $0x488] sm:$0xff] }
 0x59b   : > { %6319 = vmatprep.subr.bf16.mxu0 %v6318_v0  ;;  %v5565_v0 = vld [vmem:[%s9723_s10 + $0x380] sm:$0xff] }
 0x59e   : > { %6321 = vmatpush1.bf16.msra.mxu0 %v6320_v14  ;;  %v6362_v14 = vpack.c.bf16 %v5567_v6, %v5565_v0 }
 0x59f   : > { %6323 = vmatprep.subr.bf16.mxu0 %v6322_v4 }
 0x5a2   : > { %6325 = vmatpush1.bf16.msra.mxu0 %v6324_v18  ;;  %v5576_v18 = vld [vmem:[%s9723_s10 + $0x3d8] sm:$0xff] }
 0x5a3   : > { %6327 = vmatprep.subr.bf16.mxu0 %v6326_v2  ;;  %v6368_v21 = vpack.c.bf16 %v5576_v18, %v5574_v17  ;;  %v5606_v17 = vld [vmem:[%s9723_s10 + $0x4c8] sm:$0xff]  ;;  %v5608_v18 = vld [vmem:[%s9723_s10 + $0x4d8] sm:$0xff] }
 0x5a6   : > { %6329 = vmatpush1.bf16.msra.mxu0 %v6328_v23  ;;  %v5575_v23 = vld [vmem:[%s9723_s10 + $0x3d0] sm:$0xff] }
 0x5a7   : > { %6331 = vmatprep.subr.bf16.mxu0 %v6330_v25  ;;  %v5578_v25 = vld [vmem:[%s9723_s10 + $0x3e8] sm:$0xff]  ;;  %v6370_v28 = vpack.c.bf16 %v5575_v23, %v5573_v22  ;;  %v5612_v23 = vld [vmem:[%s9723_s10 + $0x4f8] sm:$0xff] }
 0x5a8   : > { %v5610_v22 = vld [vmem:[%s9723_s10 + $0x4e8] sm:$0xff] }
 0x5aa   : > { %6333 = vmatpush1.bf16.msra.mxu0 %v6332_v46  ;;  %v6372_v46 = vpack.c.bf16 %v5580_v26, %v5578_v25  ;;  %v6404_v26 = vpack.c.bf16 %v5612_v23, %v5610_v22  ;;  %v4200_v22 = vld [vmem:[#allocation14 + $0x70] sm:$0xff] }
 0x5ab   : > { %6335 = vmatprep.subr.bf16.mxu0 %v6334_v35  ;;  %v5577_v35 = vld [vmem:[%s9723_s10 + $0x3e0] sm:$0xff] }
 0x5ae   : > { %6337 = vmatpush1.bf16.msra.mxu0 %v6336_v40  ;;  %v6374_v40 = vpack.c.bf16 %v5579_v36, %v5577_v35  ;;  %v5616_v35 = vld [vmem:[%s9723_s10 + $0x518] sm:$0xff] }
 0x5af   : > { %6339 = vmatprep.subr.bf16.mxu0 %v6338_v42 }
 0x5b2   : > { %6341 = vmatpush1.bf16.msra.mxu0 %v6340_v47  ;;  %v3290_v47 = vld [vmem:[#allocation11 + $0x20] sm:$0xff] }
 0x5b3   : > { %6343 = vmatprep.subr.bf16.mxu0 %v6342_v48  ;;  %v6378_v48 = vpack.c.bf16 %v5583_v45, %v5581_v44  ;;  %v5617_v44 = vld [vmem:[%s9723_s10 + $0x520] sm:$0xff]  ;;  %v5619_v45 = vld [vmem:[%s9723_s10 + $0x530] sm:$0xff] }
 0x5b6   : > { %6345 = vmatpush1.bf16.msra.mxu0 %v6344_v41  ;;  %v5592_v41 = vld [vmem:[%s9723_s10 + $0x458] sm:$0xff] }
 0x5b7   : > { %6347 = vmatprep.subr.bf16.mxu0 %v6346_v51  ;;  %v3291_v51 = vld [vmem:[#allocation11 + $0x28] sm:$0x3f]  ;;  %v6384_v52 = vpack.c.bf16 %v5592_v41, %v5590_v60 }
 0x5ba   : > { %6349 = vmatpush1.bf16.msra.mxu0 %v6348_v56  ;;  %v5594_v56 = vld [vmem:[%s9723_s10 + $0x468] sm:$0xff] }
 0x5bb   : > { %6351 = vmatprep.subr.bf16.mxu0 %v6350_v13  ;;  %v5596_v13 = vld [vmem:[%s9723_s10 + $0x478] sm:$0xff] }
 0x5bc   : > { %v6388_v59 = vpack.c.bf16 %v5596_v13, %v5594_v56 }
 0x5be   : > { %6353 = vmatpush1.bf16.msra.mxu0 %v6352_v11  ;;  %v5593_v11 = vld [vmem:[%s9723_s10 + $0x460] sm:$0xff] }
 0x5bf   : > { %6361 = vmatprep.subr.bf16.mxu0 %v6360_v49  ;;  %v5600_v49 = vld [vmem:[%s9723_s10 + $0x498] sm:$0xff]  ;;  %v6390_v0 = vpack.c.bf16 %v5595_v61, %v5593_v11  ;;  %v4187_v11 = vld [vmem:[#allocation14 + $0x8] sm:$0xff] }
 0x5c0   : > { %v6392_v6 = vpack.c.bf16 %v5600_v49, %v5598_v63  ;;  %v4188_v63 = vld [vmem:[#allocation14 + $0x10] sm:$0xff] }
 0x654   : > { %v2913_v12 = vpop.f32.mrb[12].mxu0 }
 0x655   : > { %v2915_v4 = vpop.f32.mrb[13].mxu0 }
 0x656   : > { %5559 = vmatprep.mubr.msk.f32.mxu0 %vm1094_vm1, %v2915_v4  ;;  %v6394_v4 = vpack.c.bf16 %v5599_v38, %v5597_v29  ;;  %v4190_v29 = vld [vmem:[#allocation14 + $0x20] sm:$0xff] }
 0x657   : > { %3277 = vmatmul.mubr.f32.vlgmr.msra.gmra.mrb[20].mxu0 %v2913_v12  ;;  %v5602_v12 = vld [vmem:[%s9723_s10 + $0x4a8] sm:$0xff] }
 0x658   : > { %v2919_v2 = vpop.f32.mrb[14].mxu0  ;;  %6363 = vmatpush1.bf16.msra.mxu0 %v6362_v14  ;;  %v5604_v14 = vld [vmem:[%s9723_s10 + $0x4b8] sm:$0xff] }
 0x659   : > { %v2921_v20 = vpop.f32.mrb[15].mxu0  ;;  %6365 = vmatprep.subr.bf16.mxu0 %v6364_v15  ;;  %v6396_v15 = vpack.c.bf16 %v5604_v14, %v5602_v12  ;;  %v4192_v12 = vld [vmem:[#allocation14 + $0x30] sm:$0xff] }
 0x65a   : > { %5560 = vmatprep.mubr.msk.f32.mxu0 %vm1094_vm1, %v2921_v20  ;;  %v5605_v20 = vld [vmem:[%s9723_s10 + $0x4c0] sm:$0xff]  ;;  %v6608_v14 = vpack.c.bf16 %v4192_v12, %v4190_v29  ;;  %v4228_v29 = vld [vmem:[#allocation14 + $0x150] sm:$0xff] }
 0x65b   : > { %3283 = vmatmul.mubr.f32.gmra.mrb[22].mxu0 %v2919_v2  ;;  %v6398_v2 = vpack.c.bf16 %v5603_v58, %v5601_v16  ;;  %v4194_v16 = vld [vmem:[#allocation14 + $0x40] sm:$0xff]  ;;  %v4231_v12 = vld [vmem:[#allocation14 + $0x168] sm:$0xff] }
 0x65c   : > { %v3055_v27 = vpop.f32.mrb[16].mxu0  ;;  %6367 = vmatpush1.bf16.msra.mxu0 %v6366_v19  ;;  %v6400_v19 = vpack.c.bf16 %v5608_v18, %v5606_v17  ;;  %v4196_v17 = vld [vmem:[#allocation14 + $0x50] sm:$0xff] }
 0x65d   : > { %v3057_v31 = vpop.f32.mrb[17].mxu0  ;;  %6369 = vmatprep.subr.bf16.mxu0 %v6368_v21  ;;  %v5607_v21 = vld [vmem:[%s9723_s10 + $0x4d0] sm:$0xff]  ;;  %v6612_v18 = vpack.c.bf16 %v4196_v17, %v4194_v16  ;;  %v4235_v17 = vld [vmem:[#allocation14 + $0x188] sm:$0xff] }
 0x65e   : > { %5557 = vmatprep.mubr.msk.f32.mxu1 %vm1094_vm1, %v3057_v31  ;;  %v6402_v25 = vpack.c.bf16 %v5607_v21, %v5605_v20  ;;  %v4198_v20 = vld [vmem:[#allocation14 + $0x60] sm:$0xff]  ;;  %v4232_v16 = vld [vmem:[#allocation14 + $0x170] sm:$0xff] }
 0x65f   : > { %3194 = vmatmul.mubr.f32.vlgmr.msra.gmra.mrb[36].mxu1 %v3055_v27  ;;  %v5609_v27 = vld [vmem:[%s9723_s10 + $0x4e0] sm:$0xff]  ;;  %v6616_v23 = vpack.c.bf16 %v4200_v22, %v4198_v20  ;;  %v4236_v20 = vld [vmem:[#allocation14 + $0x190] sm:$0xff] }
 0x660   : > { %6359 = vmatpush1.bf16.msk.msra.mxu1 %vm8588_vm8, %v8592_v24  ;;  %v3061_v57 = vpop.f32.mrb[18].mxu0  ;;  %6371 = vmatpush1.bf16.msra.mxu0 %v6370_v28  ;;  %v5586_v24 = vld [vmem:[%s9723_s10 + $0x428] sm:$0xff]  ;;  %v5611_v28 = vld [vmem:[%s9723_s10 + $0x4f0] sm:$0xff]  ;;  %v3519_v22 = vld [vmem:[%s9724_s11] sm:$0x3] }
 0x661   : > { %v3063_v42 = vpop.f32.mrb[19].mxu0  ;;  %6373 = vmatprep.subr.bf16.mxu0 %v6372_v46  ;;  %v6380_v50 = vpack.c.bf16 %v5588_v54, %v5586_v24  ;;  %v6406_v31 = vpack.c.bf16 %v5611_v28, %v5609_v27  ;;  %v5614_v46 = vld [vmem:[%s9723_s10 + $0x508] sm:$0xff]  ;;  %v6414_v24 = vpack.c.bf16 %v5619_v45, %v5617_v44  ;;  %v2742_v54 = vld [vmem:[%s9721_s8] sm:$0x3] }
 0x662   : > { %5558 = vmatprep.mubr.msk.f32.mxu1 %vm1094_vm1, %v3063_v42  ;;  %v6408_v36 = vpack.c.bf16 %v5616_v35, %v5614_v46  ;;  %v5620_v42 = vld [vmem:[%s9723_s10 + $0x538] sm:$0xff]  ;;  %v4207_v35 = vld [vmem:[#allocation14 + $0xa8] sm:$0xff] }
 0x663   : > { %3200 = vmatmul.mubr.f32.gmra.mrb[38].mxu1 %v3061_v57  ;;  %v6410_v57 = vpack.c.bf16 %v5615_v39, %v5613_v37  ;;  %v4202_v27 = vld [vmem:[#allocation14 + $0x80] sm:$0xff] }
 0x664   : > { %3362 = vmatprep.mubr.f32.mxu1 %v7428_v1  ;;  %6375 = vmatpush1.bf16.msra.mxu0 %v6374_v40  ;;  %v5618_v40 = vld [vmem:[%s9723_s10 + $0x528] sm:$0xff]  ;;  %v4206_v37 = vld [vmem:[#allocation14 + $0xa0] sm:$0xff] }
 0x665   : > { %6377 = vmatprep.subr.bf16.mxu0 %v6376_v43  ;;  %v6412_v43 = vpack.c.bf16 %v5620_v42, %v5618_v40  ;;  %v4211_v42 = vld [vmem:[#allocation14 + $0xc8] sm:$0xff]  ;;  %v4210_v44 = vld [vmem:[#allocation14 + $0xc0] sm:$0xff] }
 0x667   : > { %5563 = vmatmul.mubr.msk.f32.vlgmr.msra.gmra.mrb[40].mxu1 %vm2833_vm9, %v3290_v47  ;;  %v2747_v47 = vrot.slane %v2742_v54, %v8342_v32 }
 0x668   : > { %3368 = vmatprep.mubr.f32.mxu1 %v7428_v1  ;;  %6379 = vmatpush1.bf16.msra.mxu0 %v6378_v48  ;;  %v2751_v48 = vrot.slane %v2742_v54, %v8347_v34 }
 0x669   : > { %6381 = vmatprep.subr.bf16.mxu0 %v6380_v50  ;;  %v2821_v50 = vadd.f32 %v8577_v8, %v2747_v47 }
 0x66a   : > { %v2823_v5 = vadd.f32 %v8579_v9, %v2751_v48 }
 0x66b   : > { %5564 = vmatmul.mubr.msk.f32.gmra.mrb[42].mxu1 %vm2833_vm9, %v3291_v51 }
 0x66c   : > { %6383 = vmatpush1.bf16.msra.mxu0 %v6382_v33  ;;  %3617 = vmatprep.mubr.f32.mxu1 %v7428_v1  ;;  %v2827_v33 = vadd.f32 %v8581_v10, %v2747_v47  ;;  %v4189_v10 = vld [vmem:[#allocation14 + $0x18] sm:$0xff]  ;;  %v4215_v47 = vld [vmem:[#allocation14 + $0xe8] sm:$0xff] }
 0x66d   : > { %6385 = vmatprep.subr.bf16.mxu0 %v6384_v52  ;;  %v2829_v52 = vadd.f32 %v8583_v3, %v2751_v48  ;;  %v6602_v61 = vpack.c.bf16 %v4189_v10, %v4187_v11  ;;  %v4186_v3 = vld [vmem:[#allocation14] sm:$0xff]  ;;  %v4217_v48 = vld [vmem:[#allocation14 + $0xf8] sm:$0xff] }
 0x66e   : > { %v6604_v49 = vpack.c.bf16 %v4188_v63, %v4186_v3  ;;  %v4222_v11 = vld [vmem:[#allocation14 + $0x120] sm:$0xff]  ;;  %v4227_v63 = vld [vmem:[#allocation14 + $0x148] sm:$0xff] }
 0x670   : > { %6387 = vmatpush1.bf16.msra.mxu0 %v6386_v30 }
 0x671   : > { %6389 = vmatprep.subr.bf16.mxu0 %v6388_v59 }
 0x674   : > { %6391 = vmatpush1.bf16.msra.mxu0 %v6390_v0  ;;  %v4191_v0 = vld [vmem:[#allocation14 + $0x28] sm:$0xff] }
 0x675   : > { %6393 = vmatprep.subr.bf16.mxu0 %v6392_v6  ;;  %v4193_v6 = vld [vmem:[#allocation14 + $0x38] sm:$0xff] }
 0x676   : > { %v6606_v38 = vpack.c.bf16 %v4193_v6, %v4191_v0  ;;  %v4226_v0 = vld [vmem:[#allocation14 + $0x140] sm:$0xff] }
 0x678   : > { %6395 = vmatpush1.bf16.msra.mxu0 %v6394_v4  ;;  %v4195_v4 = vld [vmem:[#allocation14 + $0x48] sm:$0xff] }
 0x679   : > { %6397 = vmatprep.subr.bf16.mxu0 %v6396_v15  ;;  %v4197_v15 = vld [vmem:[#allocation14 + $0x58] sm:$0xff] }
 0x67a   : > { %v6610_v58 = vpack.c.bf16 %v4197_v15, %v4195_v4  ;;  %v4230_v4 = vld [vmem:[#allocation14 + $0x160] sm:$0xff] }
 0x67c   : > { %6399 = vmatpush1.bf16.msra.mxu0 %v6398_v2  ;;  %v4199_v2 = vld [vmem:[#allocation14 + $0x68] sm:$0xff] }
 0x67d   : > { %6401 = vmatprep.subr.bf16.mxu0 %v6400_v19  ;;  %v4201_v19 = vld [vmem:[#allocation14 + $0x78] sm:$0xff] }
 0x67e   : > { %v6614_v21 = vpack.c.bf16 %v4201_v19, %v4199_v2  ;;  %v4234_v2 = vld [vmem:[#allocation14 + $0x180] sm:$0xff] }
 0x680   : > { %6403 = vmatpush1.bf16.msra.mxu0 %v6402_v25  ;;  %v4203_v25 = vld [vmem:[#allocation14 + $0x88] sm:$0xff] }
 0x681   : > { %6405 = vmatprep.subr.bf16.mxu0 %v6404_v26  ;;  %v4205_v26 = vld [vmem:[#allocation14 + $0x98] sm:$0xff] }
 0x682   : > { %v6618_v28 = vpack.c.bf16 %v4205_v26, %v4203_v25  ;;  %v3524_v25 = vrot.slane %v3519_v22, %v8342_v32 }
 0x684   : > { %6407 = vmatpush1.bf16.msra.mxu0 %v6406_v31  ;;  %v4204_v31 = vld [vmem:[#allocation14 + $0x90] sm:$0xff] }
 0x685   : > { %6409 = vmatprep.subr.bf16.mxu0 %v6408_v36  ;;  %v6620_v46 = vpack.c.bf16 %v4204_v31, %v4202_v27  ;;  %v4209_v36 = vld [vmem:[#allocation14 + $0xb8] sm:$0xff] }
 0x686   : > { %v6622_v39 = vpack.c.bf16 %v4209_v36, %v4207_v35 }
 0x688   : > { %6411 = vmatpush1.bf16.msra.mxu0 %v6410_v57  ;;  %v4208_v57 = vld [vmem:[#allocation14 + $0xb0] sm:$0xff] }
 0x689   : > { %6413 = vmatprep.subr.bf16.mxu0 %v6412_v43  ;;  %v6624_v40 = vpack.c.bf16 %v4208_v57, %v4206_v37  ;;  %v4213_v43 = vld [vmem:[#allocation14 + $0xd8] sm:$0xff] }
 0x68a   : > { %v6626_v45 = vpack.c.bf16 %v4213_v43, %v4211_v42 }
 0x68c   : > { %6415 = vmatpush1.bf16.msra.mxu0 %v6414_v24  ;;  %v4212_v24 = vld [vmem:[#allocation14 + $0xd0] sm:$0xff] }
 0x68d   : > { %6603 = vmatprep.subr.bf16.mxu0 %v6602_v61  ;;  %v6628_v54 = vpack.c.bf16 %v4212_v24, %v4210_v44  ;;  %v4224_v61 = vld [vmem:[#allocation14 + $0x130] sm:$0xff] }
 0x68e   : > { %v6640_v3 = vpack.c.bf16 %v4224_v61, %v4222_v11  ;;  %v5640_v11 = vld [vmem:[%s9726_s13 + $0x200] sm:$0xff]  ;;  %v5645_v61 = vld [vmem:[%s9726_s13 + $0x228] sm:$0xff] }
 0x732   : > { %v3195_v53 = vpop.f32.mrb[36].mxu1 }
 0x733   : > { %v8968_v60 = vadd.f32 %v3195_v53, %v2821_v50  ;;  %v3197_v41 = vpop.f32.mrb[37].mxu1  ;;  %v4214_v50 = vld [vmem:[#allocation14 + $0xe0] sm:$0xff]  ;;  %v4216_v53 = vld [vmem:[#allocation14 + $0xf0] sm:$0xff] }
 0x734   : > { %v8970_v51 = vadd.f32 %v3197_v41, %v2823_v5  ;;  %v6630_v5 = vpack.c.bf16 %v4217_v48, %v4215_v47  ;;  %v6632_v41 = vpack.c.bf16 %v4216_v53, %v4214_v50  ;;  %v3625_v47 = vld [vmem:[#allocation13 + $0x8] sm:$0x7f]  ;;  %v5632_v50 = vld [vmem:[%s9726_s13 + $0x1c0] sm:$0xff] }
 0x735   : > { %v5637_v53 = vld [vmem:[%s9726_s13 + $0x1e8] sm:$0xff] }
 0x736   : > { %v3201_v62 = vpop.f32.mrb[38].mxu1 }
 0x737   : > { %v8974_v55 = vadd.f32 %v3201_v62, %v2827_v33  ;;  %v3203_v56 = vpop.f32.mrb[39].mxu1  ;;  %v4219_v33 = vld [vmem:[#allocation14 + $0x108] sm:$0xff]  ;;  %v4218_v62 = vld [vmem:[#allocation14 + $0x100] sm:$0xff] }
 0x738   : > { %v8976_v13 = vadd.f32 %v3203_v56, %v2829_v52  ;;  %v4221_v52 = vld [vmem:[#allocation14 + $0x118] sm:$0xff] }
 0x739   : > { %v6634_v56 = vpack.c.bf16 %v4221_v52, %v4219_v33  ;;  %v3701_v33 = vld [vmem:[#allocation13 + $0x10] sm:$0x7f] }
 0x73a   : > { %v3364_v30 = vpop.f32.mrb[40].mxu1 }
 0x73b   : > { %v3366_v8 = vpop.f32.mrb[41].mxu1 }
 0x73c   : > { %5621 = vmatprep.mubr.msk.f32.mxu0 %vm1094_vm1, %v3366_v8 }
 0x73d   : > { %3503 = vmatmul.mubr.f32.vlgmr.msra.gmra.mrb[20].mxu0 %v3364_v30  ;;  %v4220_v30 = vld [vmem:[#allocation14 + $0x110] sm:$0xff] }
 0x73e   : > { %v3370_v9 = vpop.f32.mrb[42].mxu1  ;;  %6605 = vmatpush1.bf16.msra.mxu0 %v6604_v49  ;;  %v6636_v8 = vpack.c.bf16 %v4220_v30, %v4218_v62  ;;  %v4229_v49 = vld [vmem:[#allocation14 + $0x158] sm:$0xff] }
 0x73f   : > { %v3372_v59 = vpop.f32.mrb[43].mxu1  ;;  %6607 = vmatprep.subr.bf16.mxu0 %v6606_v38  ;;  %v6642_v6 = vpack.c.bf16 %v4229_v49, %v4227_v63  ;;  %v6644_v38 = vpack.c.bf16 %v4228_v29, %v4226_v0  ;;  %v5638_v30 = vld [vmem:[%s9726_s13 + $0x1f0] sm:$0xff]  ;;  %v5644_v0 = vld [vmem:[%s9726_s13 + $0x220] sm:$0xff]  ;;  %v5649_v29 = vld [vmem:[%s9726_s13 + $0x248] sm:$0xff] }
 0x740   : > { %5622 = vmatprep.mubr.msk.f32.mxu0 %vm1094_vm1, %v3372_v59  ;;  %v4225_v59 = vld [vmem:[#allocation14 + $0x138] sm:$0xff] }
 0x741   : > { %3509 = vmatmul.mubr.f32.gmra.mrb[22].mxu0 %v3370_v9  ;;  %v4223_v9 = vld [vmem:[#allocation14 + $0x128] sm:$0xff] }
 0x742   : > { %6609 = vmatpush1.bf16.msra.mxu0 %v6608_v14  ;;  %v6638_v10 = vpack.c.bf16 %v4225_v59, %v4223_v9  ;;  %v4233_v14 = vld [vmem:[#allocation14 + $0x178] sm:$0xff] }
 0x743   : > { %6611 = vmatprep.subr.bf16.mxu0 %v6610_v58  ;;  %v6646_v15 = vpack.c.bf16 %v4233_v14, %v4231_v12  ;;  %v6648_v58 = vpack.c.bf16 %v4232_v16, %v4230_v4  ;;  %v5648_v4 = vld [vmem:[%s9726_s13 + $0x240] sm:$0xff]  ;;  %v5653_v16 = vld [vmem:[%s9726_s13 + $0x268] sm:$0xff] }
 0x746   : > { %6613 = vmatpush1.bf16.msra.mxu0 %v6612_v18  ;;  %v4237_v18 = vld [vmem:[#allocation14 + $0x198] sm:$0xff] }
 0x747   : > { %6615 = vmatprep.subr.bf16.mxu0 %v6614_v21  ;;  %v6650_v19 = vpack.c.bf16 %v4237_v18, %v4235_v17  ;;  %v6652_v21 = vpack.c.bf16 %v4236_v20, %v4234_v2  ;;  %v5652_v2 = vld [vmem:[%s9726_s13 + $0x260] sm:$0xff]  ;;  %v5657_v20 = vld [vmem:[%s9726_s13 + $0x288] sm:$0xff] }
 0x74a   : > { %6617 = vmatpush1.bf16.msra.mxu0 %v6616_v23 }
 0x74b   : > { %6619 = vmatprep.subr.bf16.mxu0 %v6618_v28  ;;  %v3528_v28 = vrot.slane %v3519_v22, %v8347_v34 }
 0x74e   : > { %6621 = vmatpush1.bf16.msra.mxu0 %v6620_v46 }
 0x74f   : > { %6623 = vmatprep.subr.bf16.mxu0 %v6622_v39 }
 0x752   : > { %6625 = vmatpush1.bf16.msra.mxu0 %v6624_v40 }
 0x753   : > { %6627 = vmatprep.subr.bf16.mxu0 %v6626_v45 }
 0x756   : > { %6629 = vmatpush1.bf16.msra.mxu0 %v6628_v54 }
 0x757   : > { %6631 = vmatprep.subr.bf16.mxu0 %v6630_v5  ;;  %v5634_v5 = vld [vmem:[%s9726_s13 + $0x1d0] sm:$0xff] }
 0x758   : > { %v6436_v52 = vpack.c.bf16 %v5634_v5, %v5632_v50  ;;  %v5672_v50 = vld [vmem:[%s9726_s13 + $0x300] sm:$0xff]  ;;  %v5674_v5 = vld [vmem:[%s9726_s13 + $0x310] sm:$0xff] }
 0x75a   : > { %6633 = vmatpush1.bf16.msra.mxu0 %v6632_v41  ;;  %v5639_v41 = vld [vmem:[%s9726_s13 + $0x1f8] sm:$0xff] }
 0x75b   : > { %6635 = vmatprep.subr.bf16.mxu0 %v6634_v56  ;;  %v6438_v62 = vpack.c.bf16 %v5639_v41, %v5637_v53  ;;  %v5636_v56 = vld [vmem:[%s9726_s13 + $0x1e0] sm:$0xff]  ;;  %v5677_v53 = vld [vmem:[%s9726_s13 + $0x328] sm:$0xff]  ;;  %v5679_v41 = vld [vmem:[%s9726_s13 + $0x338] sm:$0xff] }
 0x75c   : > { %v6440_v9 = vpack.c.bf16 %v5638_v30, %v5636_v56  ;;  %v5678_v56 = vld [vmem:[%s9726_s13 + $0x330] sm:$0xff]  ;;  %v5681_v30 = vld [vmem:[%s9726_s13 + $0x348] sm:$0xff] }
 0x75e   : > { %6637 = vmatpush1.bf16.msra.mxu0 %v6636_v8  ;;  %v5641_v8 = vld [vmem:[%s9726_s13 + $0x208] sm:$0xff] }
 0x75f   : > { %6639 = vmatprep.subr.bf16.mxu0 %v6638_v10  ;;  %v6442_v59 = vpack.c.bf16 %v5643_v7, %v5641_v8  ;;  %v5642_v10 = vld [vmem:[%s9726_s13 + $0x210] sm:$0xff]  ;;  %v5683_v8 = vld [vmem:[%s9726_s13 + $0x358] sm:$0xff] }
 0x760   : > { %v6444_v63 = vpack.c.bf16 %v5642_v10, %v5640_v11  ;;  %v5682_v11 = vld [vmem:[%s9726_s13 + $0x350] sm:$0xff] }
 0x762   : > { %6641 = vmatpush1.bf16.msra.mxu0 %v6640_v3  ;;  %v5647_v3 = vld [vmem:[%s9726_s13 + $0x238] sm:$0xff] }
 0x763   : > { %6643 = vmatprep.subr.bf16.mxu0 %v6642_v6  ;;  %v6446_v49 = vpack.c.bf16 %v5647_v3, %v5645_v61  ;;  %v5646_v6 = vld [vmem:[%s9726_s13 + $0x230] sm:$0xff]  ;;  %v5685_v61 = vld [vmem:[%s9726_s13 + $0x368] sm:$0xff]  ;;  %v5687_v3 = vld [vmem:[%s9726_s13 + $0x378] sm:$0xff] }
 0x764   : > { %v6448_v12 = vpack.c.bf16 %v5646_v6, %v5644_v0  ;;  %v5686_v0 = vld [vmem:[%s9726_s13 + $0x370] sm:$0xff]  ;;  %v4239_v6 = vld [vmem:[#allocation14 + $0x1a8] sm:$0xff] }
 0x766   : > { %6645 = vmatpush1.bf16.msra.mxu0 %v6644_v38  ;;  %v5651_v38 = vld [vmem:[%s9726_s13 + $0x258] sm:$0xff] }
 0x767   : > { %6647 = vmatprep.subr.bf16.mxu0 %v6646_v15  ;;  %v6450_v14 = vpack.c.bf16 %v5651_v38, %v5649_v29  ;;  %v5650_v15 = vld [vmem:[%s9726_s13 + $0x250] sm:$0xff] }
 0x768   : > { %v6452_v17 = vpack.c.bf16 %v5650_v15, %v5648_v4  ;;  %v4241_v38 = vld [vmem:[#allocation14 + $0x1b8] sm:$0xff] }
 0x769   : > { %v6654_v4 = vpack.c.bf16 %v4241_v38, %v4239_v6  ;;  %v3811_v6 = vld [vmem:[%s9726_s13 + $0x118] sm:$0xff] }
 0x76a   : > { %6649 = vmatpush1.bf16.msra.mxu0 %v6648_v58  ;;  %v5655_v58 = vld [vmem:[%s9726_s13 + $0x278] sm:$0xff] }
 0x76b   : > { %6651 = vmatprep.subr.bf16.mxu0 %v6650_v19  ;;  %v6454_v18 = vpack.c.bf16 %v5655_v58, %v5653_v16  ;;  %v5654_v19 = vld [vmem:[%s9726_s13 + $0x270] sm:$0xff]  ;;  %v3777_v16 = vld [vmem:[%s9726_s13 + $0x8] sm:$0xff]  ;;  %v3779_v58 = vld [vmem:[%s9726_s13 + $0x18] sm:$0xff] }
 0x76c   : > { %v6456_v22 = vpack.c.bf16 %v5654_v19, %v5652_v2  ;;  %v3776_v19 = vld [vmem:[%s9726_s13] sm:$0xff] }
 0x76e   : > { %6653 = vmatpush1.bf16.msra.mxu0 %v6652_v21  ;;  %v5659_v21 = vld [vmem:[%s9726_s13 + $0x298] sm:$0xff] }
 0x76f   : > { %6655 = vmatprep.subr.bf16.mxu0 %v6654_v4  ;;  %v3813_v4 = vld [vmem:[%s9726_s13 + $0x128] sm:$0xff] }
 0x810   : > { %v3504_v23 = vpop.f32.mrb[20].mxu0 }
 0x811   : > { %v6870_v26 = vadd.f32 %v8968_v60, %v3504_v23  ;;  %v3506_v27 = vpop.f32.mrb[21].mxu0  ;;  %v6458_v23 = vpack.c.bf16 %v5659_v21, %v5657_v20  ;;  %v3778_v20 = vld [vmem:[%s9726_s13 + $0x10] sm:$0xff]  ;;  %v3781_v21 = vld [vmem:[%s9726_s13 + $0x28] sm:$0xff] }
 0x812   : > { %v6874_v31 = vadd.f32 %v8970_v51, %v3506_v27  ;;  %v3543_v51 = vld [vmem:[#allocation13] sm:$0x7f] }
 0x813   : > { %v6871_v35 = vadd.f32 %v6870_v26, %v3524_v25  ;;  %v5658_v26 = vld [vmem:[%s9726_s13 + $0x290] sm:$0xff]  ;;  %v5661_v27 = vld [vmem:[%s9726_s13 + $0x2a8] sm:$0xff] }
 0x814   : > { %v3510_v46 = vpop.f32.mrb[22].mxu0  ;;  %v6875_v39 = vadd.f32 %v6874_v31, %v3528_v28 }
 0x815   : > { %v6878_v36 = vadd.f32 %v8974_v55, %v3510_v46  ;;  %v3512_v37 = vpop.f32.mrb[23].mxu0  ;;  %v3539_v43 = vmax.f32 %v6871_v35, 0.0  ;;  %v5633_v55 = vld [vmem:[%s9726_s13 + $0x1c8] sm:$0xff]  ;;  %v5660_v35 = vld [vmem:[%s9726_s13 + $0x2a0] sm:$0xff] }
 0x816   : > { %v6882_v57 = vadd.f32 %v8976_v13, %v3512_v37  ;;  %v3540_v45 = vmax.f32 %v6875_v39, 0.0  ;;  %v5635_v13 = vld [vmem:[%s9726_s13 + $0x1d8] sm:$0xff]  ;;  %v5665_v37 = vld [vmem:[%s9726_s13 + $0x2c8] sm:$0xff] }
 0x817   : > { %v6879_v40 = vadd.f32 %v6878_v36, %v3524_v25  ;;  %v6434_v48 = vpack.c.bf16 %v5635_v13, %v5633_v55  ;;  %v5656_v25 = vld [vmem:[%s9726_s13 + $0x280] sm:$0xff]  ;;  %v5662_v36 = vld [vmem:[%s9726_s13 + $0x2b0] sm:$0xff]  ;;  %v5667_v39 = vld [vmem:[%s9726_s13 + $0x2d8] sm:$0xff] }
 0x818   : > { %v6883_v42 = vadd.f32 %v6882_v57, %v3528_v28  ;;  %v5663_v28 = vld [vmem:[%s9726_s13 + $0x2b8] sm:$0xff]  ;;  %v6460_v31 = vpack.c.bf16 %v5658_v26, %v5656_v25  ;;  %v6464_v57 = vpack.c.bf16 %v5662_v36, %v5660_v35  ;;  %v5673_v55 = vld [vmem:[%s9726_s13 + $0x308] sm:$0xff]  ;;  %v6492_v25 = vpack.c.bf16 %v3778_v20, %v3776_v19 }
 0x819   : > { %v3541_v44 = vmax.f32 %v6879_v40, 0.0  ;;  %v6462_v46 = vpack.c.bf16 %v5663_v28, %v5661_v27  ;;  %v6466_v40 = vpack.c.bf16 %v5667_v39, %v5665_v37  ;;  %v5675_v13 = vld [vmem:[%s9726_s13 + $0x318] sm:$0xff]  ;;  %v3780_v28 = vld [vmem:[%s9726_s13 + $0x20] sm:$0xff]  ;;  %v3817_v19 = vld [vmem:[%s9726_s13 + $0x148] sm:$0xff] }
 0x81a   : > { %v3542_v24 = vmax.f32 %v6883_v42, 0.0  ;;  %v5664_v42 = vld [vmem:[%s9726_s13 + $0x2c0] sm:$0xff]  ;;  %v3787_v35 = vld [vmem:[%s9726_s13 + $0x58] sm:$0xff] }
 0x81b   : > { %v6419_v60 = vpack.c.bf16 %v3541_v44, %v3539_v43  ;;  %v5666_v43 = vld [vmem:[%s9726_s13 + $0x2d0] sm:$0xff]  ;;  %v5669_v44 = vld [vmem:[%s9726_s13 + $0x2e8] sm:$0xff]  ;;  %v3819_v20 = vld [vmem:[%s9726_s13 + $0x158] sm:$0xff] }
 0x81c   : > { %v6416_v54 = vpack.c.bf16 %v3542_v24, %v3540_v45  ;;  %v5671_v45 = vld [vmem:[%s9726_s13 + $0x2f8] sm:$0xff]  ;;  %v6468_v24 = vpack.c.bf16 %v5666_v43, %v5664_v42  ;;  %v3789_v43 = vld [vmem:[%s9726_s13 + $0x68] sm:$0xff] }
 0x81e   : > { %6418 = vmatprep.subr.msk.bf16.mxu1 %vm8588_vm8, %v6416_v54 }
 0x81f   : > { %6421 = vmatpush1.bf16.msk.msra.mxu1 %vm8588_vm8, %v6419_v60 }
 0x820   : > { %6424 = vmatprep.subr.msk.bf16.mxu1 %vm8588_vm8, %v6416_v54 }
 0x822   : > { %5625 = vmatmul.mubr.msk.f32.vlgmr.msra.gmra.mrb[44].mxu1 %vm2833_vm9, %v3543_v51  ;;  %v5670_v51 = vld [vmem:[%s9726_s13 + $0x2f0] sm:$0xff] }
 0x823   : > { %6427 = vmatpush1.bf16.msk.msra.mxu1 %vm8588_vm8, %v6419_v60  ;;  %3693 = vmatprep.mubr.f32.mxu1 %v7428_v1 }
 0x824   : > { %6430 = vmatprep.subr.msk.bf16.mxu1 %vm8588_vm8, %v6416_v54  ;;  %v5668_v54 = vld [vmem:[%s9726_s13 + $0x2e0] sm:$0xff] }
 0x826   : > { %5628 = vmatmul.mubr.msk.f32.vlgmr.msra.gmra.mrb[46].mxu1 %vm2833_vm9, %v3625_v47  ;;  %v6472_v47 = vpack.c.bf16 %v5670_v51, %v5668_v54  ;;  %v3790_v54 = vld [vmem:[%s9726_s13 + $0x70] sm:$0xff]  ;;  %v3793_v51 = vld [vmem:[%s9726_s13 + $0x88] sm:$0xff] }
 0x827   : > { %6433 = vmatpush1.bf16.msk.msra.mxu1 %vm8588_vm8, %v6419_v60  ;;  %3769 = vmatprep.mubr.f32.mxu1 %v7428_v1  ;;  %v6470_v60 = vpack.c.bf16 %v5671_v45, %v5669_v44  ;;  %v3791_v44 = vld [vmem:[%s9726_s13 + $0x78] sm:$0xff] }
 0x828   : > { %6435 = vmatprep.subr.bf16.mxu1 %v6434_v48  ;;  %v6474_v48 = vpack.c.bf16 %v5675_v13, %v5673_v55  ;;  %v3795_v55 = vld [vmem:[%s9726_s13 + $0x98] sm:$0xff] }
 0x82a   : > { %5631 = vmatmul.mubr.msk.f32.vlgmr.msra.gmra.mrb[48].mxu1 %vm2833_vm9, %v3701_v33  ;;  %v6476_v33 = vpack.c.bf16 %v5674_v5, %v5672_v50  ;;  %v3794_v50 = vld [vmem:[%s9726_s13 + $0x90] sm:$0xff]  ;;  %v3797_v5 = vld [vmem:[%s9726_s13 + $0xa8] sm:$0xff] }
 0x82b   : > { %6437 = vmatpush1.bf16.msra.mxu1 %v6436_v52  ;;  %v6478_v52 = vpack.c.bf16 %v5679_v41, %v5677_v53  ;;  %v3799_v53 = vld [vmem:[%s9726_s13 + $0xb8] sm:$0xff] }
 0x82c   : > { %6439 = vmatprep.subr.bf16.mxu1 %v6438_v62  ;;  %v5676_v62 = vld [vmem:[%s9726_s13 + $0x320] sm:$0xff] }
 0x82d   : > { %v6480_v7 = vpack.c.bf16 %v5678_v56, %v5676_v62  ;;  %v3798_v62 = vld [vmem:[%s9726_s13 + $0xb0] sm:$0xff]  ;;  %v3801_v56 = vld [vmem:[%s9726_s13 + $0xc8] sm:$0xff] }
 0x82f   : > { %6441 = vmatpush1.bf16.msra.mxu1 %v6440_v9  ;;  %v6482_v9 = vpack.c.bf16 %v5683_v8, %v5681_v30  ;;  %v3803_v30 = vld [vmem:[%s9726_s13 + $0xd8] sm:$0xff] }
 0x830   : > { %6443 = vmatprep.subr.bf16.mxu1 %v6442_v59  ;;  %v5680_v59 = vld [vmem:[%s9726_s13 + $0x340] sm:$0xff] }
 0x831   : > { %v6484_v10 = vpack.c.bf16 %v5682_v11, %v5680_v59  ;;  %v3802_v59 = vld [vmem:[%s9726_s13 + $0xd0] sm:$0xff]  ;;  %v3805_v11 = vld [vmem:[%s9726_s13 + $0xe8] sm:$0xff] }
 0x833   : > { %6445 = vmatpush1.bf16.msra.mxu1 %v6444_v63  ;;  %v6486_v63 = vpack.c.bf16 %v5687_v3, %v5685_v61 }
 0x834   : > { %6447 = vmatprep.subr.bf16.mxu1 %v6446_v49  ;;  %v5684_v49 = vld [vmem:[%s9726_s13 + $0x360] sm:$0xff] }
 0x835   : > { %v6488_v29 = vpack.c.bf16 %v5686_v0, %v5684_v49  ;;  %v3806_v49 = vld [vmem:[%s9726_s13 + $0xf0] sm:$0xff]  ;;  %v3809_v0 = vld [vmem:[%s9726_s13 + $0x108] sm:$0xff] }
 0x836   : > { %v6522_v38 = vpack.c.bf16 %v3811_v6, %v3809_v0  ;;  %v5707_v0 = vld [vmem:[%s9726_s13 + $0x408] sm:$0xff]  ;;  %v5709_v6 = vld [vmem:[%s9726_s13 + $0x418] sm:$0xff] }
 0x837   : > { %6449 = vmatpush1.bf16.msra.mxu1 %v6448_v12  ;;  %v4238_v12 = vld [vmem:[#allocation14 + $0x1a0] sm:$0xff] }
 0x838   : > { %6451 = vmatprep.subr.bf16.mxu1 %v6450_v14  ;;  %v4240_v14 = vld [vmem:[#allocation14 + $0x1b0] sm:$0xff] }
 0x839   : > { %v6656_v15 = vpack.c.bf16 %v4240_v14, %v4238_v12  ;;  %v3808_v12 = vld [vmem:[%s9726_s13 + $0x100] sm:$0xff]  ;;  %v3810_v14 = vld [vmem:[%s9726_s13 + $0x110] sm:$0xff] }
 0x83b   : > { %6453 = vmatpush1.bf16.msra.mxu1 %v6452_v17  ;;  %v6490_v17 = vpack.c.bf16 %v3779_v58, %v3777_v16  ;;  %6657 = vmatpush1.bf16.msra.mxu0 %v6656_v15  ;;  %v3815_v15 = vld [vmem:[%s9726_s13 + $0x138] sm:$0xff]  ;;  %v6524_v16 = vpack.c.bf16 %v3810_v14, %v3808_v12  ;;  %v5706_v12 = vld [vmem:[%s9726_s13 + $0x400] sm:$0xff]  ;;  %v5708_v14 = vld [vmem:[%s9726_s13 + $0x410] sm:$0xff] }
 0x83c   : > { %6455 = vmatprep.subr.bf16.mxu1 %v6454_v18  ;;  %v6526_v58 = vpack.c.bf16 %v3815_v15, %v3813_v4  ;;  %v5711_v4 = vld [vmem:[%s9726_s13 + $0x428] sm:$0xff]  ;;  %v5713_v15 = vld [vmem:[%s9726_s13 + $0x438] sm:$0xff] }
 0x83f   : > { %6457 = vmatpush1.bf16.msra.mxu1 %v6456_v22  ;;  %v3783_v22 = vld [vmem:[%s9726_s13 + $0x38] sm:$0xff] }
 0x840   : > { %6459 = vmatprep.subr.bf16.mxu1 %v6458_v23  ;;  %v6494_v27 = vpack.c.bf16 %v3783_v22, %v3781_v21  ;;  %v6530_v22 = vpack.c.bf16 %v3819_v20, %v3817_v19  ;;  %v5715_v19 = vld [vmem:[%s9726_s13 + $0x448] sm:$0xff]  ;;  %v5717_v20 = vld [vmem:[%s9726_s13 + $0x458] sm:$0xff] }
 0x843   : > { %6461 = vmatpush1.bf16.msra.mxu1 %v6460_v31  ;;  %v3782_v31 = vld [vmem:[%s9726_s13 + $0x30] sm:$0xff] }
 0x844   : > { %6463 = vmatprep.subr.bf16.mxu1 %v6462_v46  ;;  %v3785_v46 = vld [vmem:[%s9726_s13 + $0x48] sm:$0xff]  ;;  %v6496_v36 = vpack.c.bf16 %v3782_v31, %v3780_v28 }
 0x845   : > { %v6498_v39 = vpack.c.bf16 %v3787_v35, %v3785_v46  ;;  %v3820_v46 = vld [vmem:[%s9726_s13 + $0x160] sm:$0xff]  ;;  %v3822_v35 = vld [vmem:[%s9726_s13 + $0x170] sm:$0xff] }
 0x847   : > { %6465 = vmatpush1.bf16.msra.mxu1 %v6464_v57  ;;  %v3784_v57 = vld [vmem:[%s9726_s13 + $0x40] sm:$0xff] }
 0x848   : > { %6467 = vmatprep.subr.bf16.mxu1 %v6466_v40  ;;  %v3786_v40 = vld [vmem:[%s9726_s13 + $0x50] sm:$0xff] }
 0x849   : > { %v6500_v45 = vpack.c.bf16 %v3786_v40, %v3784_v57  ;;  %v6536_v57 = vpack.c.bf16 %v3822_v35, %v3820_v46  ;;  %v5718_v46 = vld [vmem:[%s9726_s13 + $0x460] sm:$0xff]  ;;  %v5720_v35 = vld [vmem:[%s9726_s13 + $0x470] sm:$0xff] }
 0x84b   : > { %6469 = vmatpush1.bf16.msra.mxu1 %v6468_v24  ;;  %v6502_v24 = vpack.c.bf16 %v3791_v44, %v3789_v43  ;;  %v3824_v43 = vld [vmem:[%s9726_s13 + $0x180] sm:$0xff]  ;;  %v3826_v44 = vld [vmem:[%s9726_s13 + $0x190] sm:$0xff] }
 0x84c   : > { %6471 = vmatprep.subr.bf16.mxu1 %v6470_v60  ;;  %v3788_v60 = vld [vmem:[%s9726_s13 + $0x60] sm:$0xff] }
 0x84d   : > { %v6504_v13 = vpack.c.bf16 %v3790_v54, %v3788_v60  ;;  %v6540_v60 = vpack.c.bf16 %v3826_v44, %v3824_v43  ;;  %v5722_v43 = vld [vmem:[%s9726_s13 + $0x480] sm:$0xff]  ;;  %v5724_v44 = vld [vmem:[%s9726_s13 + $0x490] sm:$0xff] }
 0x84f   : > { %6473 = vmatpush1.bf16.msra.mxu1 %v6472_v47  ;;  %v6506_v47 = vpack.c.bf16 %v3795_v55, %v3793_v51  ;;  %v3828_v51 = vld [vmem:[%s9726_s13 + $0x1a0] sm:$0xff]  ;;  %v3830_v55 = vld [vmem:[%s9726_s13 + $0x1b0] sm:$0xff] }
 0x850   : > { %6475 = vmatprep.subr.bf16.mxu1 %v6474_v48  ;;  %v3792_v48 = vld [vmem:[%s9726_s13 + $0x80] sm:$0xff] }
 0x851   : > { %v6508_v41 = vpack.c.bf16 %v3794_v50, %v3792_v48  ;;  %v6544_v48 = vpack.c.bf16 %v3830_v55, %v3828_v51  ;;  %v5726_v51 = vld [vmem:[%s9726_s13 + $0x4a0] sm:$0xff]  ;;  %v5728_v55 = vld [vmem:[%s9726_s13 + $0x4b0] sm:$0xff] }
 0x853   : > { %6477 = vmatpush1.bf16.msra.mxu1 %v6476_v33  ;;  %v6510_v33 = vpack.c.bf16 %v3799_v53, %v3797_v5  ;;  %v5690_v5 = vld [vmem:[%s9726_s13 + $0x380] sm:$0xff]  ;;  %v5692_v53 = vld [vmem:[%s9726_s13 + $0x390] sm:$0xff] }
 0x854   : > { %6479 = vmatprep.subr.bf16.mxu1 %v6478_v52  ;;  %v3796_v52 = vld [vmem:[%s9726_s13 + $0xa0] sm:$0xff] }
 0x855   : > { %v6512_v8 = vpack.c.bf16 %v3798_v62, %v3796_v52  ;;  %v6548_v52 = vpack.c.bf16 %v5692_v53, %v5690_v5  ;;  %v5730_v5 = vld [vmem:[%s9726_s13 + $0x4c0] sm:$0xff]  ;;  %v5732_v53 = vld [vmem:[%s9726_s13 + $0x4d0] sm:$0xff] }
 0x857   : > { %6481 = vmatpush1.bf16.msra.mxu1 %v6480_v7  ;;  %v6514_v7 = vpack.c.bf16 %v3803_v30, %v3801_v56  ;;  %v5694_v56 = vld [vmem:[%s9726_s13 + $0x3a0] sm:$0xff]  ;;  %v5696_v30 = vld [vmem:[%s9726_s13 + $0x3b0] sm:$0xff] }
 0x858   : > { %6483 = vmatprep.subr.bf16.mxu1 %v6482_v9  ;;  %v3800_v9 = vld [vmem:[%s9726_s13 + $0xc0] sm:$0xff] }
 0x859   : > { %v6516_v61 = vpack.c.bf16 %v3802_v59, %v3800_v9  ;;  %v6552_v9 = vpack.c.bf16 %v5696_v30, %v5694_v56  ;;  %v5734_v56 = vld [vmem:[%s9726_s13 + $0x4e0] sm:$0xff]  ;;  %v5736_v30 = vld [vmem:[%s9726_s13 + $0x4f0] sm:$0xff] }
 0x85b   : > { %6485 = vmatpush1.bf16.msra.mxu1 %v6484_v10  ;;  %v3807_v10 = vld [vmem:[%s9726_s13 + $0xf8] sm:$0xff] }
 0x85c   : > { %6487 = vmatprep.subr.bf16.mxu1 %v6486_v63  ;;  %v6518_v3 = vpack.c.bf16 %v3807_v10, %v3805_v11  ;;  %v3804_v63 = vld [vmem:[%s9726_s13 + $0xe0] sm:$0xff]  ;;  %v5700_v10 = vld [vmem:[%s9726_s13 + $0x3d0] sm:$0xff] }
 0x85d   : > { %v5698_v11 = vld [vmem:[%s9726_s13 + $0x3c0] sm:$0xff] }
 0x85f   : > { %6489 = vmatpush1.bf16.msra.mxu1 %v6488_v29  ;;  %v6520_v29 = vpack.c.bf16 %v3806_v49, %v3804_v63  ;;  %v5702_v63 = vld [vmem:[%s9726_s13 + $0x3e0] sm:$0xff]  ;;  %v5704_v49 = vld [vmem:[%s9726_s13 + $0x3f0] sm:$0xff] }
 0x860   : > { %6491 = vmatprep.subr.bf16.mxu1 %v6490_v17  ;;  %v3812_v17 = vld [vmem:[%s9726_s13 + $0x120] sm:$0xff] }
 0x8f5   : > { %v9180_v18 = vpop.f32.mrb[44].mxu1 }
 0x8f6   : > { %v3621_v2 = vpop.f32.mrb[45].mxu1 }
 0x8f9   : > { %v3695_v23 = vpop.f32.mrb[46].mxu1 }
 0x8fa   : > { %v3697_v26 = vpop.f32.mrb[47].mxu1 }
 0x8fb   : > { %5688 = vmatprep.mubr.msk.f32.mxu1 %vm1094_vm1, %v3697_v26  ;;  %5747 = vmatprep.mubr.msk.f32.mxu0 %vm1094_vm1, %v3697_v26  ;;  %v3821_v26 = vld [vmem:[%s9726_s13 + $0x168] sm:$0xff] }
 0x8fc   : > { %3957 = vmatmul.mubr.f32.vlgmr.msra.gmra.mrb[50].mxu1 %v3695_v23  ;;  %4319 = vmatmul.mubr.f32.vlgmr.msra.gmra.mrb[24].mxu0 %v3695_v23  ;;  %v3816_v23 = vld [vmem:[%s9726_s13 + $0x140] sm:$0xff] }
 0x8fd   : > { %6493 = vmatpush1.bf16.msra.mxu1 %v6492_v25  ;;  %5689 = vmatprep.mubr.msk.f32.mxu1 %vm1094_vm1, %v3621_v2  ;;  %v9209_v37 = vpop.f32.mrb[48].mxu1  ;;  %v3814_v2 = vld [vmem:[%s9726_s13 + $0x130] sm:$0xff] }
 0x8fe   : > { %6495 = vmatprep.subr.bf16.mxu1 %v6494_v27  ;;  %v9217_v42 = vpop.f32.mrb[49].mxu1  ;;  %v6528_v21 = vpack.c.bf16 %v3814_v2, %v3812_v17  ;;  %v3818_v25 = vld [vmem:[%s9726_s13 + $0x150] sm:$0xff]  ;;  %v3823_v27 = vld [vmem:[%s9726_s13 + $0x178] sm:$0xff]  ;;  %v5710_v17 = vld [vmem:[%s9726_s13 + $0x420] sm:$0xff] }
 0x8ff   : > { %v6532_v28 = vpack.c.bf16 %v3818_v25, %v3816_v23  ;;  %v6534_v31 = vpack.c.bf16 %v3823_v27, %v3821_v26  ;;  %v5712_v2 = vld [vmem:[%s9726_s13 + $0x430] sm:$0xff]  ;;  %v5714_v23 = vld [vmem:[%s9726_s13 + $0x440] sm:$0xff]  ;;  %v5719_v26 = vld [vmem:[%s9726_s13 + $0x468] sm:$0xff] }
 0x900   : > { %v5716_v25 = vld [vmem:[%s9726_s13 + $0x450] sm:$0xff]  ;;  %v5721_v27 = vld [vmem:[%s9726_s13 + $0x478] sm:$0xff] }
 0x901   : > { %6497 = vmatpush1.bf16.msra.mxu1 %v6496_v36  ;;  %v3825_v36 = vld [vmem:[%s9726_s13 + $0x188] sm:$0xff] }
 0x902   : > { %6499 = vmatprep.subr.bf16.mxu1 %v6498_v39  ;;  %v3827_v39 = vld [vmem:[%s9726_s13 + $0x198] sm:$0xff] }
 0x903   : > { %v6538_v40 = vpack.c.bf16 %v3827_v39, %v3825_v36  ;;  %v5723_v36 = vld [vmem:[%s9726_s13 + $0x488] sm:$0xff]  ;;  %v5725_v39 = vld [vmem:[%s9726_s13 + $0x498] sm:$0xff] }
 0x905   : > { %6501 = vmatpush1.bf16.msra.mxu1 %v6500_v45  ;;  %v3829_v45 = vld [vmem:[%s9726_s13 + $0x1a8] sm:$0xff] }
 0x906   : > { %6503 = vmatprep.subr.bf16.mxu1 %v6502_v24  ;;  %v3831_v24 = vld [vmem:[%s9726_s13 + $0x1b8] sm:$0xff] }
 0x907   : > { %v6542_v54 = vpack.c.bf16 %v3831_v24, %v3829_v45  ;;  %v5727_v45 = vld [vmem:[%s9726_s13 + $0x4a8] sm:$0xff]  ;;  %v5729_v24 = vld [vmem:[%s9726_s13 + $0x4b8] sm:$0xff] }
 0x909   : > { %6505 = vmatpush1.bf16.msra.mxu1 %v6504_v13  ;;  %v5691_v13 = vld [vmem:[%s9726_s13 + $0x388] sm:$0xff] }
 0x90a   : > { %6507 = vmatprep.subr.bf16.mxu1 %v6506_v47  ;;  %v5693_v47 = vld [vmem:[%s9726_s13 + $0x398] sm:$0xff] }
 0x90b   : > { %v6546_v50 = vpack.c.bf16 %v5693_v47, %v5691_v13  ;;  %v5731_v13 = vld [vmem:[%s9726_s13 + $0x4c8] sm:$0xff]  ;;  %v5733_v47 = vld [vmem:[%s9726_s13 + $0x4d8] sm:$0xff] }
 0x90d   : > { %6509 = vmatpush1.bf16.msra.mxu1 %v6508_v41  ;;  %v5695_v41 = vld [vmem:[%s9726_s13 + $0x3a8] sm:$0xff] }
 0x90e   : > { %6511 = vmatprep.subr.bf16.mxu1 %v6510_v33  ;;  %v5697_v33 = vld [vmem:[%s9726_s13 + $0x3b8] sm:$0xff] }
 0x90f   : > { %v6550_v62 = vpack.c.bf16 %v5697_v33, %v5695_v41  ;;  %v5735_v41 = vld [vmem:[%s9726_s13 + $0x4e8] sm:$0xff]  ;;  %v5737_v33 = vld [vmem:[%s9726_s13 + $0x4f8] sm:$0xff] }
 0x911   : > { %6513 = vmatpush1.bf16.msra.mxu1 %v6512_v8  ;;  %v5699_v8 = vld [vmem:[%s9726_s13 + $0x3c8] sm:$0xff] }
 0x912   : > { %6515 = vmatprep.subr.bf16.mxu1 %v6514_v7  ;;  %v5701_v7 = vld [vmem:[%s9726_s13 + $0x3d8] sm:$0xff] }
 0x913   : > { %v6554_v59 = vpack.c.bf16 %v5701_v7, %v5699_v8  ;;  %v5739_v8 = vld [vmem:[%s9726_s13 + $0x508] sm:$0xff]  ;;  %v5741_v7 = vld [vmem:[%s9726_s13 + $0x518] sm:$0xff] }
 0x915   : > { %6517 = vmatpush1.bf16.msra.mxu1 %v6516_v61  ;;  %v5703_v61 = vld [vmem:[%s9726_s13 + $0x3e8] sm:$0xff] }
 0x916   : > { %6519 = vmatprep.subr.bf16.mxu1 %v6518_v3 }
 0x919   : > { %6521 = vmatpush1.bf16.msra.mxu1 %v6520_v29  ;;  %v6560_v29 = vpack.c.bf16 %v5704_v49, %v5702_v63  ;;  %v5742_v63 = vld [vmem:[%s9726_s13 + $0x520] sm:$0xff]  ;;  %v5744_v49 = vld [vmem:[%s9726_s13 + $0x530] sm:$0xff] }
 0x91a   : > { %6523 = vmatprep.subr.bf16.mxu1 %v6522_v38  ;;  %v6562_v38 = vpack.c.bf16 %v5709_v6, %v5707_v0  ;;  %v6600_v0 = vpack.c.bf16 %v5744_v49, %v5742_v63  ;;  %v4542_v6 = vld [vmem:[#allocation16 + $0x1c8] sm:$0xff]  ;;  %v4579_v63 = vld [vmem:[#allocation16 + $0x2f0] sm:$0xff] }
 0x91b   : > { %v4582_v49 = vld [vmem:[#allocation16 + $0x308] sm:$0xff] }
 0x91d   : > { %6525 = vmatpush1.bf16.msra.mxu1 %v6524_v16  ;;  %v6564_v16 = vpack.c.bf16 %v5708_v14, %v5706_v12  ;;  %v4543_v14 = vld [vmem:[#allocation16 + $0x1d0] sm:$0xff] }
 0x91e   : > { %6527 = vmatprep.subr.bf16.mxu1 %v6526_v58  ;;  %v6566_v58 = vpack.c.bf16 %v5713_v15, %v5711_v4  ;;  %v4546_v4 = vld [vmem:[#allocation16 + $0x1e8] sm:$0xff]  ;;  %v4548_v15 = vld [vmem:[#allocation16 + $0x1f8] sm:$0xff] }
 0x921   : > { %6529 = vmatpush1.bf16.msra.mxu1 %v6528_v21  ;;  %v6568_v21 = vpack.c.bf16 %v5712_v2, %v5710_v17  ;;  %v4545_v17 = vld [vmem:[#allocation16 + $0x1e0] sm:$0xff]  ;;  %v4547_v2 = vld [vmem:[#allocation16 + $0x1f0] sm:$0xff] }
 0x922   : > { %6531 = vmatprep.subr.bf16.mxu1 %v6530_v22  ;;  %v6570_v22 = vpack.c.bf16 %v5717_v20, %v5715_v19  ;;  %v4550_v19 = vld [vmem:[#allocation16 + $0x208] sm:$0xff]  ;;  %v4552_v20 = vld [vmem:[#allocation16 + $0x218] sm:$0xff] }
 0x925   : > { %6533 = vmatpush1.bf16.msra.mxu1 %v6532_v28  ;;  %v6572_v28 = vpack.c.bf16 %v5716_v25, %v5714_v23  ;;  %v4551_v23 = vld [vmem:[#allocation16 + $0x210] sm:$0xff]  ;;  %v4554_v25 = vld [vmem:[#allocation16 + $0x228] sm:$0xff] }
 0x926   : > { %6535 = vmatprep.subr.bf16.mxu1 %v6534_v31  ;;  %v6574_v31 = vpack.c.bf16 %v5721_v27, %v5719_v26  ;;  %v4556_v26 = vld [vmem:[#allocation16 + $0x238] sm:$0xff] }
 0x929   : > { %6537 = vmatpush1.bf16.msra.mxu1 %v6536_v57  ;;  %v6576_v57 = vpack.c.bf16 %v5720_v35, %v5718_v46  ;;  %v4555_v46 = vld [vmem:[#allocation16 + $0x230] sm:$0xff]  ;;  %v4558_v35 = vld [vmem:[#allocation16 + $0x248] sm:$0xff] }
 0x92a   : > { %6539 = vmatprep.subr.bf16.mxu1 %v6538_v40  ;;  %v6578_v40 = vpack.c.bf16 %v5725_v39, %v5723_v36  ;;  %v4560_v36 = vld [vmem:[#allocation16 + $0x258] sm:$0xff] }
 0x92d   : > { %6541 = vmatpush1.bf16.msra.mxu1 %v6540_v60  ;;  %v6580_v60 = vpack.c.bf16 %v5724_v44, %v5722_v43  ;;  %v4559_v43 = vld [vmem:[#allocation16 + $0x250] sm:$0xff]  ;;  %v4562_v44 = vld [vmem:[#allocation16 + $0x268] sm:$0xff] }
 0x92e   : > { %6543 = vmatprep.subr.bf16.mxu1 %v6542_v54  ;;  %v6582_v54 = vpack.c.bf16 %v5729_v24, %v5727_v45  ;;  %v4564_v45 = vld [vmem:[#allocation16 + $0x278] sm:$0xff] }
 0x931   : > { %6545 = vmatpush1.bf16.msra.mxu1 %v6544_v48  ;;  %v6584_v48 = vpack.c.bf16 %v5728_v55, %v5726_v51  ;;  %v4563_v51 = vld [vmem:[#allocation16 + $0x270] sm:$0xff]  ;;  %v4566_v55 = vld [vmem:[#allocation16 + $0x288] sm:$0xff] }
 0x932   : > { %6547 = vmatprep.subr.bf16.mxu1 %v6546_v50  ;;  %v6586_v50 = vpack.c.bf16 %v5733_v47, %v5731_v13  ;;  %v4568_v13 = vld [vmem:[#allocation16 + $0x298] sm:$0xff] }
 0x934   : > { %4031 = vmatmul.mubr.f32.vlgmr.msra.gmra.mrb[50].mxu1 %v9180_v18  ;;  %v5705_v18 = vld [vmem:[%s9726_s13 + $0x3f8] sm:$0xff] }
 0x935   : > { %6549 = vmatpush1.bf16.msra.mxu1 %v6548_v52  ;;  %5746 = vmatprep.mubr.msk.f32.mxu1 %vm1094_vm1, %v9217_v42  ;;  %v6556_v42 = vpack.c.bf16 %v5700_v10, %v5698_v11  ;;  %v6558_v3 = vpack.c.bf16 %v5705_v18, %v5703_v61  ;;  %v6588_v52 = vpack.c.bf16 %v5732_v53, %v5730_v5  ;;  %v5738_v11 = vld [vmem:[%s9726_s13 + $0x500] sm:$0xff]  ;;  %v5740_v10 = vld [vmem:[%s9726_s13 + $0x510] sm:$0xff]  ;;  %v5743_v61 = vld [vmem:[%s9726_s13 + $0x528] sm:$0xff] }
 0x936   : > { %6551 = vmatprep.subr.bf16.mxu1 %v6550_v62  ;;  %v6590_v62 = vpack.c.bf16 %v5737_v33, %v5735_v41  ;;  %v5745_v18 = vld [vmem:[%s9726_s13 + $0x538] sm:$0xff]  ;;  %v4567_v5 = vld [vmem:[#allocation16 + $0x290] sm:$0xff]  ;;  %v4570_v53 = vld [vmem:[#allocation16 + $0x2a8] sm:$0xff] }
 0x937   : > { %v4572_v41 = vld [vmem:[#allocation16 + $0x2b8] sm:$0xff] }
 0x939   : > { %6553 = vmatpush1.bf16.msra.mxu1 %v6552_v9  ;;  %v6592_v9 = vpack.c.bf16 %v5736_v30, %v5734_v56  ;;  %v4571_v56 = vld [vmem:[#allocation16 + $0x2b0] sm:$0xff]  ;;  %v4574_v30 = vld [vmem:[#allocation16 + $0x2c8] sm:$0xff] }
 0x93a   : > { %6555 = vmatprep.subr.bf16.mxu1 %v6554_v59  ;;  %v6594_v59 = vpack.c.bf16 %v5741_v7, %v5739_v8  ;;  %v4576_v8 = vld [vmem:[#allocation16 + $0x2d8] sm:$0xff] }
 0x93d   : > { %6557 = vmatpush1.bf16.msra.mxu1 %v6556_v42  ;;  %v6596_v42 = vpack.c.bf16 %v5740_v10, %v5738_v11  ;;  %v4575_v11 = vld [vmem:[#allocation16 + $0x2d0] sm:$0xff]  ;;  %v4578_v10 = vld [vmem:[#allocation16 + $0x2e8] sm:$0xff] }
 0x93e   : > { %6559 = vmatprep.subr.bf16.mxu1 %v6558_v3  ;;  %v6598_v3 = vpack.c.bf16 %v5745_v18, %v5743_v61  ;;  %v4580_v61 = vld [vmem:[#allocation16 + $0x2f8] sm:$0xff] }
 0x941   : > { %6561 = vmatpush1.bf16.msra.mxu1 %v6560_v29  ;;  %v4544_v29 = vld [vmem:[#allocation16 + $0x1d8] sm:$0xff] }
 0x942   : > { %6563 = vmatprep.subr.bf16.mxu1 %v6562_v38  ;;  %v4541_v38 = vld [vmem:[#allocation16 + $0x1c0] sm:$0xff]  ;;  %v6658_v12 = vpack.c.bf16 %v4544_v29, %v4542_v6 }
 0x944   : > { %6659 = vmatprep.subr.bf16.mxu0 %v6658_v12  ;;  %v4583_v12 = vld [vmem:[#allocation16 + $0x310] sm:$0xff] }
 0x945   : > { %6565 = vmatpush1.bf16.msra.mxu1 %v6564_v16  ;;  %v6660_v16 = vpack.c.bf16 %v4543_v14, %v4541_v38  ;;  %v4581_v38 = vld [vmem:[#allocation16 + $0x300] sm:$0xff]  ;;  %v4586_v14 = vld [vmem:[#allocation16 + $0x328] sm:$0xff] }
 0x946   : > { %6567 = vmatprep.subr.bf16.mxu1 %v6566_v58  ;;  %v6662_v58 = vpack.c.bf16 %v4548_v15, %v4546_v4  ;;  %v4588_v4 = vld [vmem:[#allocation16 + $0x338] sm:$0xff]  ;;  %v6700_v15 = vpack.c.bf16 %v4583_v12, %v4581_v38  ;;  %v4425_v38 = vld [vmem:[#allocation16 + $0x88] sm:$0xff] }
 0x947   : > { %6661 = vmatpush1.bf16.msra.mxu0 %v6660_v16  ;;  %v6702_v16 = vpack.c.bf16 %v4588_v4, %v4586_v14  ;;  %v4427_v12 = vld [vmem:[#allocation16 + $0x98] sm:$0xff] }
 0x948   : > { %6663 = vmatprep.subr.bf16.mxu0 %v6662_v58  ;;  %v4585_v58 = vld [vmem:[#allocation16 + $0x320] sm:$0xff]  ;;  %v6730_v4 = vpack.c.bf16 %v4427_v12, %v4425_v38  ;;  %v4462_v38 = vld [vmem:[#allocation16 + $0x1b0] sm:$0xff]  ;;  %v4823_v12 = vld [vmem:[#allocation16 + $0x388] sm:$0xff] }
 0x949   : > { %6569 = vmatpush1.bf16.msra.mxu1 %v6568_v21  ;;  %v6664_v21 = vpack.c.bf16 %v4547_v2, %v4545_v17  ;;  %v4587_v17 = vld [vmem:[#allocation16 + $0x330] sm:$0xff]  ;;  %v4590_v2 = vld [vmem:[#allocation16 + $0x348] sm:$0xff] }
 0x94a   : > { %6571 = vmatprep.subr.bf16.mxu1 %v6570_v22  ;;  %v4549_v22 = vld [vmem:[#allocation16 + $0x200] sm:$0xff] }
 0x94b   : > { %6665 = vmatpush1.bf16.msra.mxu0 %v6664_v21  ;;  %v6668_v27 = vpack.c.bf16 %v4551_v23, %v4549_v22  ;;  %v4591_v22 = vld [vmem:[#allocation16 + $0x350] sm:$0xff] }
 0x94d   : > { %6573 = vmatpush1.bf16.msra.mxu1 %v6572_v28  ;;  %v6670_v28 = vpack.c.bf16 %v4556_v26, %v4554_v25  ;;  %v4170_v25 = vld [vmem:[%s9727_s14] sm:$0x3] }
 0x94e   : > { %6575 = vmatprep.subr.bf16.mxu1 %v6574_v31  ;;  %v4553_v31 = vld [vmem:[#allocation16 + $0x220] sm:$0xff]  ;;  %v4175_v26 = vrot.slane %v4170_v25, %v8342_v32 }
 0x94f   : > { %v6672_v39 = vpack.c.bf16 %v4555_v46, %v4553_v31 }
 0x951   : > { %6577 = vmatpush1.bf16.msra.mxu1 %v6576_v57  ;;  %v6674_v57 = vpack.c.bf16 %v4560_v36, %v4558_v35 }
 0x952   : > { %6579 = vmatprep.subr.bf16.mxu1 %v6578_v40  ;;  %v4557_v40 = vld [vmem:[#allocation16 + $0x240] sm:$0xff] }
 0x953   : > { %v6676_v24 = vpack.c.bf16 %v4559_v43, %v4557_v40  ;;  %v5751_v40 = vld [vmem:[%s9730_s17 + $0x8] sm:$0x7f]  ;;  %v5757_v43 = vld [vmem:[%s9730_s17 + $0x10] sm:$0x7f] }
 0x955   : > { %6581 = vmatpush1.bf16.msra.mxu1 %v6580_v60  ;;  %v6678_v60 = vpack.c.bf16 %v4564_v45, %v4562_v44  ;;  %v4594_v44 = vld [vmem:[#allocation16 + $0x368] sm:$0xff]  ;;  %v4596_v45 = vld [vmem:[#allocation16 + $0x378] sm:$0xff] }
 0x956   : > { %6583 = vmatprep.subr.bf16.mxu1 %v6582_v54  ;;  %v4561_v54 = vld [vmem:[#allocation16 + $0x260] sm:$0xff] }
 0x957   : > { %v6680_v47 = vpack.c.bf16 %v4563_v51, %v4561_v54  ;;  %v4595_v54 = vld [vmem:[#allocation16 + $0x370] sm:$0xff] }
 0x959   : > { %6585 = vmatpush1.bf16.msra.mxu1 %v6584_v48  ;;  %v6682_v48 = vpack.c.bf16 %v4568_v13, %v4566_v55  ;;  %v4409_v55 = vld [vmem:[#allocation16 + $0x8] sm:$0xff]  ;;  %v4411_v13 = vld [vmem:[#allocation16 + $0x18] sm:$0xff] }
 0x95a   : > { %6587 = vmatprep.subr.bf16.mxu1 %v6586_v50  ;;  %v4565_v50 = vld [vmem:[#allocation16 + $0x280] sm:$0xff] }
 0x95b   : > { %v6684_v33 = vpack.c.bf16 %v4567_v5, %v4565_v50  ;;  %v4408_v5 = vld [vmem:[#allocation16] sm:$0xff] }
 0x95d   : > { %6589 = vmatpush1.bf16.msra.mxu1 %v6588_v52  ;;  %v6686_v52 = vpack.c.bf16 %v4572_v41, %v4570_v53  ;;  %v4410_v53 = vld [vmem:[#allocation16 + $0x10] sm:$0xff]  ;;  %v4413_v41 = vld [vmem:[#allocation16 + $0x28] sm:$0xff] }
 0x95e   : > { %6591 = vmatprep.subr.bf16.mxu1 %v6590_v62  ;;  %v4569_v62 = vld [vmem:[#allocation16 + $0x2a0] sm:$0xff] }
 0x95f   : > { %v6688_v7 = vpack.c.bf16 %v4571_v56, %v4569_v62 }
 0x961   : > { %6593 = vmatpush1.bf16.msra.mxu1 %v6592_v9  ;;  %v6690_v9 = vpack.c.bf16 %v4576_v8, %v4574_v30  ;;  %v4412_v30 = vld [vmem:[#allocation16 + $0x20] sm:$0xff]  ;;  %v4414_v8 = vld [vmem:[#allocation16 + $0x30] sm:$0xff] }
 0x962   : > { %6595 = vmatprep.subr.bf16.mxu1 %v6594_v59  ;;  %v4573_v59 = vld [vmem:[#allocation16 + $0x2c0] sm:$0xff] }
 0x963   : > { %v6692_v18 = vpack.c.bf16 %v4575_v11, %v4573_v59  ;;  %v6720_v59 = vpack.c.bf16 %v4414_v8, %v4412_v30  ;;  %v4452_v8 = vld [vmem:[#allocation16 + $0x160] sm:$0xff] }
 0x965   : > { %6597 = vmatpush1.bf16.msra.mxu1 %v6596_v42  ;;  %v6694_v42 = vpack.c.bf16 %v4580_v61, %v4578_v10  ;;  %v4416_v61 = vld [vmem:[#allocation16 + $0x40] sm:$0xff] }
 0x966   : > { %6599 = vmatprep.subr.bf16.mxu1 %v6598_v3  ;;  %v4577_v3 = vld [vmem:[#allocation16 + $0x2e0] sm:$0xff] }
 0x967   : > { %v6696_v6 = vpack.c.bf16 %v4579_v63, %v4577_v3  ;;  %v4421_v3 = vld [vmem:[#allocation16 + $0x68] sm:$0xff]  ;;  %v4423_v63 = vld [vmem:[#allocation16 + $0x78] sm:$0xff] }
 0x969   : > { %6601 = vmatpush1.bf16.msra.mxu1 %v6600_v0  ;;  %v4584_v0 = vld [vmem:[#allocation16 + $0x318] sm:$0xff] }
 0x96a   : > { %v6698_v29 = vpack.c.bf16 %v4584_v0, %v4582_v49  ;;  %v6726_v0 = vpack.c.bf16 %v4423_v63, %v4421_v3  ;;  %v4458_v3 = vld [vmem:[#allocation16 + $0x190] sm:$0xff]  ;;  %v4461_v63 = vld [vmem:[#allocation16 + $0x1a8] sm:$0xff] }
 0x96c   : > { %4162 = vmatmul.mubr.f32.vlgmr.msra.gmra.mrb[50].mxu1 %v9209_v37  ;;  %v6666_v37 = vpack.c.bf16 %v4552_v20, %v4550_v19  ;;  %v4592_v19 = vld [vmem:[#allocation16 + $0x358] sm:$0xff]  ;;  %v6704_v20 = vpack.c.bf16 %v4587_v17, %v4585_v58  ;;  %v4429_v58 = vld [vmem:[#allocation16 + $0xa8] sm:$0xff] }
 0x96d   : > { %4401 = vmatprep.mubr.f32.mxu1 %v7428_v1  ;;  %v6706_v21 = vpack.c.bf16 %v4592_v19, %v4590_v2  ;;  %v4431_v17 = vld [vmem:[#allocation16 + $0xb8] sm:$0xff] }
 0x96e   : > { %6667 = vmatprep.subr.bf16.mxu0 %v6666_v37  ;;  %v4589_v37 = vld [vmem:[#allocation16 + $0x340] sm:$0xff]  ;;  %v6734_v19 = vpack.c.bf16 %v4431_v17, %v4429_v58  ;;  %v4824_v58 = vld [vmem:[#allocation16 + $0x390] sm:$0xff]  ;;  %v4827_v17 = vld [vmem:[#allocation16 + $0x3a8] sm:$0xff] }
 0x96f   : > { %6669 = vmatpush1.bf16.msra.mxu0 %v6668_v27  ;;  %v6708_v23 = vpack.c.bf16 %v4591_v22, %v4589_v37  ;;  %v4179_v27 = vrot.slane %v4170_v25, %v8347_v34  ;;  %v4433_v37 = vld [vmem:[#allocation16 + $0xc8] sm:$0xff]  ;;  %v4435_v22 = vld [vmem:[#allocation16 + $0xd8] sm:$0xff] }
 0x970   : > { %6671 = vmatprep.subr.bf16.mxu0 %v6670_v28  ;;  %v6738_v25 = vpack.c.bf16 %v4435_v22, %v4433_v37  ;;  %v4828_v37 = vld [vmem:[#allocation16 + $0x3b0] sm:$0xff]  ;;  %v4831_v22 = vld [vmem:[#allocation16 + $0x3c8] sm:$0xff] }
 0x973   : > { %6673 = vmatpush1.bf16.msra.mxu0 %v6672_v39 }
 0x974   : > { %6675 = vmatprep.subr.bf16.mxu0 %v6674_v57  ;;  %v4325_v57 = vld [vmem:[%s9730_s17] sm:$0x7f] }
 0x977   : > { %6677 = vmatpush1.bf16.msra.mxu0 %v6676_v24  ;;  %v6710_v24 = vpack.c.bf16 %v4596_v45, %v4594_v44  ;;  %v4440_v45 = vld [vmem:[#allocation16 + $0x100] sm:$0xff] }
 0x978   : > { %6679 = vmatprep.subr.bf16.mxu0 %v6678_v60  ;;  %v4593_v60 = vld [vmem:[#allocation16 + $0x360] sm:$0xff] }
 0x979   : > { %v6712_v51 = vpack.c.bf16 %v4595_v54, %v4593_v60  ;;  %v4445_v60 = vld [vmem:[#allocation16 + $0x128] sm:$0xff]  ;;  %v4447_v54 = vld [vmem:[#allocation16 + $0x138] sm:$0xff] }
 0x97b   : > { %6681 = vmatpush1.bf16.msra.mxu0 %v6680_v47  ;;  %v6714_v47 = vpack.c.bf16 %v4411_v13, %v4409_v55  ;;  %v6750_v55 = vpack.c.bf16 %v4447_v54, %v4445_v60  ;;  %v4444_v13 = vld [vmem:[#allocation16 + $0x120] sm:$0xff]  ;;  %v4845_v60 = vld [vmem:[#allocation16 + $0x438] sm:$0xff] }
 0x97c   : > { %6683 = vmatprep.subr.bf16.mxu0 %v6682_v48 }
 0x97f   : > { %6685 = vmatpush1.bf16.msra.mxu0 %v6684_v33  ;;  %v4415_v33 = vld [vmem:[#allocation16 + $0x38] sm:$0xff] }
 0x980   : > { %6687 = vmatprep.subr.bf16.mxu0 %v6686_v52  ;;  %v6716_v52 = vpack.c.bf16 %v4410_v53, %v4408_v5  ;;  %v6718_v56 = vpack.c.bf16 %v4415_v33, %v4413_v41  ;;  %v4451_v5 = vld [vmem:[#allocation16 + $0x158] sm:$0xff]  ;;  %v4448_v33 = vld [vmem:[#allocation16 + $0x140] sm:$0xff] }
 0x983   : > { %6689 = vmatpush1.bf16.msra.mxu0 %v6688_v7  ;;  %v4417_v7 = vld [vmem:[#allocation16 + $0x48] sm:$0xff] }
 0x984   : > { %6691 = vmatprep.subr.bf16.mxu0 %v6690_v9  ;;  %v4419_v9 = vld [vmem:[#allocation16 + $0x58] sm:$0xff] }
 0x985   : > { %v6722_v10 = vpack.c.bf16 %v4419_v9, %v4417_v7  ;;  %v4454_v7 = vld [vmem:[#allocation16 + $0x170] sm:$0xff]  ;;  %v4457_v9 = vld [vmem:[#allocation16 + $0x188] sm:$0xff] }
 0x987   : > { %6693 = vmatpush1.bf16.msra.mxu0 %v6692_v18  ;;  %v4418_v18 = vld [vmem:[#allocation16 + $0x50] sm:$0xff] }
 0x988   : > { %6695 = vmatprep.subr.bf16.mxu0 %v6694_v42  ;;  %v6724_v49 = vpack.c.bf16 %v4418_v18, %v4416_v61  ;;  %v4456_v18 = vld [vmem:[#allocation16 + $0x180] sm:$0xff] }
 0x98b   : > { %6697 = vmatpush1.bf16.msra.mxu0 %v6696_v6  ;;  %v4420_v6 = vld [vmem:[#allocation16 + $0x60] sm:$0xff] }
 0x98c   : > { %6699 = vmatprep.subr.bf16.mxu0 %v6698_v29  ;;  %v4422_v29 = vld [vmem:[#allocation16 + $0x70] sm:$0xff] }
 0x98d   : > { %v6728_v14 = vpack.c.bf16 %v4422_v29, %v4420_v6  ;;  %v4460_v29 = vld [vmem:[#allocation16 + $0x1a0] sm:$0xff] }
 0x98f   : > { %6701 = vmatpush1.bf16.msra.mxu0 %v6700_v15  ;;  %v4424_v15 = vld [vmem:[#allocation16 + $0x80] sm:$0xff] }
 0x990   : > { %6703 = vmatprep.subr.bf16.mxu0 %v6702_v16  ;;  %v4426_v16 = vld [vmem:[#allocation16 + $0x90] sm:$0xff] }
 0x991   : > { %v6732_v2 = vpack.c.bf16 %v4426_v16, %v4424_v15  ;;  %v4822_v16 = vld [vmem:[#allocation16 + $0x380] sm:$0xff] }
 0x993   : > { %6705 = vmatpush1.bf16.msra.mxu0 %v6704_v20  ;;  %v4428_v20 = vld [vmem:[#allocation16 + $0xa0] sm:$0xff] }
 0x994   : > { %6707 = vmatprep.subr.bf16.mxu0 %v6706_v21  ;;  %v4430_v21 = vld [vmem:[#allocation16 + $0xb0] sm:$0xff] }
 0x997   : > { %6709 = vmatpush1.bf16.msra.mxu0 %v6708_v23  ;;  %v6736_v23 = vpack.c.bf16 %v4430_v21, %v4428_v20  ;;  %v4826_v21 = vld [vmem:[#allocation16 + $0x3a0] sm:$0xff] }
 0x998   : > { %6711 = vmatprep.subr.bf16.mxu0 %v6710_v24  ;;  %v4442_v24 = vld [vmem:[#allocation16 + $0x110] sm:$0xff] }
 0x99b   : > { %6713 = vmatpush1.bf16.msra.mxu0 %v6712_v51  ;;  %v6748_v51 = vpack.c.bf16 %v4442_v24, %v4440_v45  ;;  %v4838_v45 = vld [vmem:[#allocation16 + $0x400] sm:$0xff]  ;;  %v4843_v24 = vld [vmem:[#allocation16 + $0x428] sm:$0xff] }
 0x99c   : > { %6715 = vmatprep.subr.bf16.mxu0 %v6714_v47  ;;  %v4446_v47 = vld [vmem:[#allocation16 + $0x130] sm:$0xff] }
 0x99d   : > { %v6752_v53 = vpack.c.bf16 %v4446_v47, %v4444_v13  ;;  %v4844_v13 = vld [vmem:[#allocation16 + $0x430] sm:$0xff]  ;;  %v4847_v47 = vld [vmem:[#allocation16 + $0x448] sm:$0xff] }
 0xa3f   : > { %v4163_v28 = vpop.f32.mrb[50].mxu1 }
 0xa40   : > { %v4182_v31 = vadd.f32 %v4175_v26, %v4163_v28  ;;  %v4165_v46 = vpop.f32.mrb[51].mxu1  ;;  %v4432_v26 = vld [vmem:[#allocation16 + $0xc0] sm:$0xff]  ;;  %v4437_v28 = vld [vmem:[#allocation16 + $0xe8] sm:$0xff] }
 0xa41   : > { %v4183_v35 = vadd.f32 %v4179_v27, %v4165_v46  ;;  %v4434_v27 = vld [vmem:[#allocation16 + $0xd0] sm:$0xff] }
 0xa42   : > { %v4184_v39 = vmax.f32 %v4182_v31, 0.0  ;;  %v4439_v31 = vld [vmem:[#allocation16 + $0xf8] sm:$0xff]  ;;  %v6740_v46 = vpack.c.bf16 %v4434_v27, %v4432_v26  ;;  %v4830_v27 = vld [vmem:[#allocation16 + $0x3c0] sm:$0xff] }
 0xa43   : > { %v4185_v36 = vmax.f32 %v4183_v35, 0.0  ;;  %v6742_v35 = vpack.c.bf16 %v4439_v31, %v4437_v28  ;;  %v4832_v28 = vld [vmem:[#allocation16 + $0x3d0] sm:$0xff]  ;;  %v4835_v31 = vld [vmem:[#allocation16 + $0x3e8] sm:$0xff] }
 0xa45   : > { %5748 = vmatprep.subr.msk.mxu1 %vm4330_vm10, %v4185_v36 }
 0xa46   : > { %5749 = vmatpush1.msk.msra.mxu1 %vm4330_vm10, %v4184_v39 }
 0xa47   : > { %5750 = vmatmul.mubr.msk.f32.vlgmr.msra.gmra.mrb[52].mxu1 %vm4326_vm11, %v4325_v57  ;;  %5752 = vmatprep.subr.msk.mxu1 %vm4330_vm10, %v4185_v36  ;;  %v4441_v57 = vld [vmem:[#allocation16 + $0x108] sm:$0xff] }
 0xa48   : > { %5753 = vmatpush1.msk.msra.mxu1 %vm4330_vm10, %v4184_v39  ;;  %4533 = vmatprep.mubr.f32.mxu1 %v7428_v1 }
 0xa49   : > { %5758 = vmatprep.subr.msk.mxu1 %vm4330_vm10, %v4185_v36  ;;  %v4436_v36 = vld [vmem:[#allocation16 + $0xe0] sm:$0xff] }
 0xa4b   : > { %5754 = vmatmul.mubr.msk.f32.vlgmr.msra.gmra.mrb[54].mxu1 %vm4326_vm11, %v5751_v40  ;;  %v4443_v40 = vld [vmem:[#allocation16 + $0x118] sm:$0xff] }
 0xa4c   : > { %5759 = vmatpush1.msk.msra.mxu1 %vm4330_vm10, %v4184_v39  ;;  %4814 = vmatprep.mubr.f32.mxu1 %v7428_v1  ;;  %v4438_v39 = vld [vmem:[#allocation16 + $0xf0] sm:$0xff]  ;;  %v6746_v44 = vpack.c.bf16 %v4443_v40, %v4441_v57  ;;  %v4839_v40 = vld [vmem:[#allocation16 + $0x408] sm:$0xff] }
 0xa4d   : > { %v4836_v57 = vld [vmem:[#allocation16 + $0x3f0] sm:$0xff] }
 0xa4f   : > { %5760 = vmatmul.mubr.msk.f32.vlgmr.msra.gmra.mrb[56].mxu1 %vm4326_vm11, %v5757_v43  ;;  %v6744_v43 = vpack.c.bf16 %v4438_v39, %v4436_v36  ;;  %v4834_v39 = vld [vmem:[#allocation16 + $0x3e0] sm:$0xff] }
 0xa50   : > { %5046 = vmatprep.mubr.f32.mxu1 %v7428_v1 }
 0xb1a   : > { %v9550_v48 = vpop.f32.mrb[52].mxu1 }
 0xb1b   : > { %v4405_v50 = vpop.f32.mrb[53].mxu1 }
 0xb1e   : > { %v4535_v1 = vpop.f32.mrb[54].mxu1 }
 0xb1f   : > { %v4537_v62 = vpop.f32.mrb[55].mxu1 }
 0xb20   : > { %5755 = vmatprep.mubr.msk.f32.mxu0 %vm1094_vm1, %v4537_v62  ;;  %v4455_v62 = vld [vmem:[#allocation16 + $0x178] sm:$0xff] }
 0xb21   : > { %4665 = vmatmul.mubr.f32.vlgmr.msra.gmra.mrb[24].mxu0 %v4535_v1  ;;  %v4450_v1 = vld [vmem:[#allocation16 + $0x150] sm:$0xff] }
 0xb22   : > { %6717 = vmatpush1.bf16.msra.mxu0 %v6716_v52  ;;  %5756 = vmatprep.mubr.msk.f32.mxu0 %vm1094_vm1, %v4405_v50  ;;  %v9554_v11 = vpop.f32.mrb[56].mxu1  ;;  %v4449_v50 = vld [vmem:[#allocation16 + $0x148] sm:$0xff] }
 0xb23   : > { %6719 = vmatprep.subr.bf16.mxu0 %v6718_v56  ;;  %v9556_v42 = vpop.f32.mrb[57].mxu1  ;;  %v6754_v41 = vpack.c.bf16 %v4451_v5, %v4449_v50  ;;  %v4453_v52 = vld [vmem:[#allocation16 + $0x168] sm:$0xff]  ;;  %v6756_v56 = vpack.c.bf16 %v4450_v1, %v4448_v33  ;;  %v4849_v50 = vld [vmem:[#allocation16 + $0x458] sm:$0xff]  ;;  %v4848_v33 = vld [vmem:[#allocation16 + $0x450] sm:$0xff] }
 0xb24   : > { %v6758_v30 = vpack.c.bf16 %v4455_v62, %v4453_v52  ;;  %v4851_v1 = vld [vmem:[#allocation16 + $0x468] sm:$0xff]  ;;  %v4853_v52 = vld [vmem:[#allocation16 + $0x478] sm:$0xff] }
 0xb26   : > { %6721 = vmatpush1.bf16.msra.mxu0 %v6720_v59  ;;  %v4459_v59 = vld [vmem:[#allocation16 + $0x198] sm:$0xff] }
 0xb27   : > { %6723 = vmatprep.subr.bf16.mxu0 %v6722_v10  ;;  %v6760_v10 = vpack.c.bf16 %v4454_v7, %v4452_v8  ;;  %v6762_v61 = vpack.c.bf16 %v4459_v59, %v4457_v9  ;;  %v4852_v8 = vld [vmem:[#allocation16 + $0x470] sm:$0xff]  ;;  %v4855_v7 = vld [vmem:[#allocation16 + $0x488] sm:$0xff]  ;;  %v4857_v9 = vld [vmem:[#allocation16 + $0x498] sm:$0xff] }
 0xb2a   : > { %6725 = vmatpush1.bf16.msra.mxu0 %v6724_v49  ;;  %v4463_v49 = vld [vmem:[#allocation16 + $0x1b8] sm:$0xff] }
 0xb2b   : > { %6727 = vmatprep.subr.bf16.mxu0 %v6726_v0  ;;  %v6764_v0 = vpack.c.bf16 %v4458_v3, %v4456_v18  ;;  %v6766_v6 = vpack.c.bf16 %v4463_v49, %v4461_v63  ;;  %v4856_v18 = vld [vmem:[#allocation16 + $0x490] sm:$0xff]  ;;  %v4859_v3 = vld [vmem:[#allocation16 + $0x4a8] sm:$0xff]  ;;  %v4861_v63 = vld [vmem:[#allocation16 + $0x4b8] sm:$0xff] }
 0xb2e   : > { %6729 = vmatpush1.bf16.msra.mxu0 %v6728_v14  ;;  %v4825_v14 = vld [vmem:[#allocation16 + $0x398] sm:$0xff] }
 0xb2f   : > { %6731 = vmatprep.subr.bf16.mxu0 %v6730_v4  ;;  %v6768_v4 = vpack.c.bf16 %v4462_v38, %v4460_v29  ;;  %v6770_v15 = vpack.c.bf16 %v4825_v14, %v4823_v12  ;;  %v4860_v29 = vld [vmem:[#allocation16 + $0x4b0] sm:$0xff]  ;;  %v4863_v38 = vld [vmem:[#allocation16 + $0x4c8] sm:$0xff]  ;;  %v4865_v12 = vld [vmem:[#allocation16 + $0x4d8] sm:$0xff] }
 0xb32   : > { %6733 = vmatpush1.bf16.msra.mxu0 %v6732_v2  ;;  %v4829_v2 = vld [vmem:[#allocation16 + $0x3b8] sm:$0xff] }
 0xb33   : > { %6735 = vmatprep.subr.bf16.mxu0 %v6734_v19  ;;  %v6772_v19 = vpack.c.bf16 %v4824_v58, %v4822_v16  ;;  %v6774_v20 = vpack.c.bf16 %v4829_v2, %v4827_v17  ;;  %v4864_v16 = vld [vmem:[#allocation16 + $0x4d0] sm:$0xff]  ;;  %v4867_v58 = vld [vmem:[#allocation16 + $0x4e8] sm:$0xff]  ;;  %v4869_v17 = vld [vmem:[#allocation16 + $0x4f8] sm:$0xff] }
 0xb36   : > { %6737 = vmatpush1.bf16.msra.mxu0 %v6736_v23  ;;  %v4833_v23 = vld [vmem:[#allocation16 + $0x3d8] sm:$0xff] }
 0xb37   : > { %6739 = vmatprep.subr.bf16.mxu0 %v6738_v25  ;;  %v6776_v25 = vpack.c.bf16 %v4828_v37, %v4826_v21  ;;  %v6778_v26 = vpack.c.bf16 %v4833_v23, %v4831_v22  ;;  %v4868_v21 = vld [vmem:[#allocation16 + $0x4f0] sm:$0xff]  ;;  %v4871_v37 = vld [vmem:[#allocation16 + $0x508] sm:$0xff]  ;;  %v4873_v22 = vld [vmem:[#allocation16 + $0x518] sm:$0xff] }
 0xb3a   : > { %6741 = vmatpush1.bf16.msra.mxu0 %v6740_v46  ;;  %v4837_v46 = vld [vmem:[#allocation16 + $0x3f8] sm:$0xff] }
 0xb3b   : > { %6743 = vmatprep.subr.bf16.mxu0 %v6742_v35  ;;  %v6780_v35 = vpack.c.bf16 %v4832_v28, %v4830_v27  ;;  %v6782_v36 = vpack.c.bf16 %v4837_v46, %v4835_v31  ;;  %v4872_v27 = vld [vmem:[#allocation16 + $0x510] sm:$0xff]  ;;  %v4875_v28 = vld [vmem:[#allocation16 + $0x528] sm:$0xff]  ;;  %v4877_v31 = vld [vmem:[#allocation16 + $0x538] sm:$0xff] }
 0xb3e   : > { %6745 = vmatpush1.bf16.msra.mxu0 %v6744_v43  ;;  %v4841_v43 = vld [vmem:[#allocation16 + $0x418] sm:$0xff] }
 0xb3f   : > { %6747 = vmatprep.subr.bf16.mxu0 %v6746_v44  ;;  %v6786_v44 = vpack.c.bf16 %v4841_v43, %v4839_v40  ;;  %v4242_v40 = vld [vmem:[%s9729_s16] sm:$0x3] }
 0xb40   : > { %v4954_v43 = vld [vmem:[%s9825_s29] sm:$0x3]  ;;  %s5170_s29 = sshll.u32 %s831_s7, 4  ;;  %s9673_s29 = int_to_ptr.vmem [resolvable:$true] %s5170_s29 }
 0xb41   : > { %s7331_s19 = scalar_lea.vmem %s9673_s29, 16 }
 0xb42   : > { %6749 = vmatpush1.bf16.msra.mxu0 %v6748_v51  ;;  %v6790_v51 = vpack.c.bf16 %v4845_v60, %v4843_v24  ;;  %v4963_v24 = vrot.slane %v4954_v43, %v8347_v34  ;;  %p7332_p6 = scmp.ne.s32.totalorder %s9673_s29, %s7331_s19 }
 0xb43   : > { %6751 = vmatprep.subr.bf16.mxu0 %v6750_v55  ;;  %v4842_v55 = vld [vmem:[#allocation16 + $0x420] sm:$0xff] }
 0xb44   : > { %v6792_v5 = vpack.c.bf16 %v4844_v13, %v4842_v55  ;;  %v5053_v13 = vld [vmem:[%s9826_s20] sm:$0xff]  ;;  %p7333_p5 = pnand %p7332_p6, %p9832_p9 }
 0xb46   : > { %6753 = vmatpush1.bf16.msra.mxu0 %v6752_v53  ;;  %v6794_v53 = vpack.c.bf16 %v4849_v50, %v4847_v47  ;;  %v5054_v47 = vld [vmem:[%s9826_s20 + $0x8] sm:$0xff]  ;;  %p7334_p0 = pneg %p7333_p5 }
 0xb47   : > { %6755 = vmatprep.subr.bf16.mxu0 %v6754_v41  ;;  %v4846_v41 = vld [vmem:[#allocation16 + $0x440] sm:$0xff] }
 0xb48   : > { %v6796_v62 = vpack.c.bf16 %v4848_v33, %v4846_v41  ;;  %v5056_v41 = vld [vmem:[%s9826_s20 + $0x18] sm:$0xff]  ;;  %v7430_v33 = vmov 0.0|0.0  }
 0xb4a   : > { %6757 = vmatpush1.bf16.msra.mxu0 %v6756_v56  ;;  %v6798_v56 = vpack.c.bf16 %v4853_v52, %v4851_v1  ;;  %v5057_v52 = vld [vmem:[%s9826_s20 + $0x20] sm:$0xff] }
 0xb4b   : > { %6759 = vmatprep.subr.bf16.mxu0 %v6758_v30  ;;  %v4850_v30 = vld [vmem:[#allocation16 + $0x460] sm:$0xff] }
 0xb4c   : > { %v6800_v59 = vpack.c.bf16 %v4852_v8, %v4850_v30  ;;  %v5059_v30 = vld [vmem:[%s9826_s20 + $0x30] sm:$0xff]  ;;  %v5060_v8 = vld [vmem:[%s9826_s20 + $0x38] sm:$0xff] }
 0xb4e   : > { %6761 = vmatpush1.bf16.msra.mxu0 %v6760_v10  ;;  %v6802_v10 = vpack.c.bf16 %v4857_v9, %v4855_v7  ;;  %v6836_v7 = vpack.c.bf16 %v5060_v8, %v5059_v30  ;;  %v5061_v9 = vld [vmem:[%s9826_s20 + $0x40] sm:$0xff] }
 0xb4f   : > { %6763 = vmatprep.subr.bf16.mxu0 %v6762_v61  ;;  %v4854_v61 = vld [vmem:[#allocation16 + $0x480] sm:$0xff] }
 0xb50   : > { %v6804_v49 = vpack.c.bf16 %v4856_v18, %v4854_v61  ;;  %v5063_v61 = vld [vmem:[%s9826_s20 + $0x50] sm:$0xff]  ;;  %v5064_v18 = vld [vmem:[%s9826_s20 + $0x58] sm:$0xff] }
 0xb52   : > { %6765 = vmatpush1.bf16.msra.mxu0 %v6764_v0  ;;  %v6806_v0 = vpack.c.bf16 %v4861_v63, %v4859_v3  ;;  %v6842_v3 = vpack.c.bf16 %v5064_v18, %v5063_v61  ;;  %v5065_v63 = vld [vmem:[%s9826_s20 + $0x60] sm:$0xff] }
 0xb53   : > { %6767 = vmatprep.subr.bf16.mxu0 %v6766_v6  ;;  %v4858_v6 = vld [vmem:[#allocation16 + $0x4a0] sm:$0xff] }
 0xb54   : > { %v6808_v14 = vpack.c.bf16 %v4860_v29, %v4858_v6  ;;  %v5067_v6 = vld [vmem:[%s9826_s20 + $0x70] sm:$0xff]  ;;  %v5068_v29 = vld [vmem:[%s9826_s20 + $0x78] sm:$0xff] }
 0xb56   : > { %6769 = vmatpush1.bf16.msra.mxu0 %v6768_v4  ;;  %v6810_v4 = vpack.c.bf16 %v4865_v12, %v4863_v38  ;;  %v6848_v38 = vpack.c.bf16 %v5068_v29, %v5067_v6  ;;  %v5069_v12 = vld [vmem:[%s9826_s20 + $0x80] sm:$0xff] }
 0xb57   : > { %6771 = vmatprep.subr.bf16.mxu0 %v6770_v15  ;;  %v4862_v15 = vld [vmem:[#allocation16 + $0x4c0] sm:$0xff] }
 0xb58   : > { %v6812_v2 = vpack.c.bf16 %v4864_v16, %v4862_v15  ;;  %v5071_v15 = vld [vmem:[%s9826_s20 + $0x90] sm:$0xff]  ;;  %v5072_v16 = vld [vmem:[%s9826_s20 + $0x98] sm:$0xff] }
 0xb59   : > { %4739 = vmatmul.mubr.f32.vlgmr.msra.gmra.mrb[24].mxu0 %v9550_v48  ;;  %v6784_v48 = vpack.c.bf16 %v4836_v57, %v4834_v39  ;;  %v4876_v39 = vld [vmem:[#allocation16 + $0x530] sm:$0xff] }
 0xb5a   : > { %6773 = vmatpush1.bf16.msra.mxu0 %v6772_v19  ;;  %5761 = vmatprep.mubr.msk.f32.mxu0 %vm1094_vm1, %v9556_v42  ;;  %v4840_v42 = vld [vmem:[#allocation16 + $0x410] sm:$0xff]  ;;  %v6814_v19 = vpack.c.bf16 %v4869_v17, %v4867_v58  ;;  %v6854_v58 = vpack.c.bf16 %v5072_v16, %v5071_v15  ;;  %v5073_v17 = vld [vmem:[%s9826_s20 + $0xa0] sm:$0xff] }
 0xb5b   : > { %6775 = vmatprep.subr.bf16.mxu0 %v6774_v20  ;;  %v6788_v54 = vpack.c.bf16 %v4840_v42, %v4838_v45  ;;  %v4866_v20 = vld [vmem:[#allocation16 + $0x4e0] sm:$0xff]  ;;  %v4959_v45 = vrot.slane %v4954_v43, %v8342_v32 }
 0xb5c   : > { %v6816_v23 = vpack.c.bf16 %v4868_v21, %v4866_v20  ;;  %v5075_v20 = vld [vmem:[%s9826_s20 + $0xb0] sm:$0xff]  ;;  %v5076_v21 = vld [vmem:[%s9826_s20 + $0xb8] sm:$0xff] }
 0xb5e   : > { %6777 = vmatpush1.bf16.msra.mxu0 %v6776_v25  ;;  %v6818_v25 = vpack.c.bf16 %v4873_v22, %v4871_v37  ;;  %v6860_v37 = vpack.c.bf16 %v5076_v21, %v5075_v20  ;;  %v5077_v22 = vld [vmem:[%s9826_s20 + $0xc0] sm:$0xff] }
 0xb5f   : > { %6779 = vmatprep.subr.bf16.mxu0 %v6778_v26  ;;  %v4870_v26 = vld [vmem:[#allocation16 + $0x500] sm:$0xff] }
 0xb60   : > { %v6820_v46 = vpack.c.bf16 %v4872_v27, %v4870_v26  ;;  %v5079_v26 = vld [vmem:[%s9826_s20 + $0xd0] sm:$0xff]  ;;  %v5080_v27 = vld [vmem:[%s9826_s20 + $0xd8] sm:$0xff] }
 0xb62   : > { %6781 = vmatpush1.bf16.msra.mxu0 %v6780_v35  ;;  %v6822_v35 = vpack.c.bf16 %v4877_v31, %v4875_v28  ;;  %v6866_v28 = vpack.c.bf16 %v5080_v27, %v5079_v26 }
 0xb63   : > { %6783 = vmatprep.subr.bf16.mxu0 %v6782_v36  ;;  %v4874_v36 = vld [vmem:[#allocation16 + $0x520] sm:$0xff] }
 0xb64   : > { %v6824_v57 = vpack.c.bf16 %v4876_v39, %v4874_v36 }
 0xb66   : > { %6785 = vmatpush1.bf16.msra.mxu0 %v6784_v48  ;;  %v4247_v48 = vrot.slane %v4242_v40, %v8342_v32  ;;  %v4972_v32 = vld [vmem:[%s9827_s28] sm:$0x1]  ;;  %s7335_s28 = sshll.u32 %s7431_s5, 4  ;;  %s7336_s28 = int_to_ptr.vmem [resolvable:$false] %s7335_s28 }
 0xb67   : > { %6787 = vmatprep.subr.bf16.mxu0 %v6786_v44  ;;  %v4251_v44 = vrot.slane %v4242_v40, %v8347_v34  ;;  %v6827_v34 = vpack.c.bf16 %v5054_v47, %v5053_v13  ;;  %s7337_s24 = scalar_lea.vmem %s7336_s28, 32  ;;  %p7338_p10 = scmp.lt.s32.totalorder %s9673_s29, %s7336_s28 }
 0xb68   : > { %p7339_p2 = scmp.lt.s32.totalorder %s7337_s24, %s7331_s19 }
 0xb6a   : > { %6789 = vmatpush1.bf16.msra.mxu0 %v6788_v54  ;;  %p7340_p3 = por %p7339_p2, %p7338_p10 }
 0xb6b   : > { %6791 = vmatprep.subr.bf16.mxu0 %v6790_v51 }
 0xb6c   : > { %p7341_p4 = pnand %p7340_p3, %p7334_p0 }
 0xb6e   : > { %6793 = vmatpush1.bf16.msra.mxu0 %v6792_v5 }
 0xb6f   : > { %6795 = vmatprep.subr.bf16.mxu0 %v6794_v53  ;;  %v5055_v53 = vld [vmem:[%s9826_s20 + $0x10] sm:$0xff] }
 0xb70   : > { %v6830_v1 = vpack.c.bf16 %v5056_v41, %v5055_v53 }
 0xb72   : > { %6797 = vmatpush1.bf16.msra.mxu0 %v6796_v62  ;;  %v5058_v62 = vld [vmem:[%s9826_s20 + $0x28] sm:$0xff] }
 0xb73   : > { %6799 = vmatprep.subr.bf16.mxu0 %v6798_v56  ;;  %v6833_v56 = vpack.c.bf16 %v5058_v62, %v5057_v52 }
 0xb76   : > { %6801 = vmatpush1.bf16.msra.mxu0 %v6800_v59  ;;  %v5062_v59 = vld [vmem:[%s9826_s20 + $0x48] sm:$0xff] }
 0xb77   : > { %6803 = vmatprep.subr.bf16.mxu0 %v6802_v10  ;;  %v6839_v10 = vpack.c.bf16 %v5062_v59, %v5061_v9 }
 0xb7a   : > { %6805 = vmatpush1.bf16.msra.mxu0 %v6804_v49  ;;  %v5066_v49 = vld [vmem:[%s9826_s20 + $0x68] sm:$0xff] }
 0xb7b   : > { %6807 = vmatprep.subr.bf16.mxu0 %v6806_v0  ;;  %v6845_v0 = vpack.c.bf16 %v5066_v49, %v5065_v63 }
 0xb7e   : > { %6809 = vmatpush1.bf16.msra.mxu0 %v6808_v14  ;;  %v5070_v14 = vld [vmem:[%s9826_s20 + $0x88] sm:$0xff] }
 0xb7f   : > { %6811 = vmatprep.subr.bf16.mxu0 %v6810_v4  ;;  %v6851_v4 = vpack.c.bf16 %v5070_v14, %v5069_v12 }
 0xb82   : > { %6813 = vmatpush1.bf16.msra.mxu0 %v6812_v2  ;;  %v5074_v2 = vld [vmem:[%s9826_s20 + $0xa8] sm:$0xff] }
 0xb83   : > { %6815 = vmatprep.subr.bf16.mxu0 %v6814_v19  ;;  %v6857_v19 = vpack.c.bf16 %v5074_v2, %v5073_v17 }
 0xb86   : > { %6817 = vmatpush1.bf16.msra.mxu0 %v6816_v23  ;;  %v5078_v23 = vld [vmem:[%s9826_s20 + $0xc8] sm:$0xff] }
 0xb87   : > { %6819 = vmatprep.subr.bf16.mxu0 %v6818_v25  ;;  %v6863_v25 = vpack.c.bf16 %v5078_v23, %v5077_v22 }
 0xb8a   : > { %6821 = vmatpush1.bf16.msra.mxu0 %v6820_v46 }
 0xb8b   : > { %6823 = vmatprep.subr.bf16.mxu0 %v6822_v35  ;;  %v5081_v35 = vld [vmem:[%s9830_s21] sm:$0x1] }
 0xb8e   : > { %6825 = vmatpush1.bf16.msra.mxu0 %v6824_v57 }
 0xb91   : > { %4946 = vmatmul.mubr.f32.vlgmr.msra.gmra.mrb[24].mxu0 %v9554_v11 }
 0xc64   : > { %v4947_v42 = vpop.f32.mrb[24].mxu0 }
 0xc65   : > { %v6884_v60 = vadd.f32 %v4947_v42, %v4247_v48  ;;  %v4949_v54 = vpop.f32.mrb[25].mxu0 }
 0xc66   : > { %v6886_v11 = vadd.f32 %v4949_v54, %v4251_v44 }
 0xc67   : > { %v6885_v51 = vadd.f32 %v6884_v60, %v4959_v45 }
 0xc68   : > { %v6887_v55 = vadd.f32 %v6886_v11, %v4963_v24 }
 0xc69   : > { %v4970_v5 = vmax.f32 %v6885_v51, 0.0 }
 0xc6a   : > { %v4971_v50 = vmax.f32 %v6887_v55, 0.0 }
 0xc6c   : > { %5762 = vmatprep.subr.msk.mxu1 %vm4330_vm10, %v4971_v50 }
 0xc6d   : > { %5763 = vmatpush1.msk.msra.mxu1 %vm4330_vm10, %v4970_v5 }
 0xc6e   : > { %5764 = vmatmul.mubr.msk.f32.vlgmr.msra.gmra.mrb[58].mxu1 %vm4326_vm11, %v4972_v32  ;;  %6826 = vmatprep.subr.bf16.mxu1 %v7430_v33 }
 0xc6f   : > { %6828 = vmatpush1.bf16.msra.mxu1 %v6827_v34 }
 0xc70   : > { %6829 = vmatprep.subr.bf16.mxu1 %v7430_v33 }
 0xc73   : > { %6831 = vmatpush1.bf16.msra.mxu1 %v6830_v1 }
 0xc74   : > { %6832 = vmatprep.subr.bf16.mxu1 %v7430_v33 }
 0xc77   : > { %6834 = vmatpush1.bf16.msra.mxu1 %v6833_v56 }
 0xc78   : > { %6835 = vmatprep.subr.bf16.mxu1 %v7430_v33 }
 0xc7b   : > { %6837 = vmatpush1.bf16.msra.mxu1 %v6836_v7 }
 0xc7c   : > { %6838 = vmatprep.subr.bf16.mxu1 %v7430_v33 }
 0xc7f   : > { %6840 = vmatpush1.bf16.msra.mxu1 %v6839_v10 }
 0xc80   : > { %6841 = vmatprep.subr.bf16.mxu1 %v7430_v33 }
 0xc83   : > { %6843 = vmatpush1.bf16.msra.mxu1 %v6842_v3 }
 0xc84   : > { %6844 = vmatprep.subr.bf16.mxu1 %v7430_v33 }
 0xc87   : > { %6846 = vmatpush1.bf16.msra.mxu1 %v6845_v0 }
 0xc88   : > { %6847 = vmatprep.subr.bf16.mxu1 %v7430_v33 }
 0xc8b   : > { %6849 = vmatpush1.bf16.msra.mxu1 %v6848_v38 }
 0xc8c   : > { %6850 = vmatprep.subr.bf16.mxu1 %v7430_v33 }
 0xc8f   : > { %6852 = vmatpush1.bf16.msra.mxu1 %v6851_v4 }
 0xc90   : > { %6853 = vmatprep.subr.bf16.mxu1 %v7430_v33 }
 0xc93   : > { %6855 = vmatpush1.bf16.msra.mxu1 %v6854_v58 }
 0xc94   : > { %6856 = vmatprep.subr.bf16.mxu1 %v7430_v33 }
 0xc97   : > { %6858 = vmatpush1.bf16.msra.mxu1 %v6857_v19 }
 0xc98   : > { %6859 = vmatprep.subr.bf16.mxu1 %v7430_v33 }
 0xc9b   : > { %6861 = vmatpush1.bf16.msra.mxu1 %v6860_v37 }
 0xc9c   : > { %6862 = vmatprep.subr.bf16.mxu1 %v7430_v33 }
 0xc9f   : > { %6864 = vmatpush1.bf16.msra.mxu1 %v6863_v25 }
 0xca0   : > { %6865 = vmatprep.subr.bf16.mxu1 %v7430_v33 }
 0xca3   : > { %6867 = vmatpush1.bf16.msra.mxu1 %v6866_v28 }
 0xd41   : > { %v5048_v31 = vpop.f32.mrb[58].mxu1 }
 0xd42   : > { %v5050_v46 = vpop.f32.mrb[59].mxu1 }
 0xd43   : > { %5765 = vmatprep.mubr.msk.f32.mxu1 %vm1094_vm1, %v5050_v46 }
 0xd44   : > { %5150 = vmatmul.mubr.f32.vlgmr.msra.gmra.mrb[60].mxu1 %v5048_v31 }
 0xe17   : > { %v5151_v36 = vpop.f32.mrb[60].mxu1 }
 0xe18   : > { %v5152_v39 = vadd.f32 %v5151_v36, %v5081_v35  ;;  %v5153_v57 = vpop.f32.mrb[61].mxu1 }
 0xe1a   : > { %5156 = vst.msk [vmem:[%s831_s7] sm:$0x1] %vm5155_vm12, %v5152_v39 }
 0xe1b   : > { %7344 = shalt.err (!%p7341_p4)
}
 0xe1c   : > { %s7345_s4 = scalar_lea.hbm %s9671_s23, 16  ;;  %s7349_s0 = scalar_lea.hbm %s9831_s2, 32 }
 0xe1d   : > { %p7346_p12 = scmp.ne.s32.totalorder %s9671_s23, %s7345_s4  ;;  %p7350_p11 = scmp.lt.u32.totalorder %s9671_s23, %s9831_s2 }
 0xe1e   : > { %p7351_p13 = scmp.lt.u32.totalorder %s7349_s0, %s7345_s4  ;;  %p7353_p6 = scmp.lt.u32.totalorder %s7345_s4, %s9671_s23 }
 0xe1f   : > { %p7347_p7 = pnand %p7346_p12, %p9832_p9 }
 0xe20   : > { %p7352_p1 = por %p7351_p13, %p7350_p11 }
 0xe21   : > { %p7348_p8 = pneg %p7347_p7 }
 0xe22   : > { %p7354_p5 = por %p7353_p6, %p7352_p1 }
 0xe24   : > { %p7355_p0 = pnand %p7354_p5, %p7348_p8 }
 0xe26   : > { %7358 = shalt.err (!%p7355_p0)
}
 0xe27   : > { %6978 = dma.vmem_to_hbm [thread:$0]  (%p9832_p9), %s9673_s29, 16, %s9671_s23, %s5158_s6  }
 0xe28 PF: > { %s9833_s7 = sld [smem:[#allocation27_spill]]  ;;  %s9834_s1 = sld [smem:[#allocation24_spill]] }
 0xe29   : > { %s9835_s9 = sld [smem:[#allocation31_spill]] }
 0xe2e   : > { %p7030_p10 = scmp.ge.s32.totalorder %s9833_s7, 2  ;;  %s5182_s19 = sand.u32 1, %s9834_s1  }
 0xe2f   : > { %p9836_p2 = scmp.ne.s32.totalorder %s9835_s9, 0  ;;  %s5183_s5 = scalar_lea.sflag [#allocation4], %s5182_s19 }
 0xe31   : > { %p7009_p3 = pnand %p7030_p10, %p9836_p2 }
 0xe33   : > { %7396 = dma.done.wait (!%p7009_p3), %s5183_s5, 16  }
 0xe34   : > { %7398 = vsyncadd (!%p7009_p3), %s5183_s5, 4294967280  ;;  %s9837_s25 = sld [smem:[#allocation28_spill]]  ;;  %s9838_s4 = sld [smem:[#allocation25_spill]] }
 0xe35   : > { %s9839_s30 = sld [smem:[#allocation26_spill]]  ;;  %s9840_s24 = sld [smem:[#allocation29_spill]] }
 0xe3a   : > { %p38_p4 = scmp.ge.s32.totalorder %s9837_s25, 4  }
 0xe3c   :  { %40 = sbr.rel (!%p38_p4) target bundleno = 24 (0x18), region = 208 }
 0xe43   :  { %5187 = vsyncpa [#allocation3], 1 }
 0xe44   :  { %5189 = vsyncpa [#allocation3 + $0x1], 1 }
 0xe45   :  { %5190 = vsyncpa [#allocation6], 1 }
 0xe46   :  { %5191 = vsyncpa [#allocation9], 1 }
 0xe47   :  { %5192 = vsyncpa [#allocation12], 1 }
 0xe48   :  { %5193 = vsyncpa [#allocation15], 1 }
 0xe49   :  { %5194 = vsyncpa [#allocation4], 1 }
 0xe4a   :  { %5196 = vsyncpa [#allocation4 + $0x1], 1 }

</bundles_post_ra>
